<compile_context>
chip_gen: v7x
topology: tpu7x:2x2x1
jax: 0.10.0
libtpu: 0.0.40
codegen_flags: <defaults>
</compile_context>

<pallas_src>
import jax
import jax.numpy as jnp
from jax.experimental import pallas as pl
from jax.experimental.pallas import tpu as pltpu

HIDDEN1 = 400
HIDDEN2 = 300
LSTM_H = 300
N_GATES = 4
GATE_PAD = 384                  # each gate padded to a 128-aligned lane width
GATES_W = N_GATES * GATE_PAD    # 1536


def _actor_seq_kernel(x_ref, w1_ref, b1_ref, w2_ref, b2_ref,
                      wih_ref, whh_ref, bl_ref, w3_ref, b3_ref,
                      hx0_ref, cx0_ref,
                      act_ref, hxo_ref, cxo_ref):
    f32 = jnp.float32
    bf16 = jnp.bfloat16
    t = pl.program_id(0)

    # Load initial hidden state into the resident output blocks (the carry).
    @pl.when(t == 0)
    def _():
        hxo_ref[...] = hx0_ref[...]
        cxo_ref[...] = cx0_ref[...]

    x = x_ref[0]                                            # (B, S) f32

    # fc1 + ReLU   (bf16 weights, f32 accumulation / elementwise)
    h1 = jnp.dot(x.astype(bf16), w1_ref[...],
                 preferred_element_type=f32) + b1_ref[...]
    h1 = jnp.maximum(h1, 0.0)

    # fc2 + ReLU
    h2 = jnp.dot(h1.astype(bf16), w2_ref[...],
                 preferred_element_type=f32) + b2_ref[...]
    h2 = jnp.maximum(h2, 0.0)

    # LSTMCell: all 4 gates from two lane-aligned fused matmuls + one fused bias.
    hx = hxo_ref[...]
    cx = cxo_ref[...]
    gates = (jnp.dot(h2.astype(bf16), wih_ref[...], preferred_element_type=f32)
             + jnp.dot(hx.astype(bf16), whh_ref[...], preferred_element_type=f32)
             + bl_ref[...])                                  # (B, 4*GATE_PAD) f32

    i_g = jax.nn.sigmoid(gates[:, 0 * GATE_PAD:0 * GATE_PAD + LSTM_H])
    f_g = jax.nn.sigmoid(gates[:, 1 * GATE_PAD:1 * GATE_PAD + LSTM_H])
    g_g = jnp.tanh(gates[:, 2 * GATE_PAD:2 * GATE_PAD + LSTM_H])
    o_g = jax.nn.sigmoid(gates[:, 3 * GATE_PAD:3 * GATE_PAD + LSTM_H])

    c_new = f_g * cx + i_g * g_g
    h_new = o_g * jnp.tanh(c_new)

    # fc3 + tanh
    out = jnp.dot(h_new.astype(bf16), w3_ref[...],
                  preferred_element_type=f32) + b3_ref[...]
    act_ref[0] = jnp.tanh(out)

    # Update the carried hidden state (written back to HBM once at end of grid).
    hxo_ref[...] = h_new
    cxo_ref[...] = c_new


def actor_forward_seq(xs, params, hidden_states):
    """Fused T-step recurrent forward. xs: (T, B, nb_states) f32.

    Returns (actions (T, B, nb_actions), (hx_T, cx_T)). Weights stay resident
    in VMEM across all T steps.
    """
    T, B, S = xs.shape
    A = params["w3"].shape[1]
    hx, cx = hidden_states

    x_map = lambda t: (t, 0, 0)
    const2 = lambda t: (0, 0)

    def full_spec(arr):
        nd = arr.ndim
        return pl.BlockSpec(arr.shape, lambda t, _nd=nd: (0,) * _nd)

    weight_names = ("w1", "b1", "w2", "b2", "w_ihf", "w_hhf", "b_lf", "w3", "b3")
    weights = tuple(params[k] for k in weight_names)

    in_specs = ([pl.BlockSpec((1, B, S), x_map)]
                + [full_spec(w) for w in weights]
                + [pl.BlockSpec((B, LSTM_H), const2),
                   pl.BlockSpec((B, LSTM_H), const2)])

    # Advisory cost hint for XLA scheduling around the custom call.
    flops = 2 * T * B * (S * HIDDEN1 + HIDDEN1 * HIDDEN2
                         + 2 * HIDDEN2 * GATES_W + LSTM_H * A)
    bytes_w = sum(int(w.size) * w.dtype.itemsize for w in weights)
    bytes_acc = (bytes_w + int(xs.size) * 4 + T * B * A * 4 + 4 * B * LSTM_H * 4)
    cost = pl.CostEstimate(flops=flops,
                           transcendentals=6 * T * B * LSTM_H,
                           bytes_accessed=bytes_acc)

    acts, hx_new, cx_new = pl.pallas_call(
        _actor_seq_kernel,
        grid=(T,),
        out_shape=(
            jax.ShapeDtypeStruct((T, B, A), jnp.float32),
            jax.ShapeDtypeStruct((B, LSTM_H), jnp.float32),
            jax.ShapeDtypeStruct((B, LSTM_H), jnp.float32),
        ),
        in_specs=in_specs,
        out_specs=(
            pl.BlockSpec((1, B, A), x_map),
            pl.BlockSpec((B, LSTM_H), const2),
            pl.BlockSpec((B, LSTM_H), const2),
        ),
        # Update hidden state in place (hx -> hx_out, cx -> cx_out).
        input_output_aliases={10: 1, 11: 2},
        compiler_params=pltpu.CompilerParams(
            dimension_semantics=("arbitrary",),
            vmem_limit_bytes=48 * 1024 * 1024),
        cost_estimate=cost,
    )(xs, *weights, hx, cx)
    return acts, (hx_new, cx_new)


def actor_forward(x, params, hidden_states):
    """Single-step forward matching Actor.forward(x, hidden_states)."""
    acts, (hx, cx) = actor_forward_seq(x[None], params, hidden_states)
    return acts[0], (hx, cx)


def init_actor_params(key, nb_states, nb_actions, init_w=0.003):
    """Deterministic parameter init mirroring Actor.__init__/init_weights shapes.

    Big matrices are stored in bf16 (fused, gate-padded LSTM layout); biases f32.
    """
    ks = jax.random.split(key, 10)

    def uniform(k, shape, bound):
        return jax.random.uniform(k, shape, jnp.float32, -bound, bound)

    bf16 = jnp.bfloat16

    # fc1: fanin_init over nb_states ; weight stored as (in, out)
    v1 = 1.0 / (nb_states ** 0.5)
    w1 = uniform(ks[0], (nb_states, HIDDEN1), v1).astype(bf16)
    b1 = uniform(ks[1], (1, HIDDEN1), v1)

    v2 = 1.0 / (HIDDEN1 ** 0.5)
    w2 = uniform(ks[2], (HIDDEN1, HIDDEN2), v2).astype(bf16)
    b2 = uniform(ks[3], (1, HIDDEN2), v2)

    # LSTMCell default init: U(-1/sqrt(hidden), 1/sqrt(hidden)); gate order [i,f,g,o]
    vl = 1.0 / (LSTM_H ** 0.5)
    w_ih = uniform(ks[4], (N_GATES, HIDDEN2, LSTM_H), vl)
    b_ih = uniform(ks[5], (N_GATES, 1, LSTM_H), vl)
    w_hh = uniform(ks[6], (N_GATES, LSTM_H, LSTM_H), vl)
    b_hh = uniform(ks[7], (N_GATES, 1, LSTM_H), vl)

    # Fused, gate-padded layout: gate g lives at lanes [g*GATE_PAD, g*GATE_PAD+LSTM_H).
    w_ihf = jnp.zeros((HIDDEN2, GATES_W), jnp.float32)
    w_hhf = jnp.zeros((LSTM_H, GATES_W), jnp.float32)
    b_lf = jnp.zeros((1, GATES_W), jnp.float32)
    for g in range(N_GATES):
        off = g * GATE_PAD
        w_ihf = w_ihf.at[:, off:off + LSTM_H].set(w_ih[g])
        w_hhf = w_hhf.at[:, off:off + LSTM_H].set(w_hh[g])
        b_lf = b_lf.at[:, off:off + LSTM_H].set(b_ih[g] + b_hh[g])
    w_ihf = w_ihf.astype(bf16)
    w_hhf = w_hhf.astype(bf16)

    # fc3: U(-init_w, init_w)
    w3 = uniform(ks[8], (LSTM_H, nb_actions), init_w).astype(bf16)
    b3 = uniform(ks[9], (1, nb_actions), vl)

    return dict(w1=w1, b1=b1, w2=w2, b2=b2,
                w_ihf=w_ihf, w_hhf=w_hhf, b_lf=b_lf,
                w3=w3, b3=b3)


# ----------------------------- pure-JAX reference -----------------------------

def actor_step_ref(x, p, hidden):
    """Pure-JAX reference with the same bf16-weight / f32-accumulate scheme."""
    hx, cx = hidden
    bf16, f32 = jnp.bfloat16, jnp.float32
    h1 = jnp.maximum(jnp.dot(x.astype(bf16), p["w1"],
                             preferred_element_type=f32) + p["b1"], 0.0)
    h2 = jnp.maximum(jnp.dot(h1.astype(bf16), p["w2"],
                             preferred_element_type=f32) + p["b2"], 0.0)
    gates = (jnp.dot(h2.astype(bf16), p["w_ihf"], preferred_element_type=f32)
             + jnp.dot(hx.astype(bf16), p["w_hhf"], preferred_element_type=f32)
             + p["b_lf"])
    i_g = jax.nn.sigmoid(gates[:, 0 * GATE_PAD:0 * GATE_PAD + LSTM_H])
    f_g = jax.nn.sigmoid(gates[:, 1 * GATE_PAD:1 * GATE_PAD + LSTM_H])
    g_g = jnp.tanh(gates[:, 2 * GATE_PAD:2 * GATE_PAD + LSTM_H])
    o_g = jax.nn.sigmoid(gates[:, 3 * GATE_PAD:3 * GATE_PAD + LSTM_H])
    c_new = f_g * cx + i_g * g_g
    h_new = o_g * jnp.tanh(c_new)
    out = jnp.tanh(jnp.dot(h_new.astype(bf16), p["w3"],
                           preferred_element_type=f32) + p["b3"])
    return out, (h_new, c_new)


def actor_seq_ref(xs, p, hidden):
    outs = []
    for t in range(xs.shape[0]):
        o, hidden = actor_step_ref(xs[t], p, hidden)
        outs.append(o)
    return jnp.stack(outs), hidden


if __name__ == "__main__":
    nb_states, nb_actions, batch, T = 32, 8, 2, 8

    key = jax.random.PRNGKey(0)
    k_params, k_x = jax.random.split(key)
    params = init_actor_params(k_params, nb_states, nb_actions)

    xs = jax.random.normal(k_x, (T, batch, nb_states), jnp.float32)
    hx0 = jnp.zeros((batch, LSTM_H), jnp.float32)
    cx0 = jnp.zeros((batch, LSTM_H), jnp.float32)

    # --- single-step forward (matches Actor.forward semantics) ---
    step_fn = jax.jit(actor_forward)
    out1, (hx1, cx1) = step_fn(xs[0], params, (hx0, cx0))
    jax.block_until_ready((out1, hx1, cx1))
    out1_r, (hx1_r, cx1_r) = actor_step_ref(xs[0], params, (hx0, cx0))
    assert jnp.allclose(out1, out1_r, atol=2e-2), "single-step action mismatch"
    assert jnp.allclose(hx1, hx1_r, atol=2e-2), "single-step hx mismatch"
    assert jnp.allclose(cx1, cx1_r, atol=2e-2), "single-step cx mismatch"

    # --- fused T-step rollout (weights resident in VMEM across the sequence) ---
    seq_fn = jax.jit(actor_forward_seq)
    outs, (hxT, cxT) = seq_fn(xs, params, (hx0, cx0))
    jax.block_until_ready((outs, hxT, cxT))
    outs_r, (hxT_r, cxT_r) = actor_seq_ref(xs, params, (hx0, cx0))
    assert jnp.allclose(outs, outs_r, atol=2e-2), "seq action mismatch"
    assert jnp.allclose(hxT, hxT_r, atol=2e-2), "seq hx mismatch"
    assert jnp.allclose(cxT, cxT_r, atol=2e-2), "seq cx mismatch"

    print("KERNEL_OK")
</pallas_src>

<mosaic_0001>
module attributes {stable_mosaic.version = 11 : i64} {
  func.func @_actor_seq_kernel(%arg0: i32, %arg1: memref<1x2x32xf32, #tpu.memory_space<vmem>>, %arg2: memref<32x400xbf16, #tpu.memory_space<vmem>>, %arg3: memref<1x400xf32, #tpu.memory_space<vmem>>, %arg4: memref<400x300xbf16, #tpu.memory_space<vmem>>, %arg5: memref<1x300xf32, #tpu.memory_space<vmem>>, %arg6: memref<300x1536xbf16, #tpu.memory_space<vmem>>, %arg7: memref<300x1536xbf16, #tpu.memory_space<vmem>>, %arg8: memref<1x1536xf32, #tpu.memory_space<vmem>>, %arg9: memref<300x8xbf16, #tpu.memory_space<vmem>>, %arg10: memref<1x8xf32, #tpu.memory_space<vmem>>, %arg11: memref<2x300xf32, #tpu.memory_space<vmem>>, %arg12: memref<2x300xf32, #tpu.memory_space<vmem>>, %arg13: memref<1x2x8xf32, #tpu.memory_space<vmem>>, %arg14: memref<2x300xf32, #tpu.memory_space<vmem>>, %arg15: memref<2x300xf32, #tpu.memory_space<vmem>>) attributes {dimension_semantics = [#tpu.dimension_semantics<arbitrary>], iteration_bounds = array<i64: 1>, scalar_prefetch = 0 : i64, scratch_operands = 0 : i64, tpu.core_type = #tpu.core_type<tc>, window_params = [{transform_indices = @transform_0, window_bounds = array<i64: 1, 2, 32>}, {pipeline_mode = #tpu.pipeline_mode<synchronous>, transform_indices = @transform_1, window_bounds = array<i64: 32, 400>}, {pipeline_mode = #tpu.pipeline_mode<synchronous>, transform_indices = @transform_2, window_bounds = array<i64: 1, 400>}, {pipeline_mode = #tpu.pipeline_mode<synchronous>, transform_indices = @transform_3, window_bounds = array<i64: 400, 300>}, {pipeline_mode = #tpu.pipeline_mode<synchronous>, transform_indices = @transform_4, window_bounds = array<i64: 1, 300>}, {pipeline_mode = #tpu.pipeline_mode<synchronous>, transform_indices = @transform_5, window_bounds = array<i64: 300, 1536>}, {pipeline_mode = #tpu.pipeline_mode<synchronous>, transform_indices = @transform_6, window_bounds = array<i64: 300, 1536>}, {pipeline_mode = #tpu.pipeline_mode<synchronous>, transform_indices = @transform_7, window_bounds = array<i64: 1, 1536>}, {pipeline_mode = #tpu.pipeline_mode<synchronous>, transform_indices = @transform_8, window_bounds = array<i64: 300, 8>}, {pipeline_mode = #tpu.pipeline_mode<synchronous>, transform_indices = @transform_9, window_bounds = array<i64: 1, 8>}, {pipeline_mode = #tpu.pipeline_mode<synchronous>, transform_indices = @transform_10, window_bounds = array<i64: 2, 300>}, {pipeline_mode = #tpu.pipeline_mode<synchronous>, transform_indices = @transform_11, window_bounds = array<i64: 2, 300>}, {transform_indices = @transform_12, window_bounds = array<i64: 1, 2, 8>}, {pipeline_mode = #tpu.pipeline_mode<synchronous>, transform_indices = @transform_13, window_bounds = array<i64: 2, 300>}, {pipeline_mode = #tpu.pipeline_mode<synchronous>, transform_indices = @transform_14, window_bounds = array<i64: 2, 300>}]} {
    %c0_i32 = arith.constant 0 : i32
    %0 = arith.cmpi eq, %arg0, %c0_i32 : i32
    %1 = arith.extui %0 : i1 to i32
    %c0_i32_0 = arith.constant 0 : i32
    %2 = arith.cmpi ne, %1, %c0_i32_0 : i32
    scf.if %2 {
      %c0_41 = arith.constant 0 : index
      %c0_42 = arith.constant 0 : index
      %70 = vector.load %arg11[%c0_41, %c0_42] : memref<2x300xf32, #tpu.memory_space<vmem>>, vector<2x300xf32>
      %c0_43 = arith.constant 0 : index
      %c0_44 = arith.constant 0 : index
      %71 = vector.load %arg14[%c0_43, %c0_44] : memref<2x300xf32, #tpu.memory_space<vmem>>, vector<2x300xf32>
      tpu.vector_store %arg14[%c0_43, %c0_44], %70 {strides = array<i32>} : memref<2x300xf32, #tpu.memory_space<vmem>>, vector<2x300xf32>,
      %c0_45 = arith.constant 0 : index
      %c0_46 = arith.constant 0 : index
      %72 = vector.load %arg12[%c0_45, %c0_46] : memref<2x300xf32, #tpu.memory_space<vmem>>, vector<2x300xf32>
      %c0_47 = arith.constant 0 : index
      %c0_48 = arith.constant 0 : index
      %73 = vector.load %arg15[%c0_47, %c0_48] : memref<2x300xf32, #tpu.memory_space<vmem>>, vector<2x300xf32>
      tpu.vector_store %arg15[%c0_47, %c0_48], %72 {strides = array<i32>} : memref<2x300xf32, #tpu.memory_space<vmem>>, vector<2x300xf32>,
    } else {
    }
    %c0 = arith.constant 0 : index
    %c0_1 = arith.constant 0 : index
    %c0_2 = arith.constant 0 : index
    %3 = vector.load %arg1[%c0, %c0_1, %c0_2] : memref<1x2x32xf32, #tpu.memory_space<vmem>>, vector<1x2x32xf32>
    %4 = vector.shape_cast %3 : vector<1x2x32xf32> to vector<2x32xf32>
    %5 = arith.truncf %4 : vector<2x32xf32> to vector<2x32xbf16>
    %c0_3 = arith.constant 0 : index
    %c0_4 = arith.constant 0 : index
    %6 = vector.load %arg2[%c0_3, %c0_4] : memref<32x400xbf16, #tpu.memory_space<vmem>>, vector<32x400xbf16>
    %cst = arith.constant dense<0.000000e+00> : vector<2x400xf32>
    %7 = tpu.matmul %5, %6, %cst {dimension_numbers = #tpu.dot_dimension_numbers<[1], [0], [0], [1], [0, 0, 1, 1], [], []>} : vector<2x32xbf16>, vector<32x400xbf16>, vector<2x400xf32> -> vector<2x400xf32>
    %c0_5 = arith.constant 0 : index
    %c0_6 = arith.constant 0 : index
    %8 = vector.load %arg3[%c0_5, %c0_6] : memref<1x400xf32, #tpu.memory_space<vmem>>, vector<1x400xf32>
    %9 = vector.broadcast %8 : vector<1x400xf32> to vector<2x400xf32>
    %10 = arith.addf %7, %9 : vector<2x400xf32>
    %cst_7 = arith.constant 0.000000e+00 : f32
    %11 = vector.broadcast %cst_7 : f32 to vector<2x400xf32>
    %12 = arith.maximumf %10, %11 : vector<2x400xf32>
    %13 = arith.truncf %12 : vector<2x400xf32> to vector<2x400xbf16>
    %c0_8 = arith.constant 0 : index
    %c0_9 = arith.constant 0 : index
    %14 = vector.load %arg4[%c0_8, %c0_9] : memref<400x300xbf16, #tpu.memory_space<vmem>>, vector<400x300xbf16>
    %cst_10 = arith.constant dense<0.000000e+00> : vector<2x300xf32>
    %15 = tpu.matmul %13, %14, %cst_10 {dimension_numbers = #tpu.dot_dimension_numbers<[1], [0], [0], [1], [0, 0, 1, 1], [], []>} : vector<2x400xbf16>, vector<400x300xbf16>, vector<2x300xf32> -> vector<2x300xf32>
    %c0_11 = arith.constant 0 : index
    %c0_12 = arith.constant 0 : index
    %16 = vector.load %arg5[%c0_11, %c0_12] : memref<1x300xf32, #tpu.memory_space<vmem>>, vector<1x300xf32>
    %17 = vector.broadcast %16 : vector<1x300xf32> to vector<2x300xf32>
    %18 = arith.addf %15, %17 : vector<2x300xf32>
    %cst_13 = arith.constant 0.000000e+00 : f32
    %19 = vector.broadcast %cst_13 : f32 to vector<2x300xf32>
    %20 = arith.maximumf %18, %19 : vector<2x300xf32>
    %c0_14 = arith.constant 0 : index
    %c0_15 = arith.constant 0 : index
    %21 = vector.load %arg14[%c0_14, %c0_15] : memref<2x300xf32, #tpu.memory_space<vmem>>, vector<2x300xf32>
    %c0_16 = arith.constant 0 : index
    %c0_17 = arith.constant 0 : index
    %22 = vector.load %arg15[%c0_16, %c0_17] : memref<2x300xf32, #tpu.memory_space<vmem>>, vector<2x300xf32>
    %23 = arith.truncf %20 : vector<2x300xf32> to vector<2x300xbf16>
    %c0_18 = arith.constant 0 : index
    %c0_19 = arith.constant 0 : index
    %24 = vector.load %arg6[%c0_18, %c0_19] : memref<300x1536xbf16, #tpu.memory_space<vmem>>, vector<300x1536xbf16>
    %cst_20 = arith.constant dense<0.000000e+00> : vector<2x1536xf32>
    %25 = tpu.matmul %23, %24, %cst_20 {dimension_numbers = #tpu.dot_dimension_numbers<[1], [0], [0], [1], [0, 0, 1, 1], [], []>} : vector<2x300xbf16>, vector<300x1536xbf16>, vector<2x1536xf32> -> vector<2x1536xf32>
    %26 = arith.truncf %21 : vector<2x300xf32> to vector<2x300xbf16>
    %c0_21 = arith.constant 0 : index
    %c0_22 = arith.constant 0 : index
    %27 = vector.load %arg7[%c0_21, %c0_22] : memref<300x1536xbf16, #tpu.memory_space<vmem>>, vector<300x1536xbf16>
    %cst_23 = arith.constant dense<0.000000e+00> : vector<2x1536xf32>
    %28 = tpu.matmul %26, %27, %cst_23 {dimension_numbers = #tpu.dot_dimension_numbers<[1], [0], [0], [1], [0, 0, 1, 1], [], []>} : vector<2x300xbf16>, vector<300x1536xbf16>, vector<2x1536xf32> -> vector<2x1536xf32>
    %29 = arith.addf %25, %28 : vector<2x1536xf32>
    %c0_24 = arith.constant 0 : index
    %c0_25 = arith.constant 0 : index
    %30 = vector.load %arg8[%c0_24, %c0_25] : memref<1x1536xf32, #tpu.memory_space<vmem>>, vector<1x1536xf32>
    %31 = vector.broadcast %30 : vector<1x1536xf32> to vector<2x1536xf32>
    %32 = arith.addf %29, %31 : vector<2x1536xf32>
    %33 = vector.extract_strided_slice %32 {offsets = [0, 0], sizes = [2, 300], strides = [1, 1]} : vector<2x1536xf32> to vector<2x300xf32>
    %34 = arith.negf %33 : vector<2x300xf32>
    %35 = math.exp %34 : vector<2x300xf32>
    %cst_26 = arith.constant 1.000000e+00 : f32
    %36 = vector.broadcast %cst_26 : f32 to vector<2x300xf32>
    %37 = arith.addf %36, %35 : vector<2x300xf32>
    %38 = arith.divf %36, %37 : vector<2x300xf32>
    %39 = vector.extract_strided_slice %32 {offsets = [0, 384], sizes = [2, 300], strides = [1, 1]} : vector<2x1536xf32> to vector<2x300xf32>
    %40 = arith.negf %39 : vector<2x300xf32>
    %41 = math.exp %40 : vector<2x300xf32>
    %cst_27 = arith.constant 1.000000e+00 : f32
    %42 = vector.broadcast %cst_27 : f32 to vector<2x300xf32>
    %43 = arith.addf %42, %41 : vector<2x300xf32>
    %44 = arith.divf %42, %43 : vector<2x300xf32>
    %45 = vector.extract_strided_slice %32 {offsets = [0, 768], sizes = [2, 300], strides = [1, 1]} : vector<2x1536xf32> to vector<2x300xf32>
    %46 = math.tanh %45 : vector<2x300xf32>
    %47 = vector.extract_strided_slice %32 {offsets = [0, 1152], sizes = [2, 300], strides = [1, 1]} : vector<2x1536xf32> to vector<2x300xf32>
    %48 = arith.negf %47 : vector<2x300xf32>
    %49 = math.exp %48 : vector<2x300xf32>
    %cst_28 = arith.constant 1.000000e+00 : f32
    %50 = vector.broadcast %cst_28 : f32 to vector<2x300xf32>
    %51 = arith.addf %50, %49 : vector<2x300xf32>
    %52 = arith.divf %50, %51 : vector<2x300xf32>
    %53 = arith.mulf %44, %22 : vector<2x300xf32>
    %54 = arith.mulf %38, %46 : vector<2x300xf32>
    %55 = arith.addf %53, %54 : vector<2x300xf32>
    %56 = math.tanh %55 : vector<2x300xf32>
    %57 = arith.mulf %52, %56 : vector<2x300xf32>
    %58 = arith.truncf %57 : vector<2x300xf32> to vector<2x300xbf16>
    %c0_29 = arith.constant 0 : index
    %c0_30 = arith.constant 0 : index
    %59 = vector.load %arg9[%c0_29, %c0_30] : memref<300x8xbf16, #tpu.memory_space<vmem>>, vector<300x8xbf16>
    %cst_31 = arith.constant dense<0.000000e+00> : vector<2x8xf32>
    %60 = tpu.matmul %58, %59, %cst_31 {dimension_numbers = #tpu.dot_dimension_numbers<[1], [0], [0], [1], [0, 0, 1, 1], [], []>} : vector<2x300xbf16>, vector<300x8xbf16>, vector<2x8xf32> -> vector<2x8xf32>
    %c0_32 = arith.constant 0 : index
    %c0_33 = arith.constant 0 : index
    %61 = vector.load %arg10[%c0_32, %c0_33] : memref<1x8xf32, #tpu.memory_space<vmem>>, vector<1x8xf32>
    %62 = vector.broadcast %61 : vector<1x8xf32> to vector<2x8xf32>
    %63 = arith.addf %60, %62 : vector<2x8xf32>
    %64 = math.tanh %63 : vector<2x8xf32>
    %c0_34 = arith.constant 0 : index
    %c0_35 = arith.constant 0 : index
    %c0_36 = arith.constant 0 : index
    %65 = vector.load %arg13[%c0_34, %c0_35, %c0_36] : memref<1x2x8xf32, #tpu.memory_space<vmem>>, vector<1x2x8xf32>
    %66 = vector.shape_cast %65 : vector<1x2x8xf32> to vector<2x8xf32>
    %67 = vector.shape_cast %64 : vector<2x8xf32> to vector<1x2x8xf32>
    tpu.vector_store %arg13[%c0_34, %c0_35, %c0_36], %67 {strides = array<i32>} : memref<1x2x8xf32, #tpu.memory_space<vmem>>, vector<1x2x8xf32>,
    %c0_37 = arith.constant 0 : index
    %c0_38 = arith.constant 0 : index
    %68 = vector.load %arg14[%c0_37, %c0_38] : memref<2x300xf32, #tpu.memory_space<vmem>>, vector<2x300xf32>
    tpu.vector_store %arg14[%c0_37, %c0_38], %57 {strides = array<i32>} : memref<2x300xf32, #tpu.memory_space<vmem>>, vector<2x300xf32>,
    %c0_39 = arith.constant 0 : index
    %c0_40 = arith.constant 0 : index
    %69 = vector.load %arg15[%c0_39, %c0_40] : memref<2x300xf32, #tpu.memory_space<vmem>>, vector<2x300xf32>
    tpu.vector_store %arg15[%c0_39, %c0_40], %55 {strides = array<i32>} : memref<2x300xf32, #tpu.memory_space<vmem>>, vector<2x300xf32>,
    return
  }
  func.func @transform_0(%arg0: i32) -> (i32, i32, i32) {
    %c0_i32 = arith.constant 0 : i32
    %c0_i32_0 = arith.constant 0 : i32
    %c0_i32_1 = arith.constant 0 : i32
    return %arg0, %c0_i32, %c0_i32_0 : i32, i32, i32
  }
  func.func @transform_1(%arg0: i32) -> (i32, i32) {
    %c0_i32 = arith.constant 0 : i32
    %c0_i32_0 = arith.constant 0 : i32
    %c0_i32_1 = arith.constant 0 : i32
    return %c0_i32, %c0_i32_0 : i32, i32
  }
  func.func @transform_2(%arg0: i32) -> (i32, i32) {
    %c0_i32 = arith.constant 0 : i32
    %c0_i32_0 = arith.constant 0 : i32
    %c0_i32_1 = arith.constant 0 : i32
    return %c0_i32, %c0_i32_0 : i32, i32
  }
  func.func @transform_3(%arg0: i32) -> (i32, i32) {
    %c0_i32 = arith.constant 0 : i32
    %c0_i32_0 = arith.constant 0 : i32
    %c0_i32_1 = arith.constant 0 : i32
    return %c0_i32, %c0_i32_0 : i32, i32
  }
  func.func @transform_4(%arg0: i32) -> (i32, i32) {
    %c0_i32 = arith.constant 0 : i32
    %c0_i32_0 = arith.constant 0 : i32
    %c0_i32_1 = arith.constant 0 : i32
    return %c0_i32, %c0_i32_0 : i32, i32
  }
  func.func @transform_5(%arg0: i32) -> (i32, i32) {
    %c0_i32 = arith.constant 0 : i32
    %c0_i32_0 = arith.constant 0 : i32
    %c0_i32_1 = arith.constant 0 : i32
    return %c0_i32, %c0_i32_0 : i32, i32
  }
  func.func @transform_6(%arg0: i32) -> (i32, i32) {
    %c0_i32 = arith.constant 0 : i32
    %c0_i32_0 = arith.constant 0 : i32
    %c0_i32_1 = arith.constant 0 : i32
    return %c0_i32, %c0_i32_0 : i32, i32
  }
  func.func @transform_7(%arg0: i32) -> (i32, i32) {
    %c0_i32 = arith.constant 0 : i32
    %c0_i32_0 = arith.constant 0 : i32
    %c0_i32_1 = arith.constant 0 : i32
    return %c0_i32, %c0_i32_0 : i32, i32
  }
  func.func @transform_8(%arg0: i32) -> (i32, i32) {
    %c0_i32 = arith.constant 0 : i32
    %c0_i32_0 = arith.constant 0 : i32
    %c0_i32_1 = arith.constant 0 : i32
    return %c0_i32, %c0_i32_0 : i32, i32
  }
  func.func @transform_9(%arg0: i32) -> (i32, i32) {
    %c0_i32 = arith.constant 0 : i32
    %c0_i32_0 = arith.constant 0 : i32
    %c0_i32_1 = arith.constant 0 : i32
    return %c0_i32, %c0_i32_0 : i32, i32
  }
  func.func @transform_10(%arg0: i32) -> (i32, i32) {
    %c0_i32 = arith.constant 0 : i32
    %c0_i32_0 = arith.constant 0 : i32
    %c0_i32_1 = arith.constant 0 : i32
    return %c0_i32, %c0_i32_0 : i32, i32
  }
  func.func @transform_11(%arg0: i32) -> (i32, i32) {
    %c0_i32 = arith.constant 0 : i32
    %c0_i32_0 = arith.constant 0 : i32
    %c0_i32_1 = arith.constant 0 : i32
    return %c0_i32, %c0_i32_0 : i32, i32
  }
  func.func @transform_12(%arg0: i32) -> (i32, i32, i32) {
    %c0_i32 = arith.constant 0 : i32
    %c0_i32_0 = arith.constant 0 : i32
    %c0_i32_1 = arith.constant 0 : i32
    return %arg0, %c0_i32, %c0_i32_0 : i32, i32, i32
  }
  func.func @transform_13(%arg0: i32) -> (i32, i32) {
    %c0_i32 = arith.constant 0 : i32
    %c0_i32_0 = arith.constant 0 : i32
    %c0_i32_1 = arith.constant 0 : i32
    return %c0_i32, %c0_i32_0 : i32, i32
  }
  func.func @transform_14(%arg0: i32) -> (i32, i32) {
    %c0_i32 = arith.constant 0 : i32
    %c0_i32_0 = arith.constant 0 : i32
    %c0_i32_1 = arith.constant 0 : i32
    return %c0_i32, %c0_i32_0 : i32, i32
  }
}

</mosaic_0001>

<bundles_post_ra>
// kernel: actor_forward.1
= control target key start
LH: loop header
LB: loop body
LE: loop exit
PB: predicated region body
PF: predicated region fallthrough
CT: control target
= control target key end

     0   :  { %20 = vsyncpa [#allocation3], 0  ;;  %s7417_s0 = inlined_call_operand.vmem [shape: f32[1,2,32], index: 0, kind: input, shape index: {}]   ;;  %s7418_s1 = inlined_call_operand.vmem [shape: bf16[32,400], index: 1, kind: input, shape index: {}]   ;;  %s7419_s2 = inlined_call_operand.vmem [shape: f32[1,400], index: 2, kind: input, shape index: {}]   ;;  %s7420_s3 = inlined_call_operand.hbm [shape: bf16[400,300], index: 3, kind: input, shape index: {}]   ;;  %s7421_s4 = inlined_call_operand.vmem [shape: f32[1,300], index: 4, kind: input, shape index: {}]   ;;  %s7422_s5 = inlined_call_operand.hbm [shape: bf16[300,1536], index: 5, kind: input, shape index: {}]   ;;  %s7423_s6 = inlined_call_operand.hbm [shape: bf16[300,1536], index: 6, kind: input, shape index: {}]   ;;  %s7424_s7 = inlined_call_operand.vmem [shape: f32[1,1536], index: 7, kind: input, shape index: {}]   ;;  %s7425_s8 = inlined_call_operand.vmem [shape: bf16[300,8], index: 8, kind: input, shape index: {}]   ;;  %s7426_s9 = inlined_call_operand.vmem [shape: f32[1,8], index: 9, kind: input, shape index: {}]   ;;  %s7427_s10 = inlined_call_operand.vmem [shape: f32[2,300], index: 10, kind: input, shape index: {}, may-alias: {10,13}]   ;;  %s7428_s11 = inlined_call_operand.vmem [shape: f32[2,300], index: 11, kind: input, shape index: {}, may-alias: {11,14}]   ;;  %s7429_s12 = inlined_call_operand.hbm [shape: f32[1,2,8], index: 12, kind: output, shape index: {0}]   ;;  %s7430_s13 = inlined_call_operand.vmem [shape: f32[2,300], index: 13, kind: output, shape index: {1}, may-alias: {10,13}]   ;;  %s7431_s14 = inlined_call_operand.vmem [shape: f32[2,300], index: 14, kind: output, shape index: {2}, may-alias: {11,14}]  }
   0x1   :  { %21 = vsyncpa [#allocation6], 0 }
   0x2   :  { %22 = vsyncpa [#allocation4], 0  ;;  %s6879_s29 = smov [#allocation5]   ;;  %s6785_s17 = scalar_lea.hbm %s7422_s5, 29184 }
   0x3   :  { %s48_s30 = sshll.u32 %s6879_s29, 4  ;;  %p6786_p0 = scmp.ne.s32.totalorder %s7422_s5, %s6785_s17  ;;  %s49_s30 = int_to_ptr.vmem [resolvable:$true] %s48_s30 }
   0x4   :  { %p6789_p1 = scmp.lt.u32.totalorder %s6785_s17, %s7422_s5 }
   0x6   :  { %p6791_p2 = pnand %p6789_p1, %p6786_p0 }
   0x8   :  { %6794 = shalt.err (!%p6791_p2)
}
   0x9   :  { %s6795_s22 = scalar_lea.vmem %s49_s30, 29184  ;;  %p6800_p4 = scmp.lt.s32.totalorder %s49_s30, %s49_s30 }
   0xa   :  { %p6796_p3 = scmp.ne.s32.totalorder %s49_s30, %s6795_s22  ;;  %p6801_p5 = scmp.lt.s32.totalorder %s6795_s22, %s6795_s22 }
   0xc   :  { %p6802_p6 = por %p6801_p5, %p6800_p4 }
   0xe   :  { %p6803_p7 = pnand %p6802_p6, %p6796_p3 }
  0x10   :  { %6806 = shalt.err (!%p6803_p7)
}
  0x11   :  { %s6880_s23 = smov 768   ;;  %s6881_s24 = smov 48  }
  0x12   :  { %54 = dma.hbm_to_vmem [thread:$0]  %s7422_s5, 29184, %s49_s30, [#allocation6], %s6880_s23, %s6880_s23, %s6881_s24  }
  0x13   :  { %s6882_s27 = smov [#allocation2]   ;;  %s6807_s16 = scalar_lea.hbm %s7420_s3, 9600 }
  0x14   :  { %s34_s28 = sshll.u32 %s6882_s27, 4  ;;  %p6808_p8 = scmp.ne.s32.totalorder %s7420_s3, %s6807_s16  ;;  %s35_s28 = int_to_ptr.vmem [resolvable:$true] %s34_s28 }
  0x15   :  { %p6811_p9 = scmp.lt.u32.totalorder %s6807_s16, %s7420_s3 }
  0x17   :  { %p6813_p10 = pnand %p6811_p9, %p6808_p8 }
  0x19   :  { %6816 = shalt.err (!%p6813_p10)
}
  0x1a   :  { %s6817_s21 = scalar_lea.vmem %s35_s28, 9600  ;;  %p6822_p12 = scmp.lt.s32.totalorder %s35_s28, %s35_s28 }
  0x1b   :  { %p6818_p11 = scmp.ne.s32.totalorder %s35_s28, %s6817_s21  ;;  %p6823_p13 = scmp.lt.s32.totalorder %s6817_s21, %s6817_s21 }
  0x1d   :  { %p6824_p0 = por %p6823_p13, %p6822_p12 }
  0x1f   :  { %p6825_p1 = pnand %p6824_p0, %p6818_p11 }
  0x21   :  { %6828 = shalt.err (!%p6825_p1)
}
  0x22   :  { %s6883_s5 = smov 192   ;;  %s6884_s30 = smov 12  }
  0x23   :  { %40 = dma.hbm_to_vmem [thread:$0]  %s7420_s3, 9600, %s35_s28, [#allocation3], %s6883_s5, %s6883_s5, %s6884_s30  }
  0x24   :  { %s6885_s26 = smov [#allocation7]   ;;  %s6829_s16 = scalar_lea.hbm %s7423_s6, 29184 }
  0x25   :  { %s60_s27 = sshll.u32 %s6885_s26, 4  ;;  %p6830_p2 = scmp.ne.s32.totalorder %s7423_s6, %s6829_s16  ;;  %s61_s27 = int_to_ptr.vmem [resolvable:$true] %s60_s27 }
  0x26   :  { %p6833_p3 = scmp.lt.u32.totalorder %s6829_s16, %s7423_s6 }
  0x28   :  { %p6835_p4 = pnand %p6833_p3, %p6830_p2 }
  0x2a   :  { %6838 = shalt.err (!%p6835_p4)
}
  0x2b   :  { %s6839_s21 = scalar_lea.vmem %s61_s27, 29184  ;;  %p6844_p6 = scmp.lt.s32.totalorder %s61_s27, %s61_s27 }
  0x2c   :  { %p6840_p5 = scmp.ne.s32.totalorder %s61_s27, %s6839_s21  ;;  %p6845_p7 = scmp.lt.s32.totalorder %s6839_s21, %s6839_s21 }
  0x2e   :  { %p6846_p8 = por %p6845_p7, %p6844_p6 }
  0x30   :  { %p6847_p9 = pnand %p6846_p8, %p6840_p5 }
  0x32   :  { %6850 = shalt.err (!%p6847_p9)
}
  0x33   :  { %66 = dma.hbm_to_vmem [thread:$0]  %s7423_s6, 29184, %s61_s27, [#allocation6], %s6880_s23, %s6880_s23, %s6881_s24  }
  0x34   :  { %6873 = dma.done.wait [#allocation3], 9600  }
  0x35   :  { %6874 = vsyncadd [#allocation3], 4294957696 }
  0x36   :  { %6875 = dma.done.wait [#allocation6], 58368  }
  0x37   :  { %6876 = vsyncadd [#allocation6], 4294908928  ;;  %v6886_v0 = vmov 0   ;;  %v5918_v1 = vld [vmem:[%s7418_s1 + $0x4] ss:$16 sps:$4 sm:$0xff]   ;;  %vm172_vm0 = vcmask 261120   ;;  %v112_v62 = vlaneseq }
  0x38   :  { %208 = vmatprep.mubr.bf16.mxu1 %v6886_v0  ;;  %v5920_v2 = vld [vmem:[%s7418_s1] ss:$16 sps:$4 sm:$0xff]   ;;  %176 = vmatprep.subr.bf16.mxu1 %v5918_v1  ;;  %v5921_v3 = vld [vmem:[%s7418_s1 + $0x24] ss:$16 sps:$4 sm:$0xff]   ;;  %v5926_v6 = vld [vmem:[%s7418_s1 + $0xc] ss:$16 sps:$4 sm:$0xff]  }
  0x39   :  { %v5923_v4 = vld [vmem:[%s7418_s1 + $0x20] ss:$16 sps:$4 sm:$0xff]   ;;  %177 = vmatpush1.bf16.msra.mxu1 %v5920_v2  ;;  %v5924_v7 = vld [vmem:[%s7418_s1 + $0x8] ss:$16 sps:$4 sm:$0xff]   ;;  %v5929_v12 = vld [vmem:[%s7418_s1 + $0x2c] ss:$16 sps:$4 sm:$0xff]  }
  0x3a   :  { %v100_v5 = vld [vmem:[%s7417_s0] sm:$0x3]  ;;  %178 = vmatprep.subr.bf16.mxu1 %v5921_v3  ;;  %v5930_v9 = vld [vmem:[#allocation2 + $0x4] ss:$12 sps:$4 sm:$0xff]   ;;  %v5933_v11 = vld [vmem:[#allocation2 + $0x1c] ss:$12 sps:$4 sm:$0xff]  }
  0x3b   :  { %v101_v8 = vpack.c.bf16 %v100_v5, %v100_v5  ;;  %v5932_v10 = vld [vmem:[#allocation2] ss:$12 sps:$4 sm:$0xff]   ;;  %787 = vmatprep.subr.bf16.mxu0 %v5930_v9  ;;  %v5935_v13 = vld [vmem:[#allocation2 + $0x18] ss:$12 sps:$4 sm:$0xff]   ;;  %v5938_v16 = vld [vmem:[#allocation2 + $0x30] ss:$12 sps:$4 sm:$0xff]  }
  0x3c   :  { %788 = vmatpush1.bf16.msra.mxu0 %v5932_v10  ;;  %v5936_v14 = vld [vmem:[#allocation2 + $0x34] ss:$12 sps:$4 sm:$0xff]   ;;  %v5927_v15 = vld [vmem:[%s7418_s1 + $0x28] ss:$16 sps:$4 sm:$0xff]   ;;  %v5942_v19 = vld [vmem:[#allocation2 + $0x64] ss:$12 sps:$4 sm:$0xff]  }
  0x3d   :  { %179 = vmatpush1.bf16.msra.mxu1 %v5923_v4  ;;  %789 = vmatprep.subr.bf16.mxu0 %v5933_v11  ;;  %v5939_v17 = vld [vmem:[#allocation2 + $0x4c] ss:$12 sps:$4 sm:$0xff]   ;;  %v5941_v18 = vld [vmem:[#allocation2 + $0x48] ss:$12 sps:$4 sm:$0xff]   ;;  %v5950_v30 = vld [vmem:[#allocation2 + $0x90] ss:$12 sps:$4 sm:$0xff]  }
  0x3e   :  { %217 = vmatprep.subr.bf16.mxu1 %v5926_v6  ;;  %v5956_v20 = vld [vmem:[#allocation2 + $0xc8] ss:$12 sps:$4 sm:$0xff]   ;;  %v5944_v22 = vld [vmem:[#allocation2 + $0x60] ss:$12 sps:$4 sm:$0xff]   ;;  %v5947_v26 = vld [vmem:[#allocation2 + $0x78] ss:$12 sps:$4 sm:$0xff]  }
  0x3f   :  { %v5958_v21 = vld [vmem:[#allocation2 + $0x8] ss:$12 sps:$4 sm:$0xff]   ;;  %v5961_v24 = vld [vmem:[#allocation2 + $0xe0] ss:$12 sps:$4 sm:$0xff]   ;;  %v5966_v27 = vld [vmem:[#allocation2 + $0xf8] ss:$12 sps:$4 sm:$0xff]  }
  0x40   :  { %5253 = vmatmul.mubr.msk.bf16.vlgmr.msra.gmra.mrb[0].mxu1 %vm172_vm0, %v101_v8  ;;  %790 = vmatpush1.bf16.msra.mxu0 %v5935_v13  ;;  %v5945_v23 = vld [vmem:[#allocation2 + $0x7c] ss:$12 sps:$4 sm:$0xff]   ;;  %v5963_v25 = vld [vmem:[#allocation2 + $0x20] ss:$12 sps:$4 sm:$0xff]   ;;  %v5968_v29 = vld [vmem:[#allocation2 + $0x38] ss:$12 sps:$4 sm:$0xff]  }
  0x41   :  { %218 = vmatpush1.bf16.msra.mxu1 %v5924_v7  ;;  %249 = vmatprep.mubr.bf16.mxu1 %v6886_v0  ;;  %v5948_v28 = vld [vmem:[#allocation2 + $0x94] ss:$12 sps:$4 sm:$0xff]   ;;  %v5971_v31 = vld [vmem:[#allocation2 + $0x110] ss:$12 sps:$4 sm:$0xff]   ;;  %v5951_v33 = vld [vmem:[#allocation2 + $0xac] ss:$12 sps:$4 sm:$0xff]  }
  0x42   :  { %219 = vmatprep.subr.bf16.mxu1 %v5929_v12  ;;  %791 = vmatprep.subr.bf16.mxu0 %v5936_v14  ;;  %v5973_v32 = vld [vmem:[#allocation2 + $0x50] ss:$12 sps:$4 sm:$0xff]   ;;  %v5953_v34 = vld [vmem:[#allocation2 + $0xa8] ss:$12 sps:$4 sm:$0xff]   ;;  %v5981_v38 = vld [vmem:[#allocation2 + $0x140] ss:$12 sps:$4 sm:$0xff]  }
  0x43   :  { %v5976_v35 = vld [vmem:[#allocation2 + $0x128] ss:$12 sps:$4 sm:$0xff]   ;;  %v5954_v36 = vld [vmem:[#allocation2 + $0xc4] ss:$12 sps:$4 sm:$0xff]   ;;  %v5957_v39 = vld [vmem:[#allocation2 + $0xc0] ss:$12 sps:$4 sm:$0xff]  }
  0x44   :  { %792 = vmatpush1.bf16.msra.mxu0 %v5938_v16  ;;  %v5978_v37 = vld [vmem:[#allocation2 + $0x68] ss:$12 sps:$4 sm:$0xff]   ;;  %v5983_v41 = vld [vmem:[#allocation2 + $0x80] ss:$12 sps:$4 sm:$0xff]   ;;  %v5962_v42 = vld [vmem:[#allocation2 + $0xd8] ss:$12 sps:$4 sm:$0xff]  }
  0x45   :  { %220 = vmatpush1.bf16.msra.mxu1 %v5927_v15  ;;  %793 = vmatprep.subr.bf16.mxu0 %v5939_v17  ;;  %v5959_v40 = vld [vmem:[#allocation2 + $0xdc] ss:$12 sps:$4 sm:$0xff]   ;;  %v5964_v43 = vld [vmem:[#allocation2 + $0xf4] ss:$12 sps:$4 sm:$0xff]   ;;  %v5969_v45 = vld [vmem:[#allocation2 + $0x10c] ss:$12 sps:$4 sm:$0xff]  }
  0x46   :  { %5842 = vmatprep.subr.bf16.mxu1 %v5956_v20  ;;  %v5967_v44 = vld [vmem:[#allocation2 + $0xf0] ss:$12 sps:$4 sm:$0xff]   ;;  %v5972_v46 = vld [vmem:[#allocation2 + $0x108] ss:$12 sps:$4 sm:$0xff]   ;;  %v5977_v48 = vld [vmem:[#allocation2 + $0x120] ss:$12 sps:$4 sm:$0xff]  }
  0x47   :  { %v5974_v47 = vld [vmem:[#allocation2 + $0x124] ss:$12 sps:$4 sm:$0xff]   ;;  %v5979_v49 = vld [vmem:[#allocation2 + $0x13c] ss:$12 sps:$4 sm:$0xff]   ;;  %v5984_v51 = vld [vmem:[#allocation2 + $0x154] ss:$12 sps:$4 sm:$0xff]  }
  0x48   :  { %5254 = vmatmul.mubr.msk.bf16.vlgmr.msra.gmra.mrb[4].mxu1 %vm172_vm0, %v101_v8  ;;  %794 = vmatpush1.bf16.msra.mxu0 %v5941_v18  ;;  %v5982_v50 = vld [vmem:[#allocation2 + $0x138] ss:$12 sps:$4 sm:$0xff]   ;;  %v5987_v53 = vld [vmem:[#allocation2 + $0x150] ss:$12 sps:$4 sm:$0xff]   ;;  %v5992_v57 = vld [vmem:[#allocation2 + $0x168] ss:$12 sps:$4 sm:$0xff]  }
  0x49   :  { %5843 = vmatpush3.bf16.msra.mxu1 %v5958_v21  ;;  %795 = vmatprep.subr.bf16.mxu0 %v5942_v19  ;;  %v5986_v52 = vld [vmem:[#allocation2 + $0x158] ss:$12 sps:$4 sm:$0xff]   ;;  %v5991_v56 = vld [vmem:[#allocation2 + $0x170] ss:$12 sps:$4 sm:$0xff]   ;;  %vm92_vm1 = vcmask 1041408   ;;  %vm93_vm2 = vcmask 1043458  }
  0x4a   :  { %5844 = vmatprep.subr.bf16.mxu1 %v5961_v24  ;;  %v5988_v54 = vld [vmem:[#allocation2 + $0x98] ss:$12 sps:$4 sm:$0xff]   ;;  %v5993_v58 = vld [vmem:[#allocation2 + $0xb0] ss:$12 sps:$4 sm:$0xff]   ;;  %vm94_vm3 = vmor %vm93_vm2, %vm92_vm1  ;;  %vm95_vm4 = vcmask 357380   ;;  %v7052_v63 = vshrl.u32 %v112_v62, 7 }
  0x4b   :  { %v5989_v55 = vld [vmem:[#allocation2 + $0x16c] ss:$12 sps:$4 sm:$0xff]   ;;  %v5996_v59 = vld [vmem:[#allocation2 + $0x184] ss:$12 sps:$4 sm:$0xff]   ;;  %vm7043_vm5 = vmor %vm95_vm4, %vm94_vm3  ;;  %vm783_vm6 = vcmask 130048   ;;  %vm2568_vm7 = vcmask 1045504  }
  0x4c   :  { %796 = vmatpush1.bf16.msra.mxu0 %v5944_v22  ;;  %v91_v60 = vld [vmem:[%s7427_s10] sm:$0x3f]  ;;  %v7055_v1 = vsub.s32 0, %v7052_v63  ;;  %v7063_v3 = vsub.s32 1, %v7052_v63  ;;  %v7070_v11 = vsub.s32 3, %v7052_v63  ;;  %vm2564_vm8 = vcmask 359424  }
  0x4d   :  { %5845 = vmatpush3.bf16.msra.mxu1 %v5963_v25  ;;  %797 = vmatprep.subr.bf16.mxu0 %v5945_v23  ;;  %97 = vst.msk [vmem:[%s7430_s13] sm:$0x3f] %vm7043_vm5, %v91_v60  ;;  %v7060_v2 = vld [vmem:[%s7419_s2] sm:$0xf]  ;;  %v5997_v17 = vld [vmem:[#allocation2 + $0x188] ss:$12 sps:$4 sm:$0xff]  }
  0x4e   :  { %5846 = vmatprep.subr.bf16.mxu1 %v5966_v27  ;;  %v115_v4 = vrot.slane %v7060_v2, %v7055_v1  ;;  %v119_v5 = vrot.slane %v7060_v2, %v7063_v3  ;;  %v5994_v16 = vld [vmem:[#allocation2 + $0x180] ss:$12 sps:$4 sm:$0xff]   ;;  %v127_v18 = vrot.slane %v7060_v2, %v7070_v11  ;;  %v6000_v20 = vld [vmem:[#allocation2 + $0x19c] ss:$12 sps:$4 sm:$0xff]   ;;  %v5998_v23 = vld [vmem:[#allocation2 + $0x198] ss:$12 sps:$4 sm:$0xff]  }
  0x4f   :  { %v6001_v24 = vld [vmem:[#allocation2 + $0x1a0] ss:$12 sps:$4 sm:$0xff]   ;;  %v6029_v60 = vld [vmem:[#allocation2 + $0x248] ss:$12 sps:$4 sm:$0xff]   ;;  %vm6889_vm9 = vmmov 0   ;;  %s6890_s29 = smov [#allocation8]  }
  0x50   :  { %798 = vmatpush1.bf16.msra.mxu0 %v5947_v26  ;;  %v6004_v27 = vld [vmem:[#allocation2 + $0x1b4] ss:$12 sps:$4 sm:$0xff]   ;;  %v6032_v62 = vld [vmem:[#allocation7 + $0x4] ss:$48 sps:$4 sm:$0xff]   ;;  %s5227_s6 = sshll.u32 %s6890_s29, 4  ;;  %vm5172_vm10 = vcmask 58368   ;;  %s5228_s6 = int_to_ptr.vmem [resolvable:$true] %s5227_s6 }
  0x51   :  { %5847 = vmatpush3.bf16.msra.mxu1 %v5968_v29  ;;  %799 = vmatprep.subr.bf16.mxu0 %v5948_v28  ;;  %p6856_p11 = scmp.lt.s32.totalorder %s5228_s6, %s5228_s6 }
  0x52   :  { %5848 = vmatprep.subr.bf16.mxu1 %v5971_v31  ;;  %v6005_v31 = vld [vmem:[#allocation2 + $0x1b8] ss:$12 sps:$4 sm:$0xff]  }
  0x54   :  { %800 = vmatpush1.bf16.msra.mxu0 %v5950_v30  ;;  %v6002_v30 = vld [vmem:[#allocation2 + $0x1b0] ss:$12 sps:$4 sm:$0xff]  }
  0x55   :  { %5849 = vmatpush3.bf16.msra.mxu1 %v5973_v32  ;;  %801 = vmatprep.subr.bf16.mxu0 %v5951_v33  ;;  %v6008_v33 = vld [vmem:[#allocation2 + $0x1cc] ss:$12 sps:$4 sm:$0xff]  }
  0x56   :  { %5850 = vmatprep.subr.bf16.mxu1 %v5976_v35  ;;  %v6009_v35 = vld [vmem:[#allocation2 + $0x1d0] ss:$12 sps:$4 sm:$0xff]  }
  0x58   :  { %802 = vmatpush1.bf16.msra.mxu0 %v5953_v34  ;;  %v6006_v34 = vld [vmem:[#allocation2 + $0x1c8] ss:$12 sps:$4 sm:$0xff]  }
  0x59   :  { %5851 = vmatpush3.bf16.msra.mxu1 %v5978_v37  ;;  %803 = vmatprep.subr.bf16.mxu0 %v5954_v36  ;;  %v6012_v36 = vld [vmem:[#allocation2 + $0x1e4] ss:$12 sps:$4 sm:$0xff]   ;;  %v6010_v37 = vld [vmem:[#allocation2 + $0x1e0] ss:$12 sps:$4 sm:$0xff]  }
  0x5a   :  { %5852 = vmatprep.subr.bf16.mxu1 %v5981_v38  ;;  %v6013_v38 = vld [vmem:[#allocation2 + $0x1e8] ss:$12 sps:$4 sm:$0xff]  }
  0x5c   :  { %804 = vmatpush1.bf16.msra.mxu0 %v5957_v39  ;;  %v6016_v39 = vld [vmem:[#allocation2 + $0x1fc] ss:$12 sps:$4 sm:$0xff]  }
  0x5d   :  { %5853 = vmatpush3.bf16.msra.mxu1 %v5983_v41  ;;  %805 = vmatprep.subr.bf16.mxu0 %v5959_v40  ;;  %v7079_v40 = vsub.s32 2, %v7052_v63  ;;  %v6014_v41 = vld [vmem:[#allocation2 + $0x1f8] ss:$12 sps:$4 sm:$0xff]  }
  0x5e   :  { %5854 = vmatprep.subr.bf16.mxu1 %v5986_v52  ;;  %v6022_v52 = vld [vmem:[#allocation2 + $0x228] ss:$12 sps:$4 sm:$0xff]  }
  0x60   :  { %806 = vmatpush1.bf16.msra.mxu0 %v5962_v42  ;;  %v6017_v42 = vld [vmem:[#allocation2 + $0x200] ss:$12 sps:$4 sm:$0xff]  }
  0x61   :  { %807 = vmatprep.subr.bf16.mxu0 %v5964_v43  ;;  %5855 = vmatpush3.bf16.msra.mxu1 %v5988_v54  ;;  %v6887_v43 = vmov 1983009808  }
  0x62   :  { %5856 = vmatprep.subr.bf16.mxu1 %v5991_v56  ;;  %v952_v56 = vld [vmem:[%s7430_s13] sm:$0x3f] }
  0x64   :  { %808 = vmatpush1.bf16.msra.mxu0 %v5967_v44  ;;  %v1188_v44 = vunpack.c.l.s4 %v6887_v43  ;;  %v6081_v43 = vld [vmem:[#allocation7 + $0x304] ss:$48 sps:$4 sm:$0xff]  }
  0x65   :  { %809 = vmatprep.subr.bf16.mxu0 %v5969_v45  ;;  %5857 = vmatpush3.bf16.msra.mxu1 %v5993_v58  ;;  %v6020_v45 = vld [vmem:[#allocation2 + $0x214] ss:$12 sps:$4 sm:$0xff]  }
  0x66   :  { %909 = vmatprep.subr.bf16.mxu1 %v6886_v0 }
  0x68   :  { %810 = vmatpush1.bf16.msra.mxu0 %v5972_v46  ;;  %v123_v46 = vrot.slane %v7060_v2, %v7079_v40  ;;  %v6035_v2 = vld [vmem:[#allocation7 + $0x604] ss:$48 sps:$4 sm:$0xff]  }
  0x69   :  { %811 = vmatprep.subr.bf16.mxu0 %v5974_v47  ;;  %v6018_v47 = vld [vmem:[#allocation2 + $0x210] ss:$12 sps:$4 sm:$0xff]  }
  0x6c   :  { %812 = vmatpush1.bf16.msra.mxu0 %v5977_v48  ;;  %v6021_v48 = vld [vmem:[#allocation2 + $0x218] ss:$12 sps:$4 sm:$0xff]  }
  0x6d   :  { %813 = vmatprep.subr.bf16.mxu0 %v5979_v49  ;;  %v1189_v49 = vunpack.c.0.s8 %v1188_v44  ;;  %v6084_v44 = vld [vmem:[#allocation7 + $0x1ec] ss:$48 sps:$4 sm:$0xff]  }
  0x6f   :  { %v7086_v54 = vsub.s32 %v1189_v49, %v7052_v63  ;;  %v6085_v49 = vld [vmem:[#allocation7 + $0x360] ss:$48 sps:$4 sm:$0xff]  }
  0x70   :  { %814 = vmatpush1.bf16.msra.mxu0 %v5982_v50  ;;  %v6024_v50 = vld [vmem:[#allocation2 + $0x22c] ss:$12 sps:$4 sm:$0xff]  }
  0x71   :  { %815 = vmatprep.subr.bf16.mxu0 %v5984_v51 }
  0x74   :  { %816 = vmatpush1.bf16.msra.mxu0 %v5987_v53  ;;  %v6025_v53 = vld [vmem:[#allocation2 + $0x230] ss:$12 sps:$4 sm:$0xff]  }
  0x75   :  { %817 = vmatprep.subr.bf16.mxu0 %v5989_v55  ;;  %v6028_v55 = vld [vmem:[#allocation2 + $0x244] ss:$12 sps:$4 sm:$0xff]  }
  0x78   :  { %818 = vmatpush1.bf16.msra.mxu0 %v5992_v57  ;;  %v7093_v57 = vrot.slane %v952_v56, %v7086_v54 }
  0x79   :  { %828 = vmatprep.subr.bf16.mxu0 %v5996_v59  ;;  %v6026_v59 = vld [vmem:[#allocation2 + $0x240] ss:$12 sps:$4 sm:$0xff]  }
 0x113   :  { %v210_v6 = vpop.f32.mrb[0].mxu1 }
 0x114   :  { %v211_v7 = vadd.f32 %v210_v6, %v115_v4  ;;  %v212_v8 = vpop.f32.mrb[1].mxu1  ;;  %v1201_v4 = vcombine.high %v7093_v57, %v7093_v57  ;;  %v6030_v6 = vld [vmem:[#allocation7] ss:$48 sps:$4 sm:$0xff]  }
 0x115   :  { %v213_v9 = vadd.f32 %v212_v8, %v119_v5  ;;  %v214_v10 = vpop.f32.mrb[2].mxu1  ;;  %v6038_v8 = vld [vmem:[#allocation7 + $0x64] ss:$48 sps:$4 sm:$0xff]  }
 0x116   :  { %v258_v12 = vmax.f32 %v211_v7, 0.0  ;;  %v215_v13 = vpop.f32.mrb[3].mxu1  ;;  %v6033_v7 = vld [vmem:[#allocation7 + $0x600] ss:$48 sps:$4 sm:$0xff]  }
 0x117   :  { %v259_v14 = vmax.f32 %v213_v9, 0.0  ;;  %v6041_v9 = vld [vmem:[#allocation7 + $0x664] ss:$48 sps:$4 sm:$0xff]   ;;  %v6036_v10 = vld [vmem:[#allocation7 + $0x60] ss:$48 sps:$4 sm:$0xff]   ;;  %v7098_v13 = vpack.c.bf16 %v1201_v4, %v1201_v4 }
 0x118   :  { %v262_v19 = vpack.c.bf16 %v258_v12, %v258_v12  ;;  %v6039_v12 = vld [vmem:[#allocation7 + $0x660] ss:$48 sps:$4 sm:$0xff]  }
 0x119   :  { %v263_v15 = vpack.c.bf16 %v259_v14, %v259_v14  ;;  %v6044_v14 = vld [vmem:[#allocation7 + $0xc4] ss:$48 sps:$4 sm:$0xff]   ;;  %v6103_v4 = vld [vmem:[#allocation7 + $0x480] ss:$48 sps:$4 sm:$0xff]  }
 0x11b   :  { %819 = vmatprep.mubr.bf16.mxu0 %v263_v15  ;;  %901 = vmatprep.mubr.bf16.mxu1 %v263_v15  ;;  %v251_v21 = vpop.f32.mrb[4].mxu1  ;;  %v1186_v15 = vcombine.high %v952_v56, %v952_v56  ;;  %v6099_v56 = vld [vmem:[#allocation7 + $0x424] ss:$48 sps:$4 sm:$0xff]  }
 0x11c   :  { %820 = vmatmul.mubr.bf16.vlgmr.msra.gmra.mrb[0].mxu0 %v262_v19  ;;  %902 = vmatmul.mubr.bf16.vlgmr.msra.gmra.mrb[8].mxu1 %v262_v19  ;;  %v253_v22 = vpop.f32.mrb[5].mxu1  ;;  %v252_v51 = vadd.f32 %v251_v21, %v123_v46  ;;  %v6042_v19 = vld [vmem:[#allocation7 + $0xc0] ss:$48 sps:$4 sm:$0xff]   ;;  %v6082_v46 = vld [vmem:[#allocation7 + $0x1e8] ss:$48 sps:$4 sm:$0xff]  }
 0x11d   :  { %829 = vmatpush1.bf16.msra.mxu0 %v5994_v16  ;;  %910 = vmatpush1.bf16.msra.mxu1 %v5997_v17  ;;  %v254_v25 = vadd.f32 %v253_v22, %v127_v18  ;;  %v255_v26 = vpop.f32.mrb[6].mxu1  ;;  %v6045_v16 = vld [vmem:[#allocation7 + $0x6c4] ss:$48 sps:$4 sm:$0x3f]   ;;  %v1200_v18 = vrot.slane %v1186_v15, %v7086_v54  ;;  %v6054_v22 = vld [vmem:[#allocation7 + $0xc] ss:$48 sps:$4 sm:$0xff]  }
 0x11e   :  { %830 = vmatprep.subr.bf16.mxu0 %v6000_v20  ;;  %911 = vmatprep.subr.bf16.mxu1 %v6886_v0  ;;  %v256_v28 = vpop.f32.mrb[7].mxu1  ;;  %v260_v58 = vmax.f32 %v252_v51, 0.0  ;;  %v6047_v17 = vld [vmem:[#allocation7 + $0x6c0] ss:$48 sps:$4 sm:$0x3f]  }
 0x11f   :  { %v261_v29 = vmax.f32 %v254_v25, 0.0  ;;  %v6050_v20 = vld [vmem:[#allocation7 + $0x124] ss:$48 sps:$4 sm:$0xff]   ;;  %v2570_v21 = vsel %vm2568_vm7, %v6047_v17, 0  ;;  %v7105_v25 = vpack.c.bf16 %v1200_v18, %v1200_v18  ;;  %v6055_v28 = vld [vmem:[#allocation7 + $0x180] ss:$48 sps:$4 sm:$0xff]  }
 0x120   :  { %v264_v5 = vpack.c.bf16 %v260_v58, %v260_v58  ;;  %v6057_v26 = vld [vmem:[#allocation7 + $0x184] ss:$48 sps:$4 sm:$0xff]   ;;  %v6102_v58 = vld [vmem:[#allocation7 + $0x30c] ss:$48 sps:$4 sm:$0xff]   ;;  %v6118_v15 = vld [vmem:[#allocation7 + $0x428] ss:$48 sps:$4 sm:$0xff]  }
 0x121   :  { %831 = vmatpush1.bf16.msra.mxu0 %v5998_v23  ;;  %912 = vmatpush1.bf16.msra.mxu1 %v6001_v24  ;;  %v265_v32 = vpack.c.bf16 %v261_v29, %v261_v29  ;;  %v6048_v23 = vld [vmem:[#allocation7 + $0x120] ss:$48 sps:$4 sm:$0xff]   ;;  %v6052_v24 = vld [vmem:[#allocation7 + $0x8] ss:$48 sps:$4 sm:$0xff]   ;;  %v6093_v51 = vld [vmem:[#allocation7 + $0x3c4] ss:$48 sps:$4 sm:$0xff]  }
 0x122   :  { %832 = vmatprep.subr.bf16.mxu0 %v6004_v27  ;;  %913 = vmatprep.subr.bf16.mxu1 %v6886_v0  ;;  %v6060_v27 = vld [vmem:[#allocation7 + $0x6c] ss:$48 sps:$4 sm:$0xff]   ;;  %v6058_v29 = vld [vmem:[#allocation7 + $0x68] ss:$48 sps:$4 sm:$0xff]   ;;  %v6121_v18 = vld [vmem:[#allocation7 + $0x5a0] ss:$48 sps:$4 sm:$0xff]  }
 0x123   :  { %5330 = vmatprep.mubr.msk.bf16.mxu0 %vm783_vm6, %v265_v32  ;;  %5331 = vmatprep.mubr.msk.bf16.mxu1 %vm783_vm6, %v265_v32  ;;  %v6061_v32 = vld [vmem:[#allocation7 + $0x1e0] ss:$48 sps:$4 sm:$0xff]   ;;  %v6126_v17 = vld [vmem:[#allocation7 + $0x48c] ss:$48 sps:$4 sm:$0xff]  }
 0x125   :  { %833 = vmatpush1.bf16.msra.mxu0 %v6002_v30  ;;  %914 = vmatpush1.bf16.msra.mxu1 %v6005_v31  ;;  %v6063_v30 = vld [vmem:[#allocation7 + $0x1e4] ss:$48 sps:$4 sm:$0xff]   ;;  %v6066_v31 = vld [vmem:[#allocation7 + $0xcc] ss:$48 sps:$4 sm:$0xff]  }
 0x126   :  { %834 = vmatprep.subr.bf16.mxu0 %v6008_v33  ;;  %915 = vmatprep.subr.bf16.mxu1 %v6886_v0  ;;  %v6064_v33 = vld [vmem:[#allocation7 + $0xc8] ss:$48 sps:$4 sm:$0xff]  }
 0x129   :  { %835 = vmatpush1.bf16.msra.mxu0 %v6006_v34  ;;  %916 = vmatpush1.bf16.msra.mxu1 %v6009_v35  ;;  %v6069_v34 = vld [vmem:[#allocation7 + $0x244] ss:$48 sps:$4 sm:$0xff]   ;;  %v6072_v35 = vld [vmem:[#allocation7 + $0x12c] ss:$48 sps:$4 sm:$0xff]  }
 0x12a   :  { %836 = vmatprep.subr.bf16.mxu0 %v6012_v36  ;;  %917 = vmatprep.subr.bf16.mxu1 %v6886_v0  ;;  %v6067_v36 = vld [vmem:[#allocation7 + $0x240] ss:$48 sps:$4 sm:$0xff]  }
 0x12d   :  { %837 = vmatpush1.bf16.msra.mxu0 %v6010_v37  ;;  %918 = vmatpush1.bf16.msra.mxu1 %v6013_v38  ;;  %v6070_v37 = vld [vmem:[#allocation7 + $0x128] ss:$48 sps:$4 sm:$0xff]   ;;  %v6075_v38 = vld [vmem:[#allocation7 + $0x2a4] ss:$48 sps:$4 sm:$0xff]  }
 0x12e   :  { %838 = vmatprep.subr.bf16.mxu0 %v6016_v39  ;;  %919 = vmatprep.subr.bf16.mxu1 %v6886_v0  ;;  %v6078_v39 = vld [vmem:[#allocation7 + $0x18c] ss:$48 sps:$4 sm:$0xff]  }
 0x131   :  { %839 = vmatpush1.bf16.msra.mxu0 %v6014_v41  ;;  %920 = vmatpush1.bf16.msra.mxu1 %v6017_v42  ;;  %v6073_v41 = vld [vmem:[#allocation7 + $0x2a0] ss:$48 sps:$4 sm:$0xff]   ;;  %v6076_v42 = vld [vmem:[#allocation7 + $0x188] ss:$48 sps:$4 sm:$0xff]  }
 0x132   :  { %840 = vmatprep.subr.bf16.mxu0 %v6020_v45  ;;  %921 = vmatprep.subr.bf16.mxu1 %v6886_v0  ;;  %v6079_v45 = vld [vmem:[#allocation7 + $0x300] ss:$48 sps:$4 sm:$0xff]  }
 0x135   :  { %841 = vmatpush1.bf16.msra.mxu0 %v6018_v47  ;;  %922 = vmatpush1.bf16.msra.mxu1 %v6021_v48  ;;  %v6087_v47 = vld [vmem:[#allocation7 + $0x364] ss:$48 sps:$4 sm:$0xff]   ;;  %v6090_v48 = vld [vmem:[#allocation7 + $0x24c] ss:$48 sps:$4 sm:$0xff]  }
 0x136   :  { %842 = vmatprep.subr.bf16.mxu0 %v6024_v50  ;;  %923 = vmatprep.subr.bf16.mxu1 %v6886_v0  ;;  %v6088_v50 = vld [vmem:[#allocation7 + $0x248] ss:$48 sps:$4 sm:$0xff]  }
 0x139   :  { %843 = vmatpush1.bf16.msra.mxu0 %v6022_v52  ;;  %924 = vmatpush1.bf16.msra.mxu1 %v6025_v53  ;;  %v6096_v52 = vld [vmem:[#allocation7 + $0x2ac] ss:$48 sps:$4 sm:$0xff]   ;;  %v6091_v53 = vld [vmem:[#allocation7 + $0x3c0] ss:$48 sps:$4 sm:$0xff]  }
 0x13a   :  { %844 = vmatprep.subr.bf16.mxu0 %v6028_v55  ;;  %925 = vmatprep.subr.bf16.mxu1 %v6886_v0  ;;  %v6094_v55 = vld [vmem:[#allocation7 + $0x2a8] ss:$48 sps:$4 sm:$0xff]  }
 0x13d   :  { %845 = vmatpush1.bf16.msra.mxu0 %v6026_v59  ;;  %926 = vmatpush1.bf16.msra.mxu1 %v6029_v60  ;;  %v6097_v59 = vld [vmem:[#allocation7 + $0x420] ss:$48 sps:$4 sm:$0xff]   ;;  %v6100_v60 = vld [vmem:[#allocation7 + $0x308] ss:$48 sps:$4 sm:$0xff]  }
 0x13e   :  { %2605 = vmatprep.subr.bf16.mxu1 %v6032_v62  ;;  %2646 = vmatprep.subr.bf16.mxu0 %v6035_v2  ;;  %v6105_v62 = vld [vmem:[#allocation7 + $0x484] ss:$48 sps:$4 sm:$0xff]   ;;  %v6108_v2 = vld [vmem:[#allocation7 + $0x36c] ss:$48 sps:$4 sm:$0xff]  }
 0x140   :  { %861 = vmatmul.mubr.bf16.vlgmr.msra.gmra.mrb[0].mxu0 %v264_v5  ;;  %942 = vmatmul.mubr.bf16.vlgmr.msra.gmra.mrb[12].mxu1 %v264_v5  ;;  %v6106_v5 = vld [vmem:[#allocation7 + $0x368] ss:$48 sps:$4 sm:$0xff]  }
 0x141   :  { %2606 = vmatpush1.bf16.msra.mxu1 %v6030_v6  ;;  %2647 = vmatpush1.bf16.msra.mxu0 %v6033_v7  ;;  %v6111_v6 = vld [vmem:[#allocation7 + $0x4e4] ss:$48 sps:$4 sm:$0xff]   ;;  %v6114_v7 = vld [vmem:[#allocation7 + $0x3cc] ss:$48 sps:$4 sm:$0xff]  }
 0x142   :  { %2607 = vmatprep.subr.bf16.mxu1 %v6038_v8  ;;  %2648 = vmatprep.subr.bf16.mxu0 %v6041_v9  ;;  %v6109_v8 = vld [vmem:[#allocation7 + $0x4e0] ss:$48 sps:$4 sm:$0xff]   ;;  %v6112_v9 = vld [vmem:[#allocation7 + $0x3c8] ss:$48 sps:$4 sm:$0xff]  }
 0x143   :  { %2678 = vmatprep.mubr.bf16.mxu0 %v6886_v0  ;;  %2637 = vmatprep.mubr.bf16.mxu1 %v7098_v13 }
 0x145   :  { %2608 = vmatpush1.bf16.msra.mxu1 %v6036_v10  ;;  %2649 = vmatpush1.bf16.msra.mxu0 %v6039_v12  ;;  %v6117_v10 = vld [vmem:[#allocation7 + $0x544] ss:$48 sps:$4 sm:$0xff]   ;;  %v6120_v12 = vld [vmem:[#allocation7 + $0x42c] ss:$48 sps:$4 sm:$0xff]  }
 0x146   :  { %2609 = vmatprep.subr.bf16.mxu1 %v6044_v14  ;;  %5560 = vmatprep.subr.msk.bf16.mxu0 %vm2568_vm7, %v6045_v16  ;;  %v6115_v14 = vld [vmem:[#allocation7 + $0x540] ss:$48 sps:$4 sm:$0xff]   ;;  %v6123_v16 = vld [vmem:[#allocation7 + $0x5a4] ss:$48 sps:$4 sm:$0xff]  }
 0x149   :  { %2610 = vmatpush1.bf16.msra.mxu1 %v6042_v19  ;;  %2651 = vmatpush1.bf16.msra.mxu0 %v2570_v21  ;;  %v6124_v19 = vld [vmem:[#allocation7 + $0x488] ss:$48 sps:$4 sm:$0xff]   ;;  %v6132_v21 = vld [vmem:[#allocation7 + $0x60c] ss:$48 sps:$4 sm:$0xff]  }
 0x14a   :  { %2611 = vmatprep.subr.bf16.mxu1 %v6050_v20  ;;  %2687 = vmatprep.subr.bf16.mxu0 %v6054_v22  ;;  %v6129_v20 = vld [vmem:[#allocation7 + $0x4ec] ss:$48 sps:$4 sm:$0xff]   ;;  %v7112_v22 = vpack.c.bf16 %v7093_v57, %v7093_v57  ;;  %v6144_v57 = vld [vmem:[#allocation7 + $0x6c8] ss:$48 sps:$4 sm:$0x3f]  }
 0x14c   :  { %5561 = vmatmul.mubr.msk.bf16.vlgmr.msra.gmra.mrb[4].mxu0 %vm2564_vm8, %v7105_v25 }
 0x14d   :  { %2612 = vmatpush1.bf16.msra.mxu1 %v6048_v23  ;;  %2688 = vmatpush1.bf16.msra.mxu0 %v6052_v24  ;;  %v6127_v23 = vld [vmem:[#allocation7 + $0x4e8] ss:$48 sps:$4 sm:$0xff]  }
 0x14e   :  { %2613 = vmatprep.subr.bf16.mxu1 %v6057_v26  ;;  %2689 = vmatprep.subr.bf16.mxu0 %v6060_v27  ;;  %v6130_v24 = vld [vmem:[#allocation7 + $0x608] ss:$48 sps:$4 sm:$0xff]   ;;  %v6135_v26 = vld [vmem:[#allocation7 + $0x54c] ss:$48 sps:$4 sm:$0xff]  }
 0x14f   :  { %2719 = vmatprep.mubr.bf16.mxu0 %v7098_v13  ;;  %v6138_v27 = vld [vmem:[#allocation7 + $0x66c] ss:$48 sps:$4 sm:$0xff]  }
 0x151   :  { %2614 = vmatpush1.bf16.msra.mxu1 %v6055_v28  ;;  %2690 = vmatpush1.bf16.msra.mxu0 %v6058_v29  ;;  %v6133_v28 = vld [vmem:[#allocation7 + $0x548] ss:$48 sps:$4 sm:$0xff]  }
 0x152   :  { %2615 = vmatprep.subr.bf16.mxu1 %v6063_v30  ;;  %2691 = vmatprep.subr.bf16.mxu0 %v6066_v31  ;;  %v6136_v29 = vld [vmem:[#allocation7 + $0x668] ss:$48 sps:$4 sm:$0xff]   ;;  %v6141_v30 = vld [vmem:[#allocation7 + $0x5ac] ss:$48 sps:$4 sm:$0xff]  }
 0x153   :  { %v6142_v31 = vld [vmem:[#allocation7 + $0x6cc] ss:$48 sps:$4 sm:$0x3f]  }
 0x155   :  { %2616 = vmatpush1.bf16.msra.mxu1 %v6061_v32  ;;  %2692 = vmatpush1.bf16.msra.mxu0 %v6064_v33  ;;  %v6139_v32 = vld [vmem:[#allocation7 + $0x5a8] ss:$48 sps:$4 sm:$0xff]   ;;  %v2576_v33 = vsel %vm2568_vm7, %v6144_v57, 0  ;;  %v6222_v57 = vld [vmem:[#allocation7 + $0x37c] ss:$48 sps:$4 sm:$0xff]  }
 0x156   :  { %2617 = vmatprep.subr.bf16.mxu1 %v6069_v34  ;;  %2693 = vmatprep.subr.bf16.mxu0 %v6072_v35  ;;  %v6147_v34 = vld [vmem:[#allocation7 + $0x14] ss:$48 sps:$4 sm:$0xff]  }
 0x157   :  { %v6150_v35 = vld [vmem:[#allocation7 + $0x614] ss:$48 sps:$4 sm:$0xff]  }
 0x159   :  { %2618 = vmatpush1.bf16.msra.mxu1 %v6067_v36  ;;  %2694 = vmatpush1.bf16.msra.mxu0 %v6070_v37  ;;  %v6145_v36 = vld [vmem:[#allocation7 + $0x10] ss:$48 sps:$4 sm:$0xff]  }
 0x15a   :  { %2619 = vmatprep.subr.bf16.mxu1 %v6075_v38  ;;  %2695 = vmatprep.subr.bf16.mxu0 %v6078_v39  ;;  %v6148_v37 = vld [vmem:[#allocation7 + $0x610] ss:$48 sps:$4 sm:$0xff]   ;;  %v6153_v38 = vld [vmem:[#allocation7 + $0x74] ss:$48 sps:$4 sm:$0xff]  }
 0x15b   :  { %v6156_v39 = vld [vmem:[#allocation7 + $0x674] ss:$48 sps:$4 sm:$0xff]  }
 0x15d   :  { %2620 = vmatpush1.bf16.msra.mxu1 %v6073_v41  ;;  %2696 = vmatpush1.bf16.msra.mxu0 %v6076_v42  ;;  %v6151_v41 = vld [vmem:[#allocation7 + $0x70] ss:$48 sps:$4 sm:$0xff]  }
 0x15e   :  { %2621 = vmatprep.subr.bf16.mxu1 %v6081_v43  ;;  %2697 = vmatprep.subr.bf16.mxu0 %v6084_v44  ;;  %v6154_v42 = vld [vmem:[#allocation7 + $0x670] ss:$48 sps:$4 sm:$0xff]   ;;  %v6159_v43 = vld [vmem:[#allocation7 + $0xd4] ss:$48 sps:$4 sm:$0xff]  }
 0x15f   :  { %v6160_v44 = vld [vmem:[#allocation7 + $0x6d4] ss:$48 sps:$4 sm:$0x3f]  }
 0x161   :  { %2622 = vmatpush1.bf16.msra.mxu1 %v6079_v45  ;;  %2698 = vmatpush1.bf16.msra.mxu0 %v6082_v46  ;;  %v6162_v45 = vld [vmem:[#allocation7 + $0x6d0] ss:$48 sps:$4 sm:$0x3f]  }
 0x162   :  { %2623 = vmatprep.subr.bf16.mxu1 %v6087_v47  ;;  %2699 = vmatprep.subr.bf16.mxu0 %v6090_v48  ;;  %v6157_v46 = vld [vmem:[#allocation7 + $0xd0] ss:$48 sps:$4 sm:$0xff]   ;;  %v2582_v47 = vsel %vm2568_vm7, %v6162_v45, 0  ;;  %v6165_v48 = vld [vmem:[#allocation7 + $0x134] ss:$48 sps:$4 sm:$0xff]  }
 0x163   :  { %v6235_v45 = vld [vmem:[#allocation7 + $0x5b0] ss:$48 sps:$4 sm:$0xff]  }
 0x165   :  { %2624 = vmatpush1.bf16.msra.mxu1 %v6085_v49  ;;  %2700 = vmatpush1.bf16.msra.mxu0 %v6088_v50  ;;  %v6168_v49 = vld [vmem:[#allocation7 + $0x1c] ss:$48 sps:$4 sm:$0xff]   ;;  %v6163_v50 = vld [vmem:[#allocation7 + $0x130] ss:$48 sps:$4 sm:$0xff]  }
 0x166   :  { %2625 = vmatprep.subr.bf16.mxu1 %v6093_v51  ;;  %2701 = vmatprep.subr.bf16.mxu0 %v6096_v52  ;;  %v6166_v51 = vld [vmem:[#allocation7 + $0x18] ss:$48 sps:$4 sm:$0xff]   ;;  %v6171_v52 = vld [vmem:[#allocation7 + $0x194] ss:$48 sps:$4 sm:$0xff]  }
 0x169   :  { %2626 = vmatpush1.bf16.msra.mxu1 %v6091_v53  ;;  %2702 = vmatpush1.bf16.msra.mxu0 %v6094_v55  ;;  %v6174_v53 = vld [vmem:[#allocation7 + $0x7c] ss:$48 sps:$4 sm:$0xff]   ;;  %v6169_v55 = vld [vmem:[#allocation7 + $0x190] ss:$48 sps:$4 sm:$0xff]  }
 0x16a   :  { %2627 = vmatprep.subr.bf16.mxu1 %v6099_v56  ;;  %2703 = vmatprep.subr.bf16.mxu0 %v6102_v58  ;;  %v6172_v56 = vld [vmem:[#allocation7 + $0x78] ss:$48 sps:$4 sm:$0xff]   ;;  %v6177_v58 = vld [vmem:[#allocation7 + $0x1f4] ss:$48 sps:$4 sm:$0xff]  }
 0x16d   :  { %2628 = vmatpush1.bf16.msra.mxu1 %v6097_v59  ;;  %2704 = vmatpush1.bf16.msra.mxu0 %v6100_v60  ;;  %v6180_v59 = vld [vmem:[#allocation7 + $0xdc] ss:$48 sps:$4 sm:$0xff]   ;;  %v6175_v60 = vld [vmem:[#allocation7 + $0x1f0] ss:$48 sps:$4 sm:$0xff]  }
 0x16e   :  { %2629 = vmatprep.subr.bf16.mxu1 %v6105_v62  ;;  %2705 = vmatprep.subr.bf16.mxu0 %v6108_v2  ;;  %v6178_v62 = vld [vmem:[#allocation7 + $0xd8] ss:$48 sps:$4 sm:$0xff]   ;;  %v6183_v2 = vld [vmem:[#allocation7 + $0x254] ss:$48 sps:$4 sm:$0xff]  }
 0x171   :  { %2630 = vmatpush1.bf16.msra.mxu1 %v6103_v4  ;;  %2706 = vmatpush1.bf16.msra.mxu0 %v6106_v5  ;;  %v6186_v4 = vld [vmem:[#allocation7 + $0x13c] ss:$48 sps:$4 sm:$0xff]   ;;  %v6181_v5 = vld [vmem:[#allocation7 + $0x250] ss:$48 sps:$4 sm:$0xff]  }
 0x172   :  { %2631 = vmatprep.subr.bf16.mxu1 %v6111_v6  ;;  %2707 = vmatprep.subr.bf16.mxu0 %v6114_v7  ;;  %v6184_v6 = vld [vmem:[#allocation7 + $0x138] ss:$48 sps:$4 sm:$0xff]   ;;  %v6189_v7 = vld [vmem:[#allocation7 + $0x2b4] ss:$48 sps:$4 sm:$0xff]  }
 0x175   :  { %2632 = vmatpush1.bf16.msra.mxu1 %v6109_v8  ;;  %2708 = vmatpush1.bf16.msra.mxu0 %v6112_v9  ;;  %v6192_v8 = vld [vmem:[#allocation7 + $0x19c] ss:$48 sps:$4 sm:$0xff]   ;;  %v6187_v9 = vld [vmem:[#allocation7 + $0x2b0] ss:$48 sps:$4 sm:$0xff]  }
 0x176   :  { %2633 = vmatprep.subr.bf16.mxu1 %v6117_v10  ;;  %2709 = vmatprep.subr.bf16.mxu0 %v6120_v12  ;;  %v6190_v10 = vld [vmem:[#allocation7 + $0x198] ss:$48 sps:$4 sm:$0xff]   ;;  %v6195_v12 = vld [vmem:[#allocation7 + $0x314] ss:$48 sps:$4 sm:$0xff]  }
 0x179   :  { %2634 = vmatpush1.bf16.msra.mxu1 %v6115_v14  ;;  %2710 = vmatpush1.bf16.msra.mxu0 %v6118_v15  ;;  %v6198_v14 = vld [vmem:[#allocation7 + $0x1fc] ss:$48 sps:$4 sm:$0xff]   ;;  %v6193_v15 = vld [vmem:[#allocation7 + $0x310] ss:$48 sps:$4 sm:$0xff]  }
 0x17a   :  { %2635 = vmatprep.subr.bf16.mxu1 %v6123_v16  ;;  %2711 = vmatprep.subr.bf16.mxu0 %v6126_v17  ;;  %v6196_v16 = vld [vmem:[#allocation7 + $0x1f8] ss:$48 sps:$4 sm:$0xff]   ;;  %v6201_v17 = vld [vmem:[#allocation7 + $0x374] ss:$48 sps:$4 sm:$0xff]  }
 0x17d   :  { %2636 = vmatpush1.bf16.msra.mxu1 %v6121_v18  ;;  %2712 = vmatpush1.bf16.msra.mxu0 %v6124_v19  ;;  %v6204_v18 = vld [vmem:[#allocation7 + $0x25c] ss:$48 sps:$4 sm:$0xff]   ;;  %v6199_v19 = vld [vmem:[#allocation7 + $0x370] ss:$48 sps:$4 sm:$0xff]  }
 0x17e   :  { %2713 = vmatprep.subr.bf16.mxu0 %v6129_v20  ;;  %2728 = vmatprep.subr.bf16.mxu1 %v6132_v21  ;;  %v6202_v20 = vld [vmem:[#allocation7 + $0x258] ss:$48 sps:$4 sm:$0xff]   ;;  %v6207_v21 = vld [vmem:[#allocation7 + $0x3d4] ss:$48 sps:$4 sm:$0xff]  }
 0x180   :  { %2638 = vmatmul.mubr.bf16.vlgmr.msra.gmra.mrb[16].mxu1 %v7112_v22 }
 0x181   :  { %2714 = vmatpush1.bf16.msra.mxu0 %v6127_v23  ;;  %2729 = vmatpush1.bf16.msra.mxu1 %v6130_v24  ;;  %v6210_v23 = vld [vmem:[#allocation7 + $0x2bc] ss:$48 sps:$4 sm:$0xff]   ;;  %v6205_v24 = vld [vmem:[#allocation7 + $0x3d0] ss:$48 sps:$4 sm:$0xff]  }
 0x182   :  { %2715 = vmatprep.subr.bf16.mxu0 %v6135_v26  ;;  %2730 = vmatprep.subr.bf16.mxu1 %v6138_v27  ;;  %v6208_v26 = vld [vmem:[#allocation7 + $0x2b8] ss:$48 sps:$4 sm:$0xff]   ;;  %v6213_v27 = vld [vmem:[#allocation7 + $0x434] ss:$48 sps:$4 sm:$0xff]  }
 0x183   :  { %2760 = vmatprep.mubr.bf16.mxu1 %v6886_v0 }
 0x185   :  { %2716 = vmatpush1.bf16.msra.mxu0 %v6133_v28  ;;  %2731 = vmatpush1.bf16.msra.mxu1 %v6136_v29  ;;  %v6216_v28 = vld [vmem:[#allocation7 + $0x31c] ss:$48 sps:$4 sm:$0xff]   ;;  %v6211_v29 = vld [vmem:[#allocation7 + $0x430] ss:$48 sps:$4 sm:$0xff]  }
 0x186   :  { %2717 = vmatprep.subr.bf16.mxu0 %v6141_v30  ;;  %5562 = vmatprep.subr.msk.bf16.mxu1 %vm2568_vm7, %v6142_v31  ;;  %v6214_v30 = vld [vmem:[#allocation7 + $0x318] ss:$48 sps:$4 sm:$0xff]   ;;  %v6219_v31 = vld [vmem:[#allocation7 + $0x494] ss:$48 sps:$4 sm:$0xff]  }
 0x189   :  { %2718 = vmatpush1.bf16.msra.mxu0 %v6139_v32  ;;  %2733 = vmatpush1.bf16.msra.mxu1 %v2576_v33  ;;  %v6217_v32 = vld [vmem:[#allocation7 + $0x490] ss:$48 sps:$4 sm:$0xff]   ;;  %v6220_v33 = vld [vmem:[#allocation7 + $0x378] ss:$48 sps:$4 sm:$0xff]  }
 0x18a   :  { %2769 = vmatprep.subr.bf16.mxu1 %v6147_v34  ;;  %2810 = vmatprep.subr.bf16.mxu0 %v6150_v35  ;;  %v6225_v34 = vld [vmem:[#allocation7 + $0x4f4] ss:$48 sps:$4 sm:$0xff]   ;;  %v6228_v35 = vld [vmem:[#allocation7 + $0x3dc] ss:$48 sps:$4 sm:$0xff]  }
 0x18c   :  { %2720 = vmatmul.mubr.bf16.vlgmr.msra.gmra.mrb[8].mxu0 %v7112_v22  ;;  %5563 = vmatmul.mubr.msk.bf16.vlgmr.msra.gmra.mrb[20].mxu1 %vm2564_vm8, %v7105_v25 }
 0x18d   :  { %2770 = vmatpush1.bf16.msra.mxu1 %v6145_v36  ;;  %2811 = vmatpush1.bf16.msra.mxu0 %v6148_v37  ;;  %v6223_v36 = vld [vmem:[#allocation7 + $0x4f0] ss:$48 sps:$4 sm:$0xff]   ;;  %v6226_v37 = vld [vmem:[#allocation7 + $0x3d8] ss:$48 sps:$4 sm:$0xff]  }
 0x18e   :  { %2771 = vmatprep.subr.bf16.mxu1 %v6153_v38  ;;  %2812 = vmatprep.subr.bf16.mxu0 %v6156_v39  ;;  %v6231_v38 = vld [vmem:[#allocation7 + $0x554] ss:$48 sps:$4 sm:$0xff]   ;;  %v6234_v39 = vld [vmem:[#allocation7 + $0x43c] ss:$48 sps:$4 sm:$0xff]  }
 0x18f   :  { %2842 = vmatprep.mubr.bf16.mxu0 %v6886_v0  ;;  %2801 = vmatprep.mubr.bf16.mxu1 %v7098_v13 }
 0x191   :  { %2772 = vmatpush1.bf16.msra.mxu1 %v6151_v41  ;;  %2813 = vmatpush1.bf16.msra.mxu0 %v6154_v42  ;;  %v6229_v41 = vld [vmem:[#allocation7 + $0x550] ss:$48 sps:$4 sm:$0xff]   ;;  %v6232_v42 = vld [vmem:[#allocation7 + $0x438] ss:$48 sps:$4 sm:$0xff]  }
 0x192   :  { %2773 = vmatprep.subr.bf16.mxu1 %v6159_v43  ;;  %5564 = vmatprep.subr.msk.bf16.mxu0 %vm2568_vm7, %v6160_v44  ;;  %v6237_v43 = vld [vmem:[#allocation7 + $0x5b4] ss:$48 sps:$4 sm:$0xff]   ;;  %v6240_v44 = vld [vmem:[#allocation7 + $0x49c] ss:$48 sps:$4 sm:$0xff]  }
 0x195   :  { %2774 = vmatpush1.bf16.msra.mxu1 %v6157_v46  ;;  %2815 = vmatpush1.bf16.msra.mxu0 %v2582_v47  ;;  %v6238_v46 = vld [vmem:[#allocation7 + $0x498] ss:$48 sps:$4 sm:$0xff]   ;;  %v6243_v47 = vld [vmem:[#allocation7 + $0x4fc] ss:$48 sps:$4 sm:$0xff]  }
 0x196   :  { %2775 = vmatprep.subr.bf16.mxu1 %v6165_v48  ;;  %2851 = vmatprep.subr.bf16.mxu0 %v6168_v49  ;;  %v6246_v48 = vld [vmem:[#allocation7 + $0x61c] ss:$48 sps:$4 sm:$0xff]   ;;  %v6241_v49 = vld [vmem:[#allocation7 + $0x4f8] ss:$48 sps:$4 sm:$0xff]  }
 0x198   :  { %5565 = vmatmul.mubr.msk.bf16.vlgmr.msra.gmra.mrb[12].mxu0 %vm2564_vm8, %v7105_v25 }
 0x199   :  { %2776 = vmatpush1.bf16.msra.mxu1 %v6163_v50  ;;  %2852 = vmatpush1.bf16.msra.mxu0 %v6166_v51  ;;  %v6244_v50 = vld [vmem:[#allocation7 + $0x618] ss:$48 sps:$4 sm:$0xff]   ;;  %v6249_v51 = vld [vmem:[#allocation7 + $0x55c] ss:$48 sps:$4 sm:$0xff]  }
 0x19a   :  { %2777 = vmatprep.subr.bf16.mxu1 %v6171_v52  ;;  %2853 = vmatprep.subr.bf16.mxu0 %v6174_v53  ;;  %v6252_v52 = vld [vmem:[#allocation7 + $0x67c] ss:$48 sps:$4 sm:$0xff]   ;;  %v6247_v53 = vld [vmem:[#allocation7 + $0x558] ss:$48 sps:$4 sm:$0xff]  }
 0x19b   :  { %2883 = vmatprep.mubr.bf16.mxu0 %v7098_v13 }
 0x19d   :  { %2778 = vmatpush1.bf16.msra.mxu1 %v6169_v55  ;;  %2854 = vmatpush1.bf16.msra.mxu0 %v6172_v56  ;;  %v6250_v55 = vld [vmem:[#allocation7 + $0x678] ss:$48 sps:$4 sm:$0xff]   ;;  %v6255_v56 = vld [vmem:[#allocation7 + $0x5bc] ss:$48 sps:$4 sm:$0xff]  }
 0x19e   :  { %2779 = vmatprep.subr.bf16.mxu1 %v6177_v58  ;;  %2855 = vmatprep.subr.bf16.mxu0 %v6180_v59  ;;  %v6256_v58 = vld [vmem:[#allocation7 + $0x6dc] ss:$48 sps:$4 sm:$0x3f]   ;;  %v6258_v59 = vld [vmem:[#allocation7 + $0x6d8] ss:$48 sps:$4 sm:$0x3f]  }
 0x1a1   :  { %2780 = vmatpush1.bf16.msra.mxu1 %v6175_v60  ;;  %2856 = vmatpush1.bf16.msra.mxu0 %v6178_v62  ;;  %v6253_v60 = vld [vmem:[#allocation7 + $0x5b8] ss:$48 sps:$4 sm:$0xff]   ;;  %v2588_v62 = vsel %vm2568_vm7, %v6258_v59, 0  ;;  %v6330_v59 = vld [vmem:[#allocation7 + $0x32c] ss:$48 sps:$4 sm:$0xff]  }
 0x1a2   :  { %2781 = vmatprep.subr.bf16.mxu1 %v6183_v2  ;;  %2857 = vmatprep.subr.bf16.mxu0 %v6186_v4  ;;  %v6261_v2 = vld [vmem:[#allocation7 + $0x24] ss:$48 sps:$4 sm:$0xff]  }
 0x1a3   :  { %v6264_v4 = vld [vmem:[#allocation7 + $0x624] ss:$48 sps:$4 sm:$0xff]  }
 0x1a5   :  { %2782 = vmatpush1.bf16.msra.mxu1 %v6181_v5  ;;  %2858 = vmatpush1.bf16.msra.mxu0 %v6184_v6  ;;  %v6259_v5 = vld [vmem:[#allocation7 + $0x20] ss:$48 sps:$4 sm:$0xff]  }
 0x1a6   :  { %2783 = vmatprep.subr.bf16.mxu1 %v6189_v7  ;;  %2859 = vmatprep.subr.bf16.mxu0 %v6192_v8  ;;  %v6262_v6 = vld [vmem:[#allocation7 + $0x620] ss:$48 sps:$4 sm:$0xff]   ;;  %v6267_v7 = vld [vmem:[#allocation7 + $0x84] ss:$48 sps:$4 sm:$0xff]  }
 0x1a7   :  { %v6270_v8 = vld [vmem:[#allocation7 + $0x684] ss:$48 sps:$4 sm:$0xff]  }
 0x1a9   :  { %2784 = vmatpush1.bf16.msra.mxu1 %v6187_v9  ;;  %2860 = vmatpush1.bf16.msra.mxu0 %v6190_v10  ;;  %v6265_v9 = vld [vmem:[#allocation7 + $0x80] ss:$48 sps:$4 sm:$0xff]  }
 0x1aa   :  { %2785 = vmatprep.subr.bf16.mxu1 %v6195_v12  ;;  %2861 = vmatprep.subr.bf16.mxu0 %v6198_v14  ;;  %v6268_v10 = vld [vmem:[#allocation7 + $0x680] ss:$48 sps:$4 sm:$0xff]   ;;  %v6273_v12 = vld [vmem:[#allocation7 + $0xe4] ss:$48 sps:$4 sm:$0xff]  }
 0x1ab   :  { %v6274_v14 = vld [vmem:[#allocation7 + $0x6e4] ss:$48 sps:$4 sm:$0x3f]  }
 0x1ad   :  { %2786 = vmatpush1.bf16.msra.mxu1 %v6193_v15  ;;  %2862 = vmatpush1.bf16.msra.mxu0 %v6196_v16  ;;  %v6276_v15 = vld [vmem:[#allocation7 + $0x6e0] ss:$48 sps:$4 sm:$0x3f]  }
 0x1ae   :  { %2787 = vmatprep.subr.bf16.mxu1 %v6201_v17  ;;  %2863 = vmatprep.subr.bf16.mxu0 %v6204_v18  ;;  %v6271_v16 = vld [vmem:[#allocation7 + $0xe0] ss:$48 sps:$4 sm:$0xff]   ;;  %v2594_v17 = vsel %vm2568_vm7, %v6276_v15, 0  ;;  %v6279_v18 = vld [vmem:[#allocation7 + $0x144] ss:$48 sps:$4 sm:$0xff]  }
 0x1af   :  { %v7147_v15 = vld [vmem:[%s7421_s4] sm:$0x7] }
 0x1b1   :  { %2788 = vmatpush1.bf16.msra.mxu1 %v6199_v19  ;;  %2864 = vmatpush1.bf16.msra.mxu0 %v6202_v20  ;;  %v6282_v19 = vld [vmem:[#allocation7 + $0x2c] ss:$48 sps:$4 sm:$0xff]   ;;  %v6277_v20 = vld [vmem:[#allocation7 + $0x140] ss:$48 sps:$4 sm:$0xff]  }
 0x1b2   :  { %2789 = vmatprep.subr.bf16.mxu1 %v6207_v21  ;;  %2865 = vmatprep.subr.bf16.mxu0 %v6210_v23  ;;  %v6280_v21 = vld [vmem:[#allocation7 + $0x28] ss:$48 sps:$4 sm:$0xff]   ;;  %v6285_v23 = vld [vmem:[#allocation7 + $0x1a4] ss:$48 sps:$4 sm:$0xff]  }
 0x1b5   :  { %2790 = vmatpush1.bf16.msra.mxu1 %v6205_v24  ;;  %2866 = vmatpush1.bf16.msra.mxu0 %v6208_v26  ;;  %v6288_v24 = vld [vmem:[#allocation7 + $0x8c] ss:$48 sps:$4 sm:$0xff]   ;;  %v6283_v26 = vld [vmem:[#allocation7 + $0x1a0] ss:$48 sps:$4 sm:$0xff]  }
 0x1b6   :  { %2791 = vmatprep.subr.bf16.mxu1 %v6213_v27  ;;  %2867 = vmatprep.subr.bf16.mxu0 %v6216_v28  ;;  %v6286_v27 = vld [vmem:[#allocation7 + $0x88] ss:$48 sps:$4 sm:$0xff]   ;;  %v6291_v28 = vld [vmem:[#allocation7 + $0x204] ss:$48 sps:$4 sm:$0xff]  }
 0x1b9   :  { %2792 = vmatpush1.bf16.msra.mxu1 %v6211_v29  ;;  %2868 = vmatpush1.bf16.msra.mxu0 %v6214_v30  ;;  %v6294_v29 = vld [vmem:[#allocation7 + $0xec] ss:$48 sps:$4 sm:$0xff]   ;;  %v6289_v30 = vld [vmem:[#allocation7 + $0x200] ss:$48 sps:$4 sm:$0xff]  }
 0x1ba   :  { %2793 = vmatprep.subr.bf16.mxu1 %v6219_v31  ;;  %2869 = vmatprep.subr.bf16.mxu0 %v6222_v57  ;;  %v6292_v31 = vld [vmem:[#allocation7 + $0xe8] ss:$48 sps:$4 sm:$0xff]   ;;  %v6297_v57 = vld [vmem:[#allocation7 + $0x264] ss:$48 sps:$4 sm:$0xff]  }
 0x1bd   :  { %2794 = vmatpush1.bf16.msra.mxu1 %v6217_v32  ;;  %2870 = vmatpush1.bf16.msra.mxu0 %v6220_v33  ;;  %v6300_v32 = vld [vmem:[#allocation7 + $0x14c] ss:$48 sps:$4 sm:$0xff]   ;;  %v6295_v33 = vld [vmem:[#allocation7 + $0x260] ss:$48 sps:$4 sm:$0xff]  }
 0x1be   :  { %2795 = vmatprep.subr.bf16.mxu1 %v6225_v34  ;;  %2871 = vmatprep.subr.bf16.mxu0 %v6228_v35  ;;  %v6298_v34 = vld [vmem:[#allocation7 + $0x148] ss:$48 sps:$4 sm:$0xff]   ;;  %v6303_v35 = vld [vmem:[#allocation7 + $0x2c4] ss:$48 sps:$4 sm:$0xff]  }
 0x1c1   :  { %2796 = vmatpush1.bf16.msra.mxu1 %v6223_v36  ;;  %2872 = vmatpush1.bf16.msra.mxu0 %v6226_v37  ;;  %v6306_v36 = vld [vmem:[#allocation7 + $0x1ac] ss:$48 sps:$4 sm:$0xff]  }
 0x1c2   :  { %2797 = vmatprep.subr.bf16.mxu1 %v6231_v38  ;;  %2873 = vmatprep.subr.bf16.mxu0 %v6234_v39 }
 0x1c5   :  { %2798 = vmatpush1.bf16.msra.mxu1 %v6229_v41  ;;  %2874 = vmatpush1.bf16.msra.mxu0 %v6232_v42  ;;  %v6301_v41 = vld [vmem:[#allocation7 + $0x2c0] ss:$48 sps:$4 sm:$0xff]   ;;  %v6304_v42 = vld [vmem:[#allocation7 + $0x1a8] ss:$48 sps:$4 sm:$0xff]  }
 0x1c6   :  { %2799 = vmatprep.subr.bf16.mxu1 %v6237_v43  ;;  %2875 = vmatprep.subr.bf16.mxu0 %v6240_v44  ;;  %v6309_v44 = vld [vmem:[#allocation7 + $0x324] ss:$48 sps:$4 sm:$0xff]  }
 0x1c9   :  { %2800 = vmatpush1.bf16.msra.mxu1 %v6235_v45  ;;  %2876 = vmatpush1.bf16.msra.mxu0 %v6238_v46  ;;  %v6312_v45 = vld [vmem:[#allocation7 + $0x20c] ss:$48 sps:$4 sm:$0xff]   ;;  %v6307_v46 = vld [vmem:[#allocation7 + $0x320] ss:$48 sps:$4 sm:$0xff]  }
 0x1ca   :  { %2877 = vmatprep.subr.bf16.mxu0 %v6243_v47  ;;  %2892 = vmatprep.subr.bf16.mxu1 %v6246_v48  ;;  %v6310_v47 = vld [vmem:[#allocation7 + $0x208] ss:$48 sps:$4 sm:$0xff]   ;;  %v6315_v48 = vld [vmem:[#allocation7 + $0x384] ss:$48 sps:$4 sm:$0xff]  }
 0x1cc   :  { %2802 = vmatmul.mubr.bf16.vlgmr.msra.gmra.mrb[24].mxu1 %v7112_v22 }
 0x1cd   :  { %2878 = vmatpush1.bf16.msra.mxu0 %v6241_v49  ;;  %2893 = vmatpush1.bf16.msra.mxu1 %v6244_v50  ;;  %v6318_v49 = vld [vmem:[#allocation7 + $0x26c] ss:$48 sps:$4 sm:$0xff]   ;;  %v6313_v50 = vld [vmem:[#allocation7 + $0x380] ss:$48 sps:$4 sm:$0xff]  }
 0x1ce   :  { %2879 = vmatprep.subr.bf16.mxu0 %v6249_v51  ;;  %2894 = vmatprep.subr.bf16.mxu1 %v6252_v52  ;;  %v6316_v51 = vld [vmem:[#allocation7 + $0x268] ss:$48 sps:$4 sm:$0xff]   ;;  %v6321_v52 = vld [vmem:[#allocation7 + $0x3e4] ss:$48 sps:$4 sm:$0xff]  }
 0x1cf   :  { %2924 = vmatprep.mubr.bf16.mxu1 %v6886_v0 }
 0x1d1   :  { %2880 = vmatpush1.bf16.msra.mxu0 %v6247_v53  ;;  %2895 = vmatpush1.bf16.msra.mxu1 %v6250_v55  ;;  %v6324_v53 = vld [vmem:[#allocation7 + $0x2cc] ss:$48 sps:$4 sm:$0xff]   ;;  %v6319_v55 = vld [vmem:[#allocation7 + $0x3e0] ss:$48 sps:$4 sm:$0xff]  }
 0x1d2   :  { %2881 = vmatprep.subr.bf16.mxu0 %v6255_v56  ;;  %5566 = vmatprep.subr.msk.bf16.mxu1 %vm2568_vm7, %v6256_v58  ;;  %v6322_v56 = vld [vmem:[#allocation7 + $0x2c8] ss:$48 sps:$4 sm:$0xff]   ;;  %v6327_v58 = vld [vmem:[#allocation7 + $0x444] ss:$48 sps:$4 sm:$0xff]  }
 0x1d5   :  { %2882 = vmatpush1.bf16.msra.mxu0 %v6253_v60  ;;  %2897 = vmatpush1.bf16.msra.mxu1 %v2588_v62  ;;  %v6325_v60 = vld [vmem:[#allocation7 + $0x440] ss:$48 sps:$4 sm:$0xff]   ;;  %v6328_v62 = vld [vmem:[#allocation7 + $0x328] ss:$48 sps:$4 sm:$0xff]  }
 0x1d6   :  { %2933 = vmatprep.subr.bf16.mxu1 %v6261_v2  ;;  %2974 = vmatprep.subr.bf16.mxu0 %v6264_v4  ;;  %v6333_v2 = vld [vmem:[#allocation7 + $0x4a4] ss:$48 sps:$4 sm:$0xff]   ;;  %v6336_v4 = vld [vmem:[#allocation7 + $0x38c] ss:$48 sps:$4 sm:$0xff]  }
 0x1d8   :  { %2884 = vmatmul.mubr.bf16.vlgmr.msra.gmra.mrb[16].mxu0 %v7112_v22  ;;  %5567 = vmatmul.mubr.msk.bf16.vlgmr.msra.gmra.mrb[28].mxu1 %vm2564_vm8, %v7105_v25 }
 0x1d9   :  { %2934 = vmatpush1.bf16.msra.mxu1 %v6259_v5  ;;  %2975 = vmatpush1.bf16.msra.mxu0 %v6262_v6  ;;  %v6331_v5 = vld [vmem:[#allocation7 + $0x4a0] ss:$48 sps:$4 sm:$0xff]   ;;  %v6334_v6 = vld [vmem:[#allocation7 + $0x388] ss:$48 sps:$4 sm:$0xff]  }
 0x1da   :  { %2935 = vmatprep.subr.bf16.mxu1 %v6267_v7  ;;  %2976 = vmatprep.subr.bf16.mxu0 %v6270_v8  ;;  %v6339_v7 = vld [vmem:[#allocation7 + $0x504] ss:$48 sps:$4 sm:$0xff]   ;;  %v6342_v8 = vld [vmem:[#allocation7 + $0x3ec] ss:$48 sps:$4 sm:$0xff]  }
 0x1db   :  { %3006 = vmatprep.mubr.bf16.mxu0 %v6886_v0  ;;  %2965 = vmatprep.mubr.bf16.mxu1 %v7098_v13 }
 0x1dd   :  { %2936 = vmatpush1.bf16.msra.mxu1 %v6265_v9  ;;  %2977 = vmatpush1.bf16.msra.mxu0 %v6268_v10  ;;  %v6337_v9 = vld [vmem:[#allocation7 + $0x500] ss:$48 sps:$4 sm:$0xff]   ;;  %v6340_v10 = vld [vmem:[#allocation7 + $0x3e8] ss:$48 sps:$4 sm:$0xff]  }
 0x1de   :  { %2937 = vmatprep.subr.bf16.mxu1 %v6273_v12  ;;  %5568 = vmatprep.subr.msk.bf16.mxu0 %vm2568_vm7, %v6274_v14  ;;  %v6345_v12 = vld [vmem:[#allocation7 + $0x564] ss:$48 sps:$4 sm:$0xff]   ;;  %v6348_v14 = vld [vmem:[#allocation7 + $0x44c] ss:$48 sps:$4 sm:$0xff]  }
 0x1e1   :  { %2938 = vmatpush1.bf16.msra.mxu1 %v6271_v16  ;;  %2979 = vmatpush1.bf16.msra.mxu0 %v2594_v17  ;;  %v6343_v16 = vld [vmem:[#allocation7 + $0x560] ss:$48 sps:$4 sm:$0xff]   ;;  %v6346_v17 = vld [vmem:[#allocation7 + $0x448] ss:$48 sps:$4 sm:$0xff]  }
 0x1e2   :  { %2939 = vmatprep.subr.bf16.mxu1 %v6279_v18  ;;  %3015 = vmatprep.subr.bf16.mxu0 %v6282_v19  ;;  %v379_v18 = vrot.slane %v7147_v15, %v7079_v40  ;;  %v6351_v19 = vld [vmem:[#allocation7 + $0x5c4] ss:$48 sps:$4 sm:$0xff]  }
 0x1e4   :  { %5569 = vmatmul.mubr.msk.bf16.vlgmr.msra.gmra.mrb[20].mxu0 %vm2564_vm8, %v7105_v25 }
 0x1e5   :  { %2940 = vmatpush1.bf16.msra.mxu1 %v6277_v20  ;;  %3016 = vmatpush1.bf16.msra.mxu0 %v6280_v21  ;;  %v6354_v20 = vld [vmem:[#allocation7 + $0x4ac] ss:$48 sps:$4 sm:$0xff]   ;;  %v6349_v21 = vld [vmem:[#allocation7 + $0x5c0] ss:$48 sps:$4 sm:$0xff]  }
 0x1e6   :  { %2941 = vmatprep.subr.bf16.mxu1 %v6285_v23  ;;  %3017 = vmatprep.subr.bf16.mxu0 %v6288_v24  ;;  %v6352_v23 = vld [vmem:[#allocation7 + $0x4a8] ss:$48 sps:$4 sm:$0xff]  }
 0x1e7   :  { %3047 = vmatprep.mubr.bf16.mxu0 %v7098_v13 }
 0x1e9   :  { %2942 = vmatpush1.bf16.msra.mxu1 %v6283_v26  ;;  %3018 = vmatpush1.bf16.msra.mxu0 %v6286_v27  ;;  %v6357_v26 = vld [vmem:[#allocation7 + $0x50c] ss:$48 sps:$4 sm:$0xff]  }
 0x1ea   :  { %2943 = vmatprep.subr.bf16.mxu1 %v6291_v28  ;;  %3019 = vmatprep.subr.bf16.mxu0 %v6294_v29  ;;  %v6360_v27 = vld [vmem:[#allocation7 + $0x62c] ss:$48 sps:$4 sm:$0xff]  }
 0x1ed   :  { %2944 = vmatpush1.bf16.msra.mxu1 %v6289_v30  ;;  %3020 = vmatpush1.bf16.msra.mxu0 %v6292_v31 }
 0x1ee   :  { %2945 = vmatprep.subr.bf16.mxu1 %v6297_v57  ;;  %3021 = vmatprep.subr.bf16.mxu0 %v6300_v32 }
 0x1ef   :  { %v5858_v37 = vpop.f32.mrb[8].mxu1 }
 0x1f0   :  { %v5859_v38 = vpop.f32.mrb[9].mxu1 }
 0x1f1   :  { %v7142_v39 = vadd.f32 %v5859_v38, %v5858_v37  ;;  %2946 = vmatpush1.bf16.msra.mxu1 %v6295_v33  ;;  %3022 = vmatpush1.bf16.msra.mxu0 %v6298_v34  ;;  %v5861_v13 = vpop.f32.mrb[10].mxu1  ;;  %v6355_v34 = vld [vmem:[#allocation7 + $0x508] ss:$48 sps:$4 sm:$0xff]   ;;  %v6363_v38 = vld [vmem:[#allocation7 + $0x56c] ss:$48 sps:$4 sm:$0xff]  }
 0x1f2   :  { %v5862_v43 = vpop.f32.mrb[11].mxu1  ;;  %2947 = vmatprep.subr.bf16.mxu1 %v6303_v35  ;;  %3023 = vmatprep.subr.bf16.mxu0 %v6306_v36  ;;  %v6358_v35 = vld [vmem:[#allocation7 + $0x628] ss:$48 sps:$4 sm:$0xff]   ;;  %v375_v13 = vrot.slane %v7147_v15, %v7063_v3 }
 0x1f3   :  { %v904_v24 = vadd.f32 %v7142_v39, %v379_v18  ;;  %v6366_v39 = vld [vmem:[#allocation7 + $0x68c] ss:$48 sps:$4 sm:$0xff]   ;;  %v6399_v18 = vld [vmem:[#allocation5 + $0x184] ss:$48 sps:$4 sm:$0xff]  }
 0x1f4   :  { %v6369_v43 = vld [vmem:[#allocation7 + $0x5cc] ss:$48 sps:$4 sm:$0xff]  }
 0x1f5   :  { %2948 = vmatpush1.bf16.msra.mxu1 %v6301_v41  ;;  %3024 = vmatpush1.bf16.msra.mxu0 %v6304_v42  ;;  %v6361_v41 = vld [vmem:[#allocation7 + $0x568] ss:$48 sps:$4 sm:$0xff]  }
 0x1f6   :  { %2949 = vmatprep.subr.bf16.mxu1 %v6309_v44  ;;  %3025 = vmatprep.subr.bf16.mxu0 %v6312_v45  ;;  %v6364_v42 = vld [vmem:[#allocation7 + $0x688] ss:$48 sps:$4 sm:$0xff]   ;;  %v6370_v44 = vld [vmem:[#allocation7 + $0x6ec] ss:$48 sps:$4 sm:$0x3f]  }
 0x1f7   :  { %v6372_v45 = vld [vmem:[#allocation7 + $0x6e8] ss:$48 sps:$4 sm:$0x3f]  }
 0x1f9   :  { %2950 = vmatpush1.bf16.msra.mxu1 %v6307_v46  ;;  %3026 = vmatpush1.bf16.msra.mxu0 %v6310_v47  ;;  %v6367_v47 = vld [vmem:[#allocation7 + $0x5c8] ss:$48 sps:$4 sm:$0xff]  }
 0x1fa   :  { %2951 = vmatprep.subr.bf16.mxu1 %v6315_v48  ;;  %3027 = vmatprep.subr.bf16.mxu0 %v6318_v49  ;;  %v2600_v48 = vsel %vm2568_vm7, %v6372_v45, 0  ;;  %v6375_v49 = vld [vmem:[#allocation5 + $0x4] ss:$48 sps:$4 sm:$0xff]   ;;  %v6438_v45 = vld [vmem:[#allocation5 + $0x2ac] ss:$48 sps:$4 sm:$0xff]  }
 0x1fd   :  { %2952 = vmatpush1.bf16.msra.mxu1 %v6313_v50  ;;  %3028 = vmatpush1.bf16.msra.mxu0 %v6316_v51  ;;  %v6378_v50 = vld [vmem:[#allocation5 + $0x604] ss:$48 sps:$4 sm:$0xff]  }
 0x1fe   :  { %2953 = vmatprep.subr.bf16.mxu1 %v6321_v52  ;;  %3029 = vmatprep.subr.bf16.mxu0 %v6324_v53 }
 0x201   :  { %2954 = vmatpush1.bf16.msra.mxu1 %v6319_v55  ;;  %3030 = vmatpush1.bf16.msra.mxu0 %v6322_v56  ;;  %v6373_v56 = vld [vmem:[#allocation5] ss:$48 sps:$4 sm:$0xff]  }
 0x202   :  { %2955 = vmatprep.subr.bf16.mxu1 %v6327_v58  ;;  %3031 = vmatprep.subr.bf16.mxu0 %v6330_v59  ;;  %v6376_v59 = vld [vmem:[#allocation5 + $0x600] ss:$48 sps:$4 sm:$0xff]  }
 0x205   :  { %2956 = vmatpush1.bf16.msra.mxu1 %v6325_v60  ;;  %3032 = vmatpush1.bf16.msra.mxu0 %v6328_v62  ;;  %v6381_v60 = vld [vmem:[#allocation5 + $0x64] ss:$48 sps:$4 sm:$0xff]  }
 0x206   :  { %2957 = vmatprep.subr.bf16.mxu1 %v6333_v2  ;;  %3033 = vmatprep.subr.bf16.mxu0 %v6336_v4  ;;  %v6384_v2 = vld [vmem:[#allocation5 + $0x664] ss:$48 sps:$4 sm:$0xff]   ;;  %v6379_v4 = vld [vmem:[#allocation5 + $0x60] ss:$48 sps:$4 sm:$0xff]  }
 0x209   :  { %2958 = vmatpush1.bf16.msra.mxu1 %v6331_v5  ;;  %3034 = vmatpush1.bf16.msra.mxu0 %v6334_v6  ;;  %v6382_v5 = vld [vmem:[#allocation5 + $0x660] ss:$48 sps:$4 sm:$0xff]   ;;  %v6387_v6 = vld [vmem:[#allocation5 + $0xc4] ss:$48 sps:$4 sm:$0xff]  }
 0x20a   :  { %2959 = vmatprep.subr.bf16.mxu1 %v6339_v7  ;;  %3035 = vmatprep.subr.bf16.mxu0 %v6342_v8  ;;  %v6388_v7 = vld [vmem:[#allocation5 + $0x6c4] ss:$48 sps:$4 sm:$0x3f]   ;;  %v6390_v8 = vld [vmem:[#allocation5 + $0x6c0] ss:$48 sps:$4 sm:$0x3f]  }
 0x20d   :  { %2960 = vmatpush1.bf16.msra.mxu1 %v6337_v9  ;;  %3036 = vmatpush1.bf16.msra.mxu0 %v6340_v10  ;;  %v6385_v9 = vld [vmem:[#allocation5 + $0xc0] ss:$48 sps:$4 sm:$0xff]   ;;  %v4229_v10 = vsel %vm2568_vm7, %v6390_v8, 0 }
 0x20e   :  { %2961 = vmatprep.subr.bf16.mxu1 %v6345_v12  ;;  %3037 = vmatprep.subr.bf16.mxu0 %v6348_v14  ;;  %v6396_v12 = vld [vmem:[#allocation5 + $0xc] ss:$48 sps:$4 sm:$0xff]   ;;  %v6391_v14 = vld [vmem:[#allocation5 + $0x120] ss:$48 sps:$4 sm:$0xff]  }
 0x211   :  { %2962 = vmatpush1.bf16.msra.mxu1 %v6343_v16  ;;  %3038 = vmatpush1.bf16.msra.mxu0 %v6346_v17  ;;  %v6394_v16 = vld [vmem:[#allocation5 + $0x8] ss:$48 sps:$4 sm:$0xff]  }
 0x212   :  { %2963 = vmatprep.subr.bf16.mxu1 %v6351_v19  ;;  %3039 = vmatprep.subr.bf16.mxu0 %v6354_v20  ;;  %v6402_v19 = vld [vmem:[#allocation5 + $0x6c] ss:$48 sps:$4 sm:$0xff]   ;;  %v6397_v20 = vld [vmem:[#allocation5 + $0x180] ss:$48 sps:$4 sm:$0xff]  }
 0x213   :  { %v7152_v28 = vpop.f32.mrb[0].mxu0  ;;  %v943_v29 = vpop.f32.mrb[12].mxu1 }
 0x214   :  { %v7154_v30 = vadd.f32 %v943_v29, %v904_v24  ;;  %v864_v31 = vpop.f32.mrb[1].mxu0  ;;  %v945_v57 = vpop.f32.mrb[13].mxu1  ;;  %v6408_v24 = vld [vmem:[#allocation5 + $0xcc] ss:$48 sps:$4 sm:$0xff]   ;;  %v6411_v29 = vld [vmem:[#allocation5 + $0x244] ss:$48 sps:$4 sm:$0xff]  }
 0x215   :  { %v866_v32 = vpop.f32.mrb[2].mxu0  ;;  %v946_v33 = vpop.f32.mrb[14].mxu1  ;;  %2964 = vmatpush1.bf16.msra.mxu1 %v6349_v21  ;;  %3040 = vmatpush1.bf16.msra.mxu0 %v6352_v23  ;;  %v5901_v46 = vadd.f32 %v864_v31, %v375_v13  ;;  %v6400_v21 = vld [vmem:[#allocation5 + $0x68] ss:$48 sps:$4 sm:$0xff]   ;;  %v6405_v23 = vld [vmem:[#allocation5 + $0x1e4] ss:$48 sps:$4 sm:$0xff]  }
 0x216   :  { %v867_v36 = vpop.f32.mrb[3].mxu0  ;;  %v947_v37 = vpop.f32.mrb[15].mxu1  ;;  %3041 = vmatprep.subr.bf16.mxu0 %v6357_v26  ;;  %3056 = vmatprep.subr.bf16.mxu1 %v6360_v27  ;;  %v6403_v26 = vld [vmem:[#allocation5 + $0x1e0] ss:$48 sps:$4 sm:$0xff]   ;;  %v6406_v27 = vld [vmem:[#allocation5 + $0xc8] ss:$48 sps:$4 sm:$0xff]  }
 0x217   :  { %v950_v51 = vmax.f32 %v5901_v46, 0.0  ;;  %v6409_v31 = vld [vmem:[#allocation5 + $0x240] ss:$48 sps:$4 sm:$0xff]   ;;  %v6412_v57 = vld [vmem:[#allocation5 + $0x128] ss:$48 sps:$4 sm:$0xff]  }
 0x218   :  { %2966 = vmatmul.mubr.bf16.vlgmr.msra.gmra.mrb[32].mxu1 %v7112_v22  ;;  %v6417_v32 = vld [vmem:[#allocation5 + $0x2a4] ss:$48 sps:$4 sm:$0xff]   ;;  %v6420_v33 = vld [vmem:[#allocation5 + $0x18c] ss:$48 sps:$4 sm:$0xff]   ;;  %v6433_v46 = vld [vmem:[#allocation5 + $0x3c0] ss:$48 sps:$4 sm:$0xff]  }
 0x219   :  { %3042 = vmatpush1.bf16.msra.mxu0 %v6355_v34  ;;  %3057 = vmatpush1.bf16.msra.mxu1 %v6358_v35  ;;  %v7166_v62 = vpack.c.bf16 %v950_v51, %v950_v51  ;;  %v6415_v34 = vld [vmem:[#allocation5 + $0x2a0] ss:$48 sps:$4 sm:$0xff]   ;;  %v6418_v35 = vld [vmem:[#allocation5 + $0x188] ss:$48 sps:$4 sm:$0xff]   ;;  %v6423_v36 = vld [vmem:[#allocation5 + $0x304] ss:$48 sps:$4 sm:$0xff]  }
 0x21a   :  { %3043 = vmatprep.subr.bf16.mxu0 %v6363_v38  ;;  %3058 = vmatprep.subr.bf16.mxu1 %v6366_v39  ;;  %v6426_v37 = vld [vmem:[#allocation5 + $0x1ec] ss:$48 sps:$4 sm:$0xff]   ;;  %v6421_v38 = vld [vmem:[#allocation5 + $0x300] ss:$48 sps:$4 sm:$0xff]   ;;  %v6424_v39 = vld [vmem:[#allocation5 + $0x1e8] ss:$48 sps:$4 sm:$0xff]  }
 0x21b   :  { %3088 = vmatprep.mubr.bf16.mxu1 %v6886_v0  ;;  %v6429_v13 = vld [vmem:[#allocation5 + $0x364] ss:$48 sps:$4 sm:$0xff]   ;;  %v6442_v51 = vld [vmem:[#allocation5 + $0x308] ss:$48 sps:$4 sm:$0xff]  }
 0x21d   :  { %3044 = vmatpush1.bf16.msra.mxu0 %v6361_v41  ;;  %3059 = vmatpush1.bf16.msra.mxu1 %v6364_v42  ;;  %v6432_v41 = vld [vmem:[#allocation5 + $0x24c] ss:$48 sps:$4 sm:$0xff]   ;;  %v6427_v42 = vld [vmem:[#allocation5 + $0x360] ss:$48 sps:$4 sm:$0xff]  }
 0x21e   :  { %3045 = vmatprep.subr.bf16.mxu0 %v6369_v43  ;;  %5570 = vmatprep.subr.msk.bf16.mxu1 %vm2568_vm7, %v6370_v44  ;;  %v6430_v43 = vld [vmem:[#allocation5 + $0x248] ss:$48 sps:$4 sm:$0xff]   ;;  %v6435_v44 = vld [vmem:[#allocation5 + $0x3c4] ss:$48 sps:$4 sm:$0xff]  }
 0x21f   :  { %v7162_v52 = vpop.f32.mrb[4].mxu0 }
 0x220   :  { %v7164_v53 = vpop.f32.mrb[5].mxu0 }
 0x221   :  { %v2684_v55 = vpop.f32.mrb[6].mxu0  ;;  %3046 = vmatpush1.bf16.msra.mxu0 %v6367_v47  ;;  %3061 = vmatpush1.bf16.msra.mxu1 %v2600_v48  ;;  %v6436_v47 = vld [vmem:[#allocation5 + $0x2a8] ss:$48 sps:$4 sm:$0xff]   ;;  %v6441_v48 = vld [vmem:[#allocation5 + $0x424] ss:$48 sps:$4 sm:$0xff]  }
 0x222   :  { %v2685_v58 = vpop.f32.mrb[7].mxu0  ;;  %4264 = vmatprep.subr.bf16.mxu1 %v6375_v49  ;;  %4305 = vmatprep.subr.bf16.mxu0 %v6378_v50  ;;  %v6444_v49 = vld [vmem:[#allocation5 + $0x30c] ss:$48 sps:$4 sm:$0xff]   ;;  %v6439_v50 = vld [vmem:[#allocation5 + $0x420] ss:$48 sps:$4 sm:$0xff]  }
 0x223   :  { %v6447_v55 = vld [vmem:[#allocation5 + $0x484] ss:$48 sps:$4 sm:$0xff]   ;;  %v6445_v58 = vld [vmem:[#allocation5 + $0x480] ss:$48 sps:$4 sm:$0xff]  }
 0x224   :  { %3048 = vmatmul.mubr.bf16.vlgmr.msra.gmra.mrb[24].mxu0 %v7112_v22  ;;  %5571 = vmatmul.mubr.msk.bf16.vlgmr.msra.gmra.mrb[36].mxu1 %vm2564_vm8, %v7105_v25  ;;  %v6393_v22 = vld [vmem:[#allocation5 + $0x124] ss:$48 sps:$4 sm:$0xff]   ;;  %v951_v25 = vmax.f32 %v7154_v30, 0.0  ;;  %v6414_v30 = vld [vmem:[#allocation5 + $0x12c] ss:$48 sps:$4 sm:$0xff]  }
 0x225   :  { %4265 = vmatpush1.bf16.msra.mxu1 %v6373_v56  ;;  %4296 = vmatprep.mubr.bf16.mxu1 %v7166_v62  ;;  %v6450_v56 = vld [vmem:[#allocation5 + $0x36c] ss:$48 sps:$4 sm:$0xff]  }
 0x226   :  { %4306 = vmatpush1.bf16.msra.mxu0 %v6376_v59  ;;  %4266 = vmatprep.subr.bf16.mxu1 %v6381_v60  ;;  %v7176_v17 = vpack.c.bf16 %v951_v25, %v951_v25  ;;  %v6448_v59 = vld [vmem:[#allocation5 + $0x368] ss:$48 sps:$4 sm:$0xff]   ;;  %v6453_v60 = vld [vmem:[#allocation5 + $0x4e4] ss:$48 sps:$4 sm:$0xff]  }
 0x227   :  { %4307 = vmatprep.subr.bf16.mxu0 %v6384_v2  ;;  %4337 = vmatprep.mubr.bf16.mxu0 %v6886_v0 }
 0x229   :  { %4267 = vmatpush1.bf16.msra.mxu1 %v6379_v4  ;;  %v6456_v4 = vld [vmem:[#allocation5 + $0x3cc] ss:$48 sps:$4 sm:$0xff]  }
 0x22a   :  { %4308 = vmatpush1.bf16.msra.mxu0 %v6382_v5  ;;  %4268 = vmatprep.subr.bf16.mxu1 %v6387_v6 }
 0x22b   :  { %5800 = vmatprep.subr.msk.bf16.mxu0 %vm2568_vm7, %v6388_v7 }
 0x22d   :  { %4269 = vmatpush1.bf16.msra.mxu1 %v6385_v9  ;;  %v6451_v9 = vld [vmem:[#allocation5 + $0x4e0] ss:$48 sps:$4 sm:$0xff]  }
 0x22e   :  { %4310 = vmatpush1.bf16.msra.mxu0 %v4229_v10  ;;  %4270 = vmatprep.subr.bf16.mxu1 %v6393_v22  ;;  %v371_v22 = vrot.slane %v7147_v15, %v7055_v1  ;;  %v6454_v10 = vld [vmem:[#allocation5 + $0x3c8] ss:$48 sps:$4 sm:$0xff]  }
 0x22f   :  { %4346 = vmatprep.subr.bf16.mxu0 %v6396_v12  ;;  %v6459_v12 = vld [vmem:[#allocation5 + $0x544] ss:$48 sps:$4 sm:$0xff]  }
 0x231   :  { %5801 = vmatmul.mubr.msk.bf16.vlgmr.msra.gmra.mrb[28].mxu0 %vm2564_vm8, %v7176_v17  ;;  %4271 = vmatpush1.bf16.msra.mxu1 %v6391_v14  ;;  %v6462_v14 = vld [vmem:[#allocation5 + $0x42c] ss:$48 sps:$4 sm:$0xff]  }
 0x232   :  { %4347 = vmatpush1.bf16.msra.mxu0 %v6394_v16  ;;  %4378 = vmatprep.mubr.bf16.mxu0 %v7166_v62  ;;  %v5900_v16 = vadd.f32 %v7152_v28, %v371_v22  ;;  %v6499_v22 = vld [vmem:[#allocation5 + $0xd0] ss:$48 sps:$4 sm:$0xff]  }
 0x233   :  { %4272 = vmatprep.subr.bf16.mxu1 %v6399_v18  ;;  %4348 = vmatprep.subr.bf16.mxu0 %v6402_v19  ;;  %v6465_v18 = vld [vmem:[#allocation5 + $0x5a4] ss:$48 sps:$4 sm:$0xff]   ;;  %v6468_v19 = vld [vmem:[#allocation5 + $0x48c] ss:$48 sps:$4 sm:$0xff]  }
 0x234   :  { %v949_v15 = vmax.f32 %v5900_v16, 0.0  ;;  %v6513_v16 = vld [vmem:[#allocation5 + $0x194] ss:$48 sps:$4 sm:$0xff]  }
 0x235   :  { %4273 = vmatpush1.bf16.msra.mxu1 %v6397_v20  ;;  %v6463_v20 = vld [vmem:[#allocation5 + $0x5a0] ss:$48 sps:$4 sm:$0xff]  }
 0x236   :  { %4349 = vmatpush1.bf16.msra.mxu0 %v6400_v21  ;;  %4274 = vmatprep.subr.bf16.mxu1 %v6405_v23  ;;  %v6466_v21 = vld [vmem:[#allocation5 + $0x488] ss:$48 sps:$4 sm:$0xff]   ;;  %v6474_v23 = vld [vmem:[#allocation5 + $0x60c] ss:$48 sps:$4 sm:$0xff]  }
 0x237   :  { %4350 = vmatprep.subr.bf16.mxu0 %v6408_v24 }
 0x239   :  { %4275 = vmatpush1.bf16.msra.mxu1 %v6403_v26 }
 0x23a   :  { %4351 = vmatpush1.bf16.msra.mxu0 %v6406_v27  ;;  %4276 = vmatprep.subr.bf16.mxu1 %v6411_v29  ;;  %v6471_v27 = vld [vmem:[#allocation5 + $0x4ec] ss:$48 sps:$4 sm:$0xff]  }
 0x23b   :  { %4352 = vmatprep.subr.bf16.mxu0 %v6414_v30 }
 0x23d   :  { %4277 = vmatpush1.bf16.msra.mxu1 %v6409_v31 }
 0x23e   :  { %4353 = vmatpush1.bf16.msra.mxu0 %v6412_v57  ;;  %4278 = vmatprep.subr.bf16.mxu1 %v6417_v32 }
 0x23f   :  { %4354 = vmatprep.subr.bf16.mxu0 %v6420_v33  ;;  %v6472_v33 = vld [vmem:[#allocation5 + $0x608] ss:$48 sps:$4 sm:$0xff]  }
 0x241   :  { %4279 = vmatpush1.bf16.msra.mxu1 %v6415_v34  ;;  %v7194_v34 = vpack.c.bf16 %v949_v15, %v949_v15  ;;  %v6522_v15 = vld [vmem:[#allocation5 + $0xdc] ss:$48 sps:$4 sm:$0xff]  }
 0x242   :  { %4355 = vmatpush1.bf16.msra.mxu0 %v6418_v35  ;;  %4280 = vmatprep.subr.bf16.mxu1 %v6423_v36 }
 0x243   :  { %4356 = vmatprep.subr.bf16.mxu0 %v6426_v37  ;;  %v6469_v37 = vld [vmem:[#allocation5 + $0x4e8] ss:$48 sps:$4 sm:$0xff]  }
 0x245   :  { %4281 = vmatpush1.bf16.msra.mxu1 %v6421_v38  ;;  %v6480_v38 = vld [vmem:[#allocation5 + $0x66c] ss:$48 sps:$4 sm:$0xff]  }
 0x246   :  { %4357 = vmatpush1.bf16.msra.mxu0 %v6424_v39  ;;  %4282 = vmatprep.subr.bf16.mxu1 %v6429_v13  ;;  %v6477_v39 = vld [vmem:[#allocation5 + $0x54c] ss:$48 sps:$4 sm:$0xff]   ;;  %v6475_v13 = vld [vmem:[#allocation5 + $0x548] ss:$48 sps:$4 sm:$0xff]  }
 0x247   :  { %4358 = vmatprep.subr.bf16.mxu0 %v6432_v41  ;;  %v6478_v41 = vld [vmem:[#allocation5 + $0x668] ss:$48 sps:$4 sm:$0xff]  }
 0x249   :  { %4283 = vmatpush1.bf16.msra.mxu1 %v6427_v42  ;;  %v6484_v42 = vld [vmem:[#allocation5 + $0x6cc] ss:$48 sps:$4 sm:$0x3f]  }
 0x24a   :  { %4359 = vmatpush1.bf16.msra.mxu0 %v6430_v43  ;;  %4284 = vmatprep.subr.bf16.mxu1 %v6435_v44  ;;  %v6486_v43 = vld [vmem:[#allocation5 + $0x6c8] ss:$48 sps:$4 sm:$0x3f]   ;;  %v6483_v44 = vld [vmem:[#allocation5 + $0x5ac] ss:$48 sps:$4 sm:$0xff]  }
 0x24b   :  { %4360 = vmatprep.subr.bf16.mxu0 %v6438_v45  ;;  %v6481_v45 = vld [vmem:[#allocation5 + $0x5a8] ss:$48 sps:$4 sm:$0xff]  }
 0x24d   :  { %4285 = vmatpush1.bf16.msra.mxu1 %v6433_v46  ;;  %v4235_v46 = vsel %vm2568_vm7, %v6486_v43, 0  ;;  %v6549_v43 = vld [vmem:[#allocation5 + $0x3d4] ss:$48 sps:$4 sm:$0xff]  }
 0x24e   :  { %4361 = vmatpush1.bf16.msra.mxu0 %v6436_v47  ;;  %4286 = vmatprep.subr.bf16.mxu1 %v6441_v48  ;;  %v6489_v47 = vld [vmem:[#allocation5 + $0x14] ss:$48 sps:$4 sm:$0xff]  }
 0x24f   :  { %4362 = vmatprep.subr.bf16.mxu0 %v6444_v49  ;;  %v6492_v49 = vld [vmem:[#allocation5 + $0x614] ss:$48 sps:$4 sm:$0xff]  }
 0x251   :  { %4287 = vmatpush1.bf16.msra.mxu1 %v6439_v50 }
 0x252   :  { %4363 = vmatpush1.bf16.msra.mxu0 %v6442_v51  ;;  %4288 = vmatprep.subr.bf16.mxu1 %v6447_v55  ;;  %v6487_v55 = vld [vmem:[#allocation5 + $0x10] ss:$48 sps:$4 sm:$0xff]  }
 0x253   :  { %v2639_v2 = vpop.f32.mrb[16].mxu1  ;;  %4364 = vmatprep.subr.bf16.mxu0 %v6450_v56 }
 0x254   :  { %v7182_v5 = vadd.f32 %v7162_v52, %v2639_v2  ;;  %v2641_v6 = vpop.f32.mrb[17].mxu1  ;;  %v6457_v52 = vld [vmem:[#allocation5 + $0x540] ss:$48 sps:$4 sm:$0xff]  }
 0x255   :  { %v7185_v7 = vadd.f32 %v7164_v53, %v2641_v6  ;;  %v2643_v8 = vpop.f32.mrb[18].mxu1  ;;  %4289 = vmatpush1.bf16.msra.mxu1 %v6445_v58  ;;  %v6460_v53 = vld [vmem:[#allocation5 + $0x428] ss:$48 sps:$4 sm:$0xff]   ;;  %v6490_v58 = vld [vmem:[#allocation5 + $0x610] ss:$48 sps:$4 sm:$0xff]  }
 0x256   :  { %4365 = vmatpush1.bf16.msra.mxu0 %v6448_v59  ;;  %v2644_v25 = vpop.f32.mrb[19].mxu1  ;;  %4290 = vmatprep.subr.bf16.mxu1 %v6453_v60  ;;  %v6495_v59 = vld [vmem:[#allocation5 + $0x74] ss:$48 sps:$4 sm:$0xff]   ;;  %v6493_v2 = vld [vmem:[#allocation5 + $0x70] ss:$48 sps:$4 sm:$0xff]  }
 0x257   :  { %4366 = vmatprep.subr.bf16.mxu0 %v6456_v4  ;;  %v6498_v60 = vld [vmem:[#allocation5 + $0x674] ss:$48 sps:$4 sm:$0xff]   ;;  %v6496_v4 = vld [vmem:[#allocation5 + $0x670] ss:$48 sps:$4 sm:$0xff]  }
 0x258   :  { %v6501_v6 = vld [vmem:[#allocation5 + $0xd4] ss:$48 sps:$4 sm:$0xff]  }
 0x259   :  { %4291 = vmatpush1.bf16.msra.mxu1 %v6451_v9  ;;  %v6502_v8 = vld [vmem:[#allocation5 + $0x6d4] ss:$48 sps:$4 sm:$0x3f]   ;;  %v6504_v9 = vld [vmem:[#allocation5 + $0x6d0] ss:$48 sps:$4 sm:$0x3f]  }
 0x25a   :  { %4367 = vmatpush1.bf16.msra.mxu0 %v6454_v10  ;;  %4292 = vmatprep.subr.bf16.mxu1 %v6459_v12  ;;  %v6507_v25 = vld [vmem:[#allocation5 + $0x134] ss:$48 sps:$4 sm:$0xff]   ;;  %v4241_v10 = vsel %vm2568_vm7, %v6504_v9, 0  ;;  %v6510_v12 = vld [vmem:[#allocation5 + $0x1c] ss:$48 sps:$4 sm:$0xff]  }
 0x25b   :  { %4368 = vmatprep.subr.bf16.mxu0 %v6462_v14  ;;  %v6505_v14 = vld [vmem:[#allocation5 + $0x130] ss:$48 sps:$4 sm:$0xff]  }
 0x25d   :  { %4293 = vmatpush1.bf16.msra.mxu1 %v6457_v52  ;;  %v6508_v52 = vld [vmem:[#allocation5 + $0x18] ss:$48 sps:$4 sm:$0xff]  }
 0x25e   :  { %4369 = vmatpush1.bf16.msra.mxu0 %v6460_v53  ;;  %4294 = vmatprep.subr.bf16.mxu1 %v6465_v18  ;;  %v6516_v53 = vld [vmem:[#allocation5 + $0x7c] ss:$48 sps:$4 sm:$0xff]   ;;  %v6511_v18 = vld [vmem:[#allocation5 + $0x190] ss:$48 sps:$4 sm:$0xff]  }
 0x25f   :  { %v2721_v24 = vpop.f32.mrb[8].mxu0  ;;  %v2762_v26 = vpop.f32.mrb[20].mxu1  ;;  %4370 = vmatprep.subr.bf16.mxu0 %v6468_v19  ;;  %v6514_v19 = vld [vmem:[#allocation5 + $0x78] ss:$48 sps:$4 sm:$0xff]  }
 0x260   :  { %v7190_v29 = vadd.f32 %v2762_v26, %v2721_v24  ;;  %v2723_v28 = vpop.f32.mrb[9].mxu0  ;;  %v2764_v30 = vpop.f32.mrb[21].mxu1  ;;  %v6525_v24 = vld [vmem:[#allocation5 + $0x254] ss:$48 sps:$4 sm:$0xff]   ;;  %v6528_v26 = vld [vmem:[#allocation5 + $0x13c] ss:$48 sps:$4 sm:$0xff]  }
 0x261   :  { %v7192_v31 = vadd.f32 %v2764_v30, %v2723_v28  ;;  %v2725_v57 = vpop.f32.mrb[10].mxu0  ;;  %v2766_v32 = vpop.f32.mrb[22].mxu1  ;;  %4295 = vmatpush1.bf16.msra.mxu1 %v6463_v20  ;;  %v6519_v20 = vld [vmem:[#allocation5 + $0x1f4] ss:$48 sps:$4 sm:$0xff]   ;;  %v6526_v28 = vld [vmem:[#allocation5 + $0x138] ss:$48 sps:$4 sm:$0xff]  }
 0x262   :  { %4371 = vmatpush1.bf16.msra.mxu0 %v6466_v21  ;;  %v2726_v35 = vpop.f32.mrb[11].mxu0  ;;  %v2767_v36 = vpop.f32.mrb[23].mxu1  ;;  %4387 = vmatprep.subr.bf16.mxu1 %v6474_v23  ;;  %v6517_v21 = vld [vmem:[#allocation5 + $0x1f0] ss:$48 sps:$4 sm:$0xff]   ;;  %v6520_v23 = vld [vmem:[#allocation5 + $0xd8] ss:$48 sps:$4 sm:$0xff]  }
 0x263   :  { %4372 = vmatprep.subr.bf16.mxu0 %v6471_v27  ;;  %v6523_v27 = vld [vmem:[#allocation5 + $0x250] ss:$48 sps:$4 sm:$0xff]   ;;  %v6531_v30 = vld [vmem:[#allocation5 + $0x2b4] ss:$48 sps:$4 sm:$0xff]   ;;  %v6534_v57 = vld [vmem:[#allocation5 + $0x19c] ss:$48 sps:$4 sm:$0xff]  }
 0x264   :  { %4297 = vmatmul.mubr.bf16.vlgmr.msra.gmra.mrb[40].mxu1 %v7194_v34  ;;  %v6529_v32 = vld [vmem:[#allocation5 + $0x2b0] ss:$48 sps:$4 sm:$0xff]   ;;  %v6537_v35 = vld [vmem:[#allocation5 + $0x314] ss:$48 sps:$4 sm:$0xff]   ;;  %v6540_v36 = vld [vmem:[#allocation5 + $0x1fc] ss:$48 sps:$4 sm:$0xff]  }
 0x265   :  { %4388 = vmatpush1.bf16.msra.mxu1 %v6472_v33  ;;  %4419 = vmatprep.mubr.bf16.mxu1 %v6886_v0  ;;  %v6532_v33 = vld [vmem:[#allocation5 + $0x198] ss:$48 sps:$4 sm:$0xff]  }
 0x266   :  { %4373 = vmatpush1.bf16.msra.mxu0 %v6469_v37  ;;  %4389 = vmatprep.subr.bf16.mxu1 %v6480_v38  ;;  %v6535_v37 = vld [vmem:[#allocation5 + $0x310] ss:$48 sps:$4 sm:$0xff]   ;;  %v6538_v38 = vld [vmem:[#allocation5 + $0x1f8] ss:$48 sps:$4 sm:$0xff]  }
 0x267   :  { %4374 = vmatprep.subr.bf16.mxu0 %v6477_v39  ;;  %v6543_v39 = vld [vmem:[#allocation5 + $0x374] ss:$48 sps:$4 sm:$0xff]  }
 0x269   :  { %4390 = vmatpush1.bf16.msra.mxu1 %v6478_v41  ;;  %v6541_v41 = vld [vmem:[#allocation5 + $0x370] ss:$48 sps:$4 sm:$0xff]  }
 0x26a   :  { %4375 = vmatpush1.bf16.msra.mxu0 %v6475_v13  ;;  %5802 = vmatprep.subr.msk.bf16.mxu1 %vm2568_vm7, %v6484_v42  ;;  %v6546_v13 = vld [vmem:[#allocation5 + $0x25c] ss:$48 sps:$4 sm:$0xff]   ;;  %v6544_v42 = vld [vmem:[#allocation5 + $0x258] ss:$48 sps:$4 sm:$0xff]  }
 0x26b   :  { %v7200_v48 = vpop.f32.mrb[12].mxu0  ;;  %4376 = vmatprep.subr.bf16.mxu0 %v6483_v44  ;;  %v6552_v44 = vld [vmem:[#allocation5 + $0x2bc] ss:$48 sps:$4 sm:$0xff]  }
 0x26c   :  { %v7202_v50 = vpop.f32.mrb[13].mxu0 }
 0x26d   :  { %v2848_v51 = vpop.f32.mrb[14].mxu0  ;;  %4392 = vmatpush1.bf16.msra.mxu1 %v4235_v46  ;;  %v6550_v46 = vld [vmem:[#allocation5 + $0x2b8] ss:$48 sps:$4 sm:$0xff]  }
 0x26e   :  { %4377 = vmatpush1.bf16.msra.mxu0 %v6481_v45  ;;  %v2849_v56 = vpop.f32.mrb[15].mxu0  ;;  %4428 = vmatprep.subr.bf16.mxu1 %v6489_v47  ;;  %v6547_v45 = vld [vmem:[#allocation5 + $0x3d0] ss:$48 sps:$4 sm:$0xff]   ;;  %v6555_v47 = vld [vmem:[#allocation5 + $0x434] ss:$48 sps:$4 sm:$0xff]  }
 0x26f   :  { %4469 = vmatprep.subr.bf16.mxu0 %v6492_v49  ;;  %v6558_v49 = vld [vmem:[#allocation5 + $0x31c] ss:$48 sps:$4 sm:$0xff]   ;;  %v6553_v51 = vld [vmem:[#allocation5 + $0x430] ss:$48 sps:$4 sm:$0xff]   ;;  %v6561_v56 = vld [vmem:[#allocation5 + $0x494] ss:$48 sps:$4 sm:$0xff]  }
 0x270   :  { %5803 = vmatmul.mubr.msk.bf16.vlgmr.msra.gmra.mrb[44].mxu1 %vm2564_vm8, %v7176_v17 }
 0x271   :  { %4379 = vmatmul.mubr.bf16.vlgmr.msra.gmra.mrb[32].mxu0 %v7194_v34  ;;  %4429 = vmatpush1.bf16.msra.mxu1 %v6487_v55  ;;  %v6556_v55 = vld [vmem:[#allocation5 + $0x318] ss:$48 sps:$4 sm:$0xff]  }
 0x272   :  { %4460 = vmatprep.mubr.bf16.mxu1 %v7166_v62  ;;  %4470 = vmatpush1.bf16.msra.mxu0 %v6490_v58  ;;  %v6564_v58 = vld [vmem:[#allocation5 + $0x37c] ss:$48 sps:$4 sm:$0xff]  }
 0x273   :  { %4430 = vmatprep.subr.bf16.mxu1 %v6495_v59  ;;  %4471 = vmatprep.subr.bf16.mxu0 %v6498_v60  ;;  %v6559_v59 = vld [vmem:[#allocation5 + $0x490] ss:$48 sps:$4 sm:$0xff]   ;;  %v6562_v60 = vld [vmem:[#allocation5 + $0x378] ss:$48 sps:$4 sm:$0xff]  }
 0x274   :  { %4501 = vmatprep.mubr.bf16.mxu0 %v6886_v0 }
 0x275   :  { %4431 = vmatpush1.bf16.msra.mxu1 %v6493_v2  ;;  %v6567_v2 = vld [vmem:[#allocation5 + $0x4f4] ss:$48 sps:$4 sm:$0xff]  }
 0x276   :  { %4472 = vmatpush1.bf16.msra.mxu0 %v6496_v4  ;;  %4432 = vmatprep.subr.bf16.mxu1 %v6501_v6  ;;  %v6570_v6 = vld [vmem:[#allocation5 + $0x3dc] ss:$48 sps:$4 sm:$0xff]  }
 0x277   :  { %5804 = vmatprep.subr.msk.bf16.mxu0 %vm2568_vm7, %v6502_v8 }
 0x279   :  { %4433 = vmatpush1.bf16.msra.mxu1 %v6499_v22 }
 0x27a   :  { %4474 = vmatpush1.bf16.msra.mxu0 %v4241_v10  ;;  %4434 = vmatprep.subr.bf16.mxu1 %v6507_v25  ;;  %v6565_v10 = vld [vmem:[#allocation5 + $0x4f0] ss:$48 sps:$4 sm:$0xff]  }
 0x27b   :  { %4510 = vmatprep.subr.bf16.mxu0 %v6510_v12 }
 0x27d   :  { %5805 = vmatmul.mubr.msk.bf16.vlgmr.msra.gmra.mrb[36].mxu0 %vm2564_vm8, %v7176_v17  ;;  %4435 = vmatpush1.bf16.msra.mxu1 %v6505_v14  ;;  %v6568_v14 = vld [vmem:[#allocation5 + $0x3d8] ss:$48 sps:$4 sm:$0xff]  }
 0x27e   :  { %4511 = vmatpush1.bf16.msra.mxu0 %v6508_v52  ;;  %4542 = vmatprep.mubr.bf16.mxu0 %v7166_v62  ;;  %v6573_v52 = vld [vmem:[#allocation5 + $0x554] ss:$48 sps:$4 sm:$0xff]  }
 0x27f   :  { %4436 = vmatprep.subr.bf16.mxu1 %v6513_v16  ;;  %4512 = vmatprep.subr.bf16.mxu0 %v6516_v53  ;;  %v6576_v16 = vld [vmem:[#allocation5 + $0x43c] ss:$48 sps:$4 sm:$0xff]   ;;  %v6571_v53 = vld [vmem:[#allocation5 + $0x550] ss:$48 sps:$4 sm:$0xff]  }
 0x281   :  { %4437 = vmatpush1.bf16.msra.mxu1 %v6511_v18  ;;  %v6579_v18 = vld [vmem:[#allocation5 + $0x5b4] ss:$48 sps:$4 sm:$0xff]  }
 0x282   :  { %4513 = vmatpush1.bf16.msra.mxu0 %v6514_v19  ;;  %4438 = vmatprep.subr.bf16.mxu1 %v6519_v20  ;;  %v6582_v19 = vld [vmem:[#allocation5 + $0x49c] ss:$48 sps:$4 sm:$0xff]   ;;  %v6580_v20 = vld [vmem:[#allocation5 + $0x498] ss:$48 sps:$4 sm:$0xff]  }
 0x283   :  { %4514 = vmatprep.subr.bf16.mxu0 %v6522_v15  ;;  %v6588_v15 = vld [vmem:[#allocation5 + $0x61c] ss:$48 sps:$4 sm:$0xff]  }
 0x285   :  { %4439 = vmatpush1.bf16.msra.mxu1 %v6517_v21 }
 0x286   :  { %4515 = vmatpush1.bf16.msra.mxu0 %v6520_v23  ;;  %4440 = vmatprep.subr.bf16.mxu1 %v6525_v24  ;;  %v6585_v24 = vld [vmem:[#allocation5 + $0x4fc] ss:$48 sps:$4 sm:$0xff]  }
 0x287   :  { %4516 = vmatprep.subr.bf16.mxu0 %v6528_v26 }
 0x289   :  { %4441 = vmatpush1.bf16.msra.mxu1 %v6523_v27 }
 0x28a   :  { %4517 = vmatpush1.bf16.msra.mxu0 %v6526_v28  ;;  %4442 = vmatprep.subr.bf16.mxu1 %v6531_v30 }
 0x28b   :  { %4518 = vmatprep.subr.bf16.mxu0 %v6534_v57 }
 0x28d   :  { %4443 = vmatpush1.bf16.msra.mxu1 %v6529_v32 }
 0x28e   :  { %4519 = vmatpush1.bf16.msra.mxu0 %v6532_v33  ;;  %4444 = vmatprep.subr.bf16.mxu1 %v6537_v35  ;;  %v6586_v33 = vld [vmem:[#allocation5 + $0x618] ss:$48 sps:$4 sm:$0xff]  }
 0x28f   :  { %4520 = vmatprep.subr.bf16.mxu0 %v6540_v36 }
 0x291   :  { %4445 = vmatpush1.bf16.msra.mxu1 %v6535_v37  ;;  %v6583_v37 = vld [vmem:[#allocation5 + $0x4f8] ss:$48 sps:$4 sm:$0xff]  }
 0x292   :  { %4521 = vmatpush1.bf16.msra.mxu0 %v6538_v38  ;;  %4446 = vmatprep.subr.bf16.mxu1 %v6543_v39  ;;  %v6594_v38 = vld [vmem:[#allocation5 + $0x67c] ss:$48 sps:$4 sm:$0xff]  }
 0x293   :  { %4522 = vmatprep.subr.bf16.mxu0 %v6546_v13  ;;  %v6591_v39 = vld [vmem:[#allocation5 + $0x55c] ss:$48 sps:$4 sm:$0xff]   ;;  %v6589_v13 = vld [vmem:[#allocation5 + $0x558] ss:$48 sps:$4 sm:$0xff]  }
 0x295   :  { %4447 = vmatpush1.bf16.msra.mxu1 %v6541_v41  ;;  %v6592_v41 = vld [vmem:[#allocation5 + $0x678] ss:$48 sps:$4 sm:$0xff]  }
 0x296   :  { %4523 = vmatpush1.bf16.msra.mxu0 %v6544_v42  ;;  %4448 = vmatprep.subr.bf16.mxu1 %v6549_v43  ;;  %v6598_v42 = vld [vmem:[#allocation5 + $0x6dc] ss:$48 sps:$4 sm:$0x3f]   ;;  %v6600_v43 = vld [vmem:[#allocation5 + $0x6d8] ss:$48 sps:$4 sm:$0x3f]  }
 0x297   :  { %4524 = vmatprep.subr.bf16.mxu0 %v6552_v44  ;;  %v6597_v44 = vld [vmem:[#allocation5 + $0x5bc] ss:$48 sps:$4 sm:$0xff]  }
 0x299   :  { %4449 = vmatpush1.bf16.msra.mxu1 %v6547_v45  ;;  %v6595_v45 = vld [vmem:[#allocation5 + $0x5b8] ss:$48 sps:$4 sm:$0xff]  }
 0x29a   :  { %4525 = vmatpush1.bf16.msra.mxu0 %v6550_v46  ;;  %4450 = vmatprep.subr.bf16.mxu1 %v6555_v47  ;;  %v4247_v46 = vsel %vm2568_vm7, %v6600_v43, 0  ;;  %v6603_v47 = vld [vmem:[#allocation5 + $0x24] ss:$48 sps:$4 sm:$0xff]   ;;  %v6660_v43 = vld [vmem:[#allocation5 + $0x26c] ss:$48 sps:$4 sm:$0xff]  }
 0x29b   :  { %4526 = vmatprep.subr.bf16.mxu0 %v6558_v49 }
 0x29d   :  { %4451 = vmatpush1.bf16.msra.mxu1 %v6553_v51  ;;  %v6606_v51 = vld [vmem:[#allocation5 + $0x624] ss:$48 sps:$4 sm:$0xff]  }
 0x29e   :  { %4527 = vmatpush1.bf16.msra.mxu0 %v6556_v55  ;;  %4452 = vmatprep.subr.bf16.mxu1 %v6561_v56 }
 0x29f   :  { %v2803_v4 = vpop.f32.mrb[24].mxu1  ;;  %4528 = vmatprep.subr.bf16.mxu0 %v6564_v58  ;;  %v6601_v58 = vld [vmem:[#allocation5 + $0x20] ss:$48 sps:$4 sm:$0xff]  }
 0x2a0   :  { %v7215_v8 = vadd.f32 %v7200_v48, %v2803_v4  ;;  %v2805_v9 = vpop.f32.mrb[25].mxu1  ;;  %v6574_v48 = vld [vmem:[#allocation5 + $0x438] ss:$48 sps:$4 sm:$0xff]   ;;  %v6612_v4 = vld [vmem:[#allocation5 + $0x684] ss:$48 sps:$4 sm:$0xff]  }
 0x2a1   :  { %v7218_v22 = vadd.f32 %v7202_v50, %v2805_v9  ;;  %v2807_v25 = vpop.f32.mrb[26].mxu1  ;;  %4453 = vmatpush1.bf16.msra.mxu1 %v6559_v59  ;;  %v6577_v50 = vld [vmem:[#allocation5 + $0x5b0] ss:$48 sps:$4 sm:$0xff]  }
 0x2a2   :  { %4529 = vmatpush1.bf16.msra.mxu0 %v6562_v60  ;;  %v2808_v12 = vpop.f32.mrb[27].mxu1  ;;  %4454 = vmatprep.subr.bf16.mxu1 %v6567_v2  ;;  %v6604_v60 = vld [vmem:[#allocation5 + $0x620] ss:$48 sps:$4 sm:$0xff]   ;;  %v6609_v2 = vld [vmem:[#allocation5 + $0x84] ss:$48 sps:$4 sm:$0xff]  }
 0x2a3   :  { %4530 = vmatprep.subr.bf16.mxu0 %v6570_v6  ;;  %v6607_v6 = vld [vmem:[#allocation5 + $0x80] ss:$48 sps:$4 sm:$0xff]   ;;  %v6615_v25 = vld [vmem:[#allocation5 + $0xe4] ss:$48 sps:$4 sm:$0xff]  }
 0x2a4   :  { %v6610_v9 = vld [vmem:[#allocation5 + $0x680] ss:$48 sps:$4 sm:$0xff]  }
 0x2a5   :  { %4455 = vmatpush1.bf16.msra.mxu1 %v6565_v10  ;;  %v6616_v10 = vld [vmem:[#allocation5 + $0x6e4] ss:$48 sps:$4 sm:$0x3f]   ;;  %v6618_v12 = vld [vmem:[#allocation5 + $0x6e0] ss:$48 sps:$4 sm:$0x3f]  }
 0x2a6   :  { %4531 = vmatpush1.bf16.msra.mxu0 %v6568_v14  ;;  %4456 = vmatprep.subr.bf16.mxu1 %v6573_v52  ;;  %v6613_v14 = vld [vmem:[#allocation5 + $0xe0] ss:$48 sps:$4 sm:$0xff]   ;;  %v6621_v52 = vld [vmem:[#allocation5 + $0x144] ss:$48 sps:$4 sm:$0xff]  }
 0x2a7   :  { %4532 = vmatprep.subr.bf16.mxu0 %v6576_v16  ;;  %v4253_v16 = vsel %vm2568_vm7, %v6618_v12, 0  ;;  %v6681_v12 = vld [vmem:[#allocation5 + $0x504] ss:$48 sps:$4 sm:$0xff]  }
 0x2a9   :  { %4457 = vmatpush1.bf16.msra.mxu1 %v6571_v53  ;;  %v6624_v53 = vld [vmem:[#allocation5 + $0x2c] ss:$48 sps:$4 sm:$0xff]  }
 0x2aa   :  { %4533 = vmatpush1.bf16.msra.mxu0 %v6574_v48  ;;  %4458 = vmatprep.subr.bf16.mxu1 %v6579_v18  ;;  %v6619_v48 = vld [vmem:[#allocation5 + $0x140] ss:$48 sps:$4 sm:$0xff]   ;;  %v6622_v18 = vld [vmem:[#allocation5 + $0x28] ss:$48 sps:$4 sm:$0xff]  }
 0x2ab   :  { %v2885_v21 = vpop.f32.mrb[16].mxu0  ;;  %v2926_v23 = vpop.f32.mrb[28].mxu1  ;;  %4534 = vmatprep.subr.bf16.mxu0 %v6582_v19  ;;  %v6627_v19 = vld [vmem:[#allocation5 + $0x1a4] ss:$48 sps:$4 sm:$0xff]  }
 0x2ac   :  { %v7220_v26 = vadd.f32 %v2926_v23, %v2885_v21  ;;  %v2887_v27 = vpop.f32.mrb[17].mxu0  ;;  %v2928_v28 = vpop.f32.mrb[29].mxu1  ;;  %v6633_v21 = vld [vmem:[#allocation5 + $0x204] ss:$48 sps:$4 sm:$0xff]   ;;  %v6636_v23 = vld [vmem:[#allocation5 + $0xec] ss:$48 sps:$4 sm:$0xff]  }
 0x2ad   :  { %v7222_v30 = vadd.f32 %v2928_v28, %v2887_v27  ;;  %v2889_v57 = vpop.f32.mrb[18].mxu0  ;;  %v2930_v32 = vpop.f32.mrb[30].mxu1  ;;  %4459 = vmatpush1.bf16.msra.mxu1 %v6577_v50  ;;  %v6630_v50 = vld [vmem:[#allocation5 + $0x8c] ss:$48 sps:$4 sm:$0xff]   ;;  %v6634_v27 = vld [vmem:[#allocation5 + $0xe8] ss:$48 sps:$4 sm:$0xff]  }
 0x2ae   :  { %4535 = vmatpush1.bf16.msra.mxu0 %v6580_v20  ;;  %v2890_v35 = vpop.f32.mrb[19].mxu0  ;;  %v2931_v36 = vpop.f32.mrb[31].mxu1  ;;  %4551 = vmatprep.subr.bf16.mxu1 %v6588_v15  ;;  %v6625_v20 = vld [vmem:[#allocation5 + $0x1a0] ss:$48 sps:$4 sm:$0xff]   ;;  %v6628_v15 = vld [vmem:[#allocation5 + $0x88] ss:$48 sps:$4 sm:$0xff]  }
 0x2af   :  { %4536 = vmatprep.subr.bf16.mxu0 %v6585_v24  ;;  %v6631_v24 = vld [vmem:[#allocation5 + $0x200] ss:$48 sps:$4 sm:$0xff]   ;;  %v6639_v28 = vld [vmem:[#allocation5 + $0x264] ss:$48 sps:$4 sm:$0xff]   ;;  %v6642_v57 = vld [vmem:[#allocation5 + $0x14c] ss:$48 sps:$4 sm:$0xff]  }
 0x2b0   :  { %4461 = vmatmul.mubr.bf16.vlgmr.msra.gmra.mrb[48].mxu1 %v7194_v34  ;;  %v6637_v32 = vld [vmem:[#allocation5 + $0x260] ss:$48 sps:$4 sm:$0xff]   ;;  %v6645_v35 = vld [vmem:[#allocation5 + $0x2c4] ss:$48 sps:$4 sm:$0xff]  }
 0x2b1   :  { %4552 = vmatpush1.bf16.msra.mxu1 %v6586_v33  ;;  %4583 = vmatprep.mubr.bf16.mxu1 %v6886_v0  ;;  %v6640_v33 = vld [vmem:[#allocation5 + $0x148] ss:$48 sps:$4 sm:$0xff]   ;;  %v6643_v36 = vld [vmem:[#allocation5 + $0x2c0] ss:$48 sps:$4 sm:$0xff]  }
 0x2b2   :  { %4537 = vmatpush1.bf16.msra.mxu0 %v6583_v37  ;;  %4553 = vmatprep.subr.bf16.mxu1 %v6594_v38  ;;  %v6646_v37 = vld [vmem:[#allocation5 + $0x1a8] ss:$48 sps:$4 sm:$0xff]   ;;  %v6651_v38 = vld [vmem:[#allocation5 + $0x324] ss:$48 sps:$4 sm:$0xff]  }
 0x2b3   :  { %4538 = vmatprep.subr.bf16.mxu0 %v6591_v39  ;;  %v6654_v39 = vld [vmem:[#allocation5 + $0x20c] ss:$48 sps:$4 sm:$0xff]  }
 0x2b5   :  { %4554 = vmatpush1.bf16.msra.mxu1 %v6592_v41  ;;  %v6652_v41 = vld [vmem:[#allocation5 + $0x208] ss:$48 sps:$4 sm:$0xff]  }
 0x2b6   :  { %4539 = vmatpush1.bf16.msra.mxu0 %v6589_v13  ;;  %5806 = vmatprep.subr.msk.bf16.mxu1 %vm2568_vm7, %v6598_v42  ;;  %v6649_v13 = vld [vmem:[#allocation5 + $0x320] ss:$48 sps:$4 sm:$0xff]   ;;  %v6657_v42 = vld [vmem:[#allocation5 + $0x384] ss:$48 sps:$4 sm:$0xff]  }
 0x2b7   :  { %v7228_v49 = vpop.f32.mrb[20].mxu0  ;;  %4540 = vmatprep.subr.bf16.mxu0 %v6597_v44  ;;  %v98_v44 = vld [vmem:[%s7428_s11] sm:$0x3f] }
 0x2b8   :  { %v7230_v55 = vpop.f32.mrb[21].mxu0  ;;  %99 = vst.msk [vmem:[%s7431_s14] sm:$0x3f] %vm7043_vm5, %v98_v44  ;;  %v6697_v44 = vld [vmem:[#allocation5 + $0x508] ss:$48 sps:$4 sm:$0xff]  }
 0x2b9   :  { %v3012_v56 = vpop.f32.mrb[22].mxu0  ;;  %4556 = vmatpush1.bf16.msra.mxu1 %v4247_v46  ;;  %v6658_v46 = vld [vmem:[#allocation5 + $0x268] ss:$48 sps:$4 sm:$0xff]  }
 0x2ba   :  { %4541 = vmatpush1.bf16.msra.mxu0 %v6595_v45  ;;  %v3013_v59 = vpop.f32.mrb[23].mxu0  ;;  %4592 = vmatprep.subr.bf16.mxu1 %v6603_v47  ;;  %v6655_v45 = vld [vmem:[#allocation5 + $0x380] ss:$48 sps:$4 sm:$0xff]   ;;  %v6663_v47 = vld [vmem:[#allocation5 + $0x3e4] ss:$48 sps:$4 sm:$0xff]  }
 0x2bb   :  { %4633 = vmatprep.subr.bf16.mxu0 %v6606_v51  ;;  %v6666_v51 = vld [vmem:[#allocation5 + $0x2cc] ss:$48 sps:$4 sm:$0xff]   ;;  %v6661_v56 = vld [vmem:[#allocation5 + $0x3e0] ss:$48 sps:$4 sm:$0xff]   ;;  %v6669_v59 = vld [vmem:[#allocation5 + $0x444] ss:$48 sps:$4 sm:$0xff]  }
 0x2bc   :  { %5807 = vmatmul.mubr.msk.bf16.vlgmr.msra.gmra.mrb[52].mxu1 %vm2564_vm8, %v7176_v17 }
 0x2bd   :  { %4543 = vmatmul.mubr.bf16.vlgmr.msra.gmra.mrb[40].mxu0 %v7194_v34  ;;  %4593 = vmatpush1.bf16.msra.mxu1 %v6601_v58  ;;  %v6664_v58 = vld [vmem:[#allocation5 + $0x2c8] ss:$48 sps:$4 sm:$0xff]  }
 0x2be   :  { %4624 = vmatprep.mubr.bf16.mxu1 %v7166_v62  ;;  %4634 = vmatpush1.bf16.msra.mxu0 %v6604_v60  ;;  %v6672_v60 = vld [vmem:[#allocation5 + $0x32c] ss:$48 sps:$4 sm:$0xff]  }
 0x2bf   :  { %4594 = vmatprep.subr.bf16.mxu1 %v6609_v2  ;;  %4635 = vmatprep.subr.bf16.mxu0 %v6612_v4  ;;  %v6667_v2 = vld [vmem:[#allocation5 + $0x440] ss:$48 sps:$4 sm:$0xff]   ;;  %v6670_v4 = vld [vmem:[#allocation5 + $0x328] ss:$48 sps:$4 sm:$0xff]  }
 0x2c0   :  { %4665 = vmatprep.mubr.bf16.mxu0 %v6886_v0 }
 0x2c1   :  { %4595 = vmatpush1.bf16.msra.mxu1 %v6607_v6  ;;  %v6675_v6 = vld [vmem:[#allocation5 + $0x4a4] ss:$48 sps:$4 sm:$0xff]  }
 0x2c2   :  { %4636 = vmatpush1.bf16.msra.mxu0 %v6610_v9  ;;  %4596 = vmatprep.subr.bf16.mxu1 %v6615_v25  ;;  %v6678_v9 = vld [vmem:[#allocation5 + $0x38c] ss:$48 sps:$4 sm:$0xff]   ;;  %v6673_v25 = vld [vmem:[#allocation5 + $0x4a0] ss:$48 sps:$4 sm:$0xff]  }
 0x2c3   :  { %5808 = vmatprep.subr.msk.bf16.mxu0 %vm2568_vm7, %v6616_v10  ;;  %v6676_v10 = vld [vmem:[#allocation5 + $0x388] ss:$48 sps:$4 sm:$0xff]  }
 0x2c5   :  { %4597 = vmatpush1.bf16.msra.mxu1 %v6613_v14 }
 0x2c6   :  { %4638 = vmatpush1.bf16.msra.mxu0 %v4253_v16  ;;  %4598 = vmatprep.subr.bf16.mxu1 %v6621_v52  ;;  %v6684_v52 = vld [vmem:[#allocation5 + $0x3ec] ss:$48 sps:$4 sm:$0xff]  }
 0x2c7   :  { %4674 = vmatprep.subr.bf16.mxu0 %v6624_v53 }
 0x2c9   :  { %5809 = vmatmul.mubr.msk.bf16.vlgmr.msra.gmra.mrb[44].mxu0 %vm2564_vm8, %v7176_v17  ;;  %4599 = vmatpush1.bf16.msra.mxu1 %v6619_v48 }
 0x2ca   :  { %4675 = vmatpush1.bf16.msra.mxu0 %v6622_v18  ;;  %4706 = vmatprep.mubr.bf16.mxu0 %v7166_v62  ;;  %v6648_v62 = vld [vmem:[#allocation5 + $0x1ac] ss:$48 sps:$4 sm:$0xff]  }
 0x2cb   :  { %4600 = vmatprep.subr.bf16.mxu1 %v6627_v19  ;;  %4676 = vmatprep.subr.bf16.mxu0 %v6630_v50  ;;  %v6679_v19 = vld [vmem:[#allocation5 + $0x500] ss:$48 sps:$4 sm:$0xff]  }
 0x2cd   :  { %4601 = vmatpush1.bf16.msra.mxu1 %v6625_v20  ;;  %v6682_v20 = vld [vmem:[#allocation5 + $0x3e8] ss:$48 sps:$4 sm:$0xff]  }
 0x2ce   :  { %4677 = vmatpush1.bf16.msra.mxu0 %v6628_v15  ;;  %4602 = vmatprep.subr.bf16.mxu1 %v6633_v21  ;;  %v6687_v15 = vld [vmem:[#allocation5 + $0x564] ss:$48 sps:$4 sm:$0xff]   ;;  %v6690_v21 = vld [vmem:[#allocation5 + $0x44c] ss:$48 sps:$4 sm:$0xff]  }
 0x2cf   :  { %4678 = vmatprep.subr.bf16.mxu0 %v6636_v23  ;;  %v6685_v23 = vld [vmem:[#allocation5 + $0x560] ss:$48 sps:$4 sm:$0xff]  }
 0x2d1   :  { %4603 = vmatpush1.bf16.msra.mxu1 %v6631_v24  ;;  %v6693_v24 = vld [vmem:[#allocation5 + $0x5c4] ss:$48 sps:$4 sm:$0xff]  }
 0x2d2   :  { %4679 = vmatpush1.bf16.msra.mxu0 %v6634_v27  ;;  %4604 = vmatprep.subr.bf16.mxu1 %v6639_v28  ;;  %v6696_v27 = vld [vmem:[#allocation5 + $0x4ac] ss:$48 sps:$4 sm:$0xff]   ;;  %v6694_v28 = vld [vmem:[#allocation5 + $0x4a8] ss:$48 sps:$4 sm:$0xff]  }
 0x2d3   :  { %4680 = vmatprep.subr.bf16.mxu0 %v6642_v57  ;;  %v6702_v57 = vld [vmem:[#allocation5 + $0x62c] ss:$48 sps:$4 sm:$0xff]  }
 0x2d5   :  { %4605 = vmatpush1.bf16.msra.mxu1 %v6637_v32 }
 0x2d6   :  { %4681 = vmatpush1.bf16.msra.mxu0 %v6640_v33  ;;  %4606 = vmatprep.subr.bf16.mxu1 %v6645_v35  ;;  %v6699_v35 = vld [vmem:[#allocation5 + $0x50c] ss:$48 sps:$4 sm:$0xff]  }
 0x2d7   :  { %4682 = vmatprep.subr.bf16.mxu0 %v6648_v62 }
 0x2d9   :  { %4607 = vmatpush1.bf16.msra.mxu1 %v6643_v36 }
 0x2da   :  { %4683 = vmatpush1.bf16.msra.mxu0 %v6646_v37  ;;  %4608 = vmatprep.subr.bf16.mxu1 %v6651_v38 }
 0x2db   :  { %4684 = vmatprep.subr.bf16.mxu0 %v6654_v39 }
 0x2dd   :  { %4609 = vmatpush1.bf16.msra.mxu1 %v6649_v13 }
 0x2de   :  { %4685 = vmatpush1.bf16.msra.mxu0 %v6652_v41  ;;  %4610 = vmatprep.subr.bf16.mxu1 %v6657_v42  ;;  %v6700_v41 = vld [vmem:[#allocation5 + $0x628] ss:$48 sps:$4 sm:$0xff]  }
 0x2df   :  { %4686 = vmatprep.subr.bf16.mxu0 %v6660_v43 }
 0x2e1   :  { %4611 = vmatpush1.bf16.msra.mxu1 %v6655_v45  ;;  %v6708_v45 = vld [vmem:[#allocation5 + $0x68c] ss:$48 sps:$4 sm:$0xff]  }
 0x2e2   :  { %4687 = vmatpush1.bf16.msra.mxu0 %v6658_v46  ;;  %4612 = vmatprep.subr.bf16.mxu1 %v6663_v47  ;;  %v6705_v46 = vld [vmem:[#allocation5 + $0x56c] ss:$48 sps:$4 sm:$0xff]   ;;  %v6703_v47 = vld [vmem:[#allocation5 + $0x568] ss:$48 sps:$4 sm:$0xff]  }
 0x2e3   :  { %4688 = vmatprep.subr.bf16.mxu0 %v6666_v51  ;;  %v6706_v51 = vld [vmem:[#allocation5 + $0x688] ss:$48 sps:$4 sm:$0xff]  }
 0x2e5   :  { %4613 = vmatpush1.bf16.msra.mxu1 %v6661_v56  ;;  %v6712_v56 = vld [vmem:[#allocation5 + $0x6ec] ss:$48 sps:$4 sm:$0x3f]  }
 0x2e6   :  { %4689 = vmatpush1.bf16.msra.mxu0 %v6664_v58  ;;  %4614 = vmatprep.subr.bf16.mxu1 %v6669_v59  ;;  %v6714_v58 = vld [vmem:[#allocation5 + $0x6e8] ss:$48 sps:$4 sm:$0x3f]   ;;  %v6711_v59 = vld [vmem:[#allocation5 + $0x5cc] ss:$48 sps:$4 sm:$0xff]  }
 0x2e7   :  { %4690 = vmatprep.subr.bf16.mxu0 %v6672_v60  ;;  %v6709_v60 = vld [vmem:[#allocation5 + $0x5c8] ss:$48 sps:$4 sm:$0xff]  }
 0x2e9   :  { %4615 = vmatpush1.bf16.msra.mxu1 %v6667_v2  ;;  %v4259_v2 = vsel %vm2568_vm7, %v6714_v58, 0  ;;  %v6731_v58 = vld [vmem:[%s7425_s8 + $0x88] sm:$0xff]  }
 0x2ea   :  { %4691 = vmatpush1.bf16.msra.mxu0 %v6670_v4  ;;  %4616 = vmatprep.subr.bf16.mxu1 %v6675_v6 }
 0x2eb   :  { %v2967_v14 = vpop.f32.mrb[32].mxu1  ;;  %4692 = vmatprep.subr.bf16.mxu0 %v6678_v9 }
 0x2ec   :  { %v7251_v16 = vadd.f32 %v7228_v49, %v2967_v14  ;;  %v2969_v53 = vpop.f32.mrb[33].mxu1  ;;  %v6688_v49 = vld [vmem:[#allocation5 + $0x448] ss:$48 sps:$4 sm:$0xff]  }
 0x2ed   :  { %v7254_v48 = vadd.f32 %v7230_v55, %v2969_v53  ;;  %v2971_v18 = vpop.f32.mrb[34].mxu1  ;;  %4617 = vmatpush1.bf16.msra.mxu1 %v6673_v25  ;;  %v6691_v55 = vld [vmem:[#allocation5 + $0x5c0] ss:$48 sps:$4 sm:$0xff]  }
 0x2ee   :  { %4693 = vmatpush1.bf16.msra.mxu0 %v6676_v10  ;;  %v2972_v50 = vpop.f32.mrb[35].mxu1  ;;  %4618 = vmatprep.subr.bf16.mxu1 %v6681_v12 }
 0x2ef   :  { %4694 = vmatprep.subr.bf16.mxu0 %v6684_v52 }
 0x2f1   :  { %4619 = vmatpush1.bf16.msra.mxu1 %v6679_v19 }
 0x2f2   :  { %4695 = vmatpush1.bf16.msra.mxu0 %v6682_v20  ;;  %4620 = vmatprep.subr.bf16.mxu1 %v6687_v15 }
 0x2f3   :  { %4696 = vmatprep.subr.bf16.mxu0 %v6690_v21 }
 0x2f5   :  { %4621 = vmatpush1.bf16.msra.mxu1 %v6685_v23 }
 0x2f6   :  { %4697 = vmatpush1.bf16.msra.mxu0 %v6688_v49  ;;  %4622 = vmatprep.subr.bf16.mxu1 %v6693_v24 }
 0x2f7   :  { %v3049_v32 = vpop.f32.mrb[24].mxu0  ;;  %v3090_v33 = vpop.f32.mrb[36].mxu1  ;;  %4698 = vmatprep.subr.bf16.mxu0 %v6696_v27 }
 0x2f8   :  { %v7256_v62 = vadd.f32 %v3090_v33, %v3049_v32  ;;  %v3051_v36 = vpop.f32.mrb[25].mxu0  ;;  %v3092_v37 = vpop.f32.mrb[37].mxu1  ;;  %v6718_v33 = vld [vmem:[%s7425_s8 + $0x48] sm:$0xff]  }
 0x2f9   :  { %v7258_v38 = vadd.f32 %v3092_v37, %v3051_v36  ;;  %v3053_v39 = vpop.f32.mrb[26].mxu0  ;;  %v3094_v13 = vpop.f32.mrb[38].mxu1  ;;  %4623 = vmatpush1.bf16.msra.mxu1 %v6691_v55  ;;  %v6720_v36 = vld [vmem:[%s7425_s8 + $0x50] sm:$0xff]  }
 0x2fa   :  { %4699 = vmatpush1.bf16.msra.mxu0 %v6694_v28  ;;  %v3054_v42 = vpop.f32.mrb[27].mxu0  ;;  %v3095_v43 = vpop.f32.mrb[39].mxu1  ;;  %4715 = vmatprep.subr.bf16.mxu1 %v6702_v57  ;;  %v6721_v37 = vld [vmem:[%s7425_s8 + $0x10] sm:$0xff]   ;;  %v6722_v39 = vld [vmem:[%s7425_s8 + $0x58] sm:$0xff]  }
 0x2fb   :  { %4700 = vmatprep.subr.bf16.mxu0 %v6699_v35  ;;  %v6719_v35 = vld [vmem:[%s7425_s8 + $0x8] sm:$0xff]   ;;  %v6723_v13 = vld [vmem:[%s7425_s8 + $0x18] sm:$0xff]   ;;  %v6725_v42 = vld [vmem:[%s7425_s8 + $0x20] sm:$0xff]  }
 0x2fc   :  { %4625 = vmatmul.mubr.bf16.vlgmr.msra.gmra.mrb[56].mxu1 %v7194_v34  ;;  %v7310_v43 = vld [vmem:[%s7424_s7] sm:$0xff] }
 0x2fd   :  { %4716 = vmatpush1.bf16.msra.mxu1 %v6700_v41  ;;  %4747 = vmatprep.mubr.bf16.mxu1 %v6886_v0  ;;  %v6724_v41 = vld [vmem:[%s7425_s8 + $0x60] sm:$0xff]  }
 0x2fe   :  { %4701 = vmatpush1.bf16.msra.mxu0 %v6697_v44  ;;  %4717 = vmatprep.subr.bf16.mxu1 %v6708_v45  ;;  %v6726_v44 = vld [vmem:[%s7425_s8 + $0x68] sm:$0xff]  }
 0x2ff   :  { %4702 = vmatprep.subr.bf16.mxu0 %v6705_v46  ;;  %v6727_v45 = vld [vmem:[%s7425_s8 + $0x28] sm:$0xff]   ;;  %v6728_v46 = vld [vmem:[%s7425_s8 + $0x80] sm:$0xff]  }
 0x301   :  { %4718 = vmatpush1.bf16.msra.mxu1 %v6706_v51  ;;  %v6729_v51 = vld [vmem:[%s7425_s8 + $0x70] sm:$0xff]  }
 0x302   :  { %4703 = vmatpush1.bf16.msra.mxu0 %v6703_v47  ;;  %5810 = vmatprep.subr.msk.bf16.mxu1 %vm2568_vm7, %v6712_v56  ;;  %v6888_v47 = vmov 0.0   ;;  %v4763_v56 = vrot.slane %v7310_v43, %v7055_v1 }
 0x303   :  { %4704 = vmatprep.subr.bf16.mxu0 %v6711_v59  ;;  %v4775_v59 = vrot.slane %v7310_v43, %v7070_v11 }
 0x304   :  { %v4339_v4 = vpop.f32.mrb[28].mxu0 }
 0x305   :  { %v4341_v6 = vpop.f32.mrb[29].mxu0  ;;  %4720 = vmatpush1.bf16.msra.mxu1 %v4259_v2  ;;  %v4767_v2 = vrot.slane %v7310_v43, %v7063_v3 }
 0x306   :  { %v4343_v9 = vpop.f32.mrb[30].mxu0  ;;  %4705 = vmatpush1.bf16.msra.mxu0 %v6709_v60  ;;  %v6734_v60 = vld [vmem:[%s7425_s8 + $0x90] sm:$0x3f]  }
 0x307   :  { %v4344_v0 = vpop.f32.mrb[31].mxu0  ;;  %5890 = vmatprep.subr.bf16.mxu0 %v6888_v47 }
 0x308   :  { %5811 = vmatmul.mubr.msk.bf16.vlgmr.msra.gmra.mrb[60].mxu1 %vm2564_vm8, %v7176_v17 }
 0x309   :  { %4707 = vmatmul.mubr.bf16.vlgmr.msra.gmra.mrb[48].mxu0 %v7194_v34 }
 0x30a   :  { %5891 = vmatpush3.bf16.msra.mxu0 %v6728_v46  ;;  %5896 = vmatprep.mubr.msk.bf16.mxu0 %vm6889_vm9, %v6888_v47 }
 0x30b   :  { %5892 = vmatprep.subr.bf16.mxu0 %v6888_v47 }
 0x30e   :  { %5893 = vmatpush3.bf16.msra.mxu0 %v6731_v58 }
 0x30f   :  { %5894 = vmatprep.subr.bf16.mxu0 %v6888_v47 }
 0x337   :  { %v4298_v25 = vpop.f32.mrb[40].mxu1 }
 0x338   :  { %v4299_v10 = vadd.f32 %v4298_v25, %v7182_v5  ;;  %v4300_v12 = vpop.f32.mrb[41].mxu1  ;;  %v5089_v25 = vsel %vm2568_vm7, %v6734_v60, 0 }
 0x339   :  { %v4301_v14 = vadd.f32 %v4300_v12, %v7185_v7  ;;  %v4302_v52 = vpop.f32.mrb[42].mxu1  ;;  %v6733_v12 = vld [vmem:[%s7425_s8 + $0x38] sm:$0xff]   ;;  %5895 = vmatpush3.bf16.msra.mxu0 %v5089_v25 }
 0x33a   :  { %v4340_v53 = vadd.f32 %v4339_v4, %v4299_v10  ;;  %v4303_v18 = vpop.f32.mrb[43].mxu1  ;;  %v6730_v4 = vld [vmem:[%s7425_s8 + $0x30] sm:$0xff]  }
 0x33b   :  { %v4342_v19 = vadd.f32 %v4341_v6, %v4301_v14  ;;  %v6732_v6 = vld [vmem:[%s7425_s8 + $0x78] sm:$0xff]   ;;  %v4778_v18 = vsub.s32 4, %v7052_v63 }
 0x33c   :  { %v4820_v9 = vadd.f32 %v4763_v56, %v4340_v53 }
 0x33d   :  { %v4821_v10 = vadd.f32 %v4767_v2, %v4342_v19 }
 0x33e   :  { %v5812_v14 = vmul.f32 -1.442695, %v4820_v9 }
 0x340   :  { %6735 = vpow2.f32 %v5812_v14 }
 0x343   :  { %v4421_v50 = vpop.f32.mrb[44].mxu1 }
 0x344   :  { %v4380_v20 = vpop.f32.mrb[32].mxu0  ;;  %v4423_v15 = vpop.f32.mrb[45].mxu1 }
 0x345   :  { %v4381_v21 = vadd.f32 %v4380_v20, %v7190_v29  ;;  %v4382_v23 = vpop.f32.mrb[33].mxu0  ;;  %v4425_v49 = vpop.f32.mrb[46].mxu1  ;;  %v6716_v29 = vld [vmem:[%s7425_s8 + $0x40] sm:$0xff]   ;;  %v4779_v20 = vrot.slane %v7310_v43, %v4778_v18 }
 0x346   :  { %v4383_v17 = vadd.f32 %v4382_v23, %v7192_v31  ;;  %v4384_v34 = vpop.f32.mrb[34].mxu0  ;;  %v4426_v24 = vpop.f32.mrb[47].mxu1  ;;  %v6717_v31 = vld [vmem:[%s7425_s8] sm:$0xff]   ;;  %5864 = vmatprep.subr.bf16.mxu1 %v6716_v29 }
 0x347   :  { %v7271_v27 = vadd.f32 %v4421_v50, %v4381_v21  ;;  %v4385_v5 = vpop.f32.mrb[35].mxu0  ;;  %5865 = vmatpush3.bf16.msra.mxu1 %v6717_v31  ;;  %v5813_v50 = vmul.f32 -1.442695, %v4821_v10 }
 0x348   :  { %v4424_v55 = vadd.f32 %v4423_v15, %v4383_v17  ;;  %5866 = vmatprep.subr.bf16.mxu1 %v6718_v33 }
 0x34a   :  { %v4823_v0 = vadd.f32 %v4775_v59, %v4424_v55  ;;  %v6736_v55 = vpop.eup %6735 }
 0x34b   :  { %5867 = vmatpush3.bf16.msra.mxu1 %v6719_v35  ;;  %v4841_v33 = vadd.f32 1.0, %v6736_v55 }
 0x34c   :  { %5868 = vmatprep.subr.bf16.mxu1 %v6720_v36  ;;  %v5815_v52 = vmul.f32 -1.442695, %v4823_v0 }
 0x34e   :  { %6737 = vpow2.f32 %v5815_v52 }
 0x34f   :  { %5869 = vmatpush3.bf16.msra.mxu1 %v6721_v37  ;;  %6739 = vpow2.f32 %v5813_v50 }
 0x350   :  { %v7273_v7 = vpop.f32.mrb[36].mxu0  ;;  %5870 = vmatprep.subr.bf16.mxu1 %v6722_v39 }
 0x351   :  { %v7275_v28 = vpop.f32.mrb[37].mxu0 }
 0x352   :  { %v4507_v57 = vpop.f32.mrb[38].mxu0 }
 0x353   :  { %v4508_v32 = vpop.f32.mrb[39].mxu0  ;;  %5871 = vmatpush3.bf16.msra.mxu1 %v6723_v13  ;;  %v4786_v57 = vsub.s32 6, %v7052_v63 }
 0x354   :  { %5872 = vmatprep.subr.bf16.mxu1 %v6724_v41 }
 0x355   :  { %v4787_v37 = vrot.slane %v7310_v43, %v4786_v57 }
 0x357   :  { %5873 = vmatpush3.bf16.msra.mxu1 %v6725_v42 }
 0x358   :  { %5874 = vmatprep.subr.bf16.mxu1 %v6726_v44  ;;  %v6738_v32 = vpop.eup %6737 }
 0x359   :  { %v6740_v29 = vpop.eup %6739  ;;  %v4859_v36 = vadd.f32 1.0, %v6738_v32 }
 0x35a   :  { %v4842_v13 = vadd.f32 1.0, %v6740_v29  ;;  %v4757_v29 = vld [vmem:[%s7424_s7 + $0x8] sm:$0xf] }
 0x35b   :  { %5875 = vmatpush3.bf16.msra.mxu1 %v6727_v45 }
 0x35c   :  { %5876 = vmatprep.subr.bf16.mxu1 %v6729_v51 }
 0x35f   :  { %5877 = vmatpush3.bf16.msra.mxu1 %v6730_v4 }
 0x360   :  { %5878 = vmatprep.subr.bf16.mxu1 %v6732_v6 }
 0x363   :  { %5879 = vmatpush3.bf16.msra.mxu1 %v6733_v12 }
 0x383   :  { %v4462_v53 = vpop.f32.mrb[48].mxu1 }
 0x384   :  { %v4463_v19 = vadd.f32 %v4462_v53, %v7215_v8  ;;  %v4464_v15 = vpop.f32.mrb[49].mxu1  ;;  %v4790_v8 = vsub.s32 7, %v7052_v63 }
 0x385   :  { %v4465_v21 = vadd.f32 %v4464_v15, %v7218_v22  ;;  %v4466_v23 = vpop.f32.mrb[50].mxu1 }
 0x386   :  { %v4504_v49 = vadd.f32 %v7273_v7, %v4463_v19  ;;  %v4467_v17 = vpop.f32.mrb[51].mxu1  ;;  %v4791_v42 = vrot.slane %v7310_v43, %v4790_v8 }
 0x387   :  { %v4506_v34 = vadd.f32 %v7275_v28, %v4465_v21 }
 0x388   :  { %v4824_v24 = vadd.f32 %v4779_v20, %v4504_v49  ;;  %v4782_v49 = vsub.s32 5, %v7052_v63 }
 0x38a   :  { %v5816_v5 = vmul.f32 -1.442695, %v4824_v24  ;;  %v4783_v17 = vrot.slane %v7310_v43, %v4782_v49  ;;  %v4771_v24 = vrot.slane %v7310_v43, %v7079_v40 }
 0x38c   :  { %6741 = vpow2.f32 %v5816_v5  ;;  %v4825_v5 = vadd.f32 %v4783_v17, %v4506_v34  ;;  %v4822_v55 = vadd.f32 %v4771_v24, %v7271_v27 }
 0x38d   :  { %6743 = vrcp.f32 %v4841_v33 }
 0x38e   :  { %6745 = vrcp.f32 %v4859_v36  ;;  %v5817_v57 = vmul.f32 -1.442695, %v4825_v5  ;;  %v5814_v32 = vmul.f32 -1.442695, %v4822_v55  ;;  %v4799_v36 = vrot.slane %v4757_v29, %v7063_v3 }
 0x38f   :  { %v4585_v31 = vpop.f32.mrb[52].mxu1  ;;  %6747 = vrcp.f32 %v4842_v13  ;;  %v4803_v3 = vrot.slane %v4757_v29, %v7079_v40 }
 0x390   :  { %v4544_v35 = vpop.f32.mrb[40].mxu0  ;;  %v4587_v22 = vpop.f32.mrb[53].mxu1 }
 0x391   :  { %v4545_v7 = vadd.f32 %v4544_v35, %v7220_v26  ;;  %v4546_v28 = vpop.f32.mrb[41].mxu0  ;;  %v4589_v39 = vpop.f32.mrb[54].mxu1 }
 0x392   :  { %v4547_v41 = vadd.f32 %v4546_v28, %v7222_v30  ;;  %v4548_v44 = vpop.f32.mrb[42].mxu0  ;;  %v4590_v45 = vpop.f32.mrb[55].mxu1  ;;  %v953_v30 = vld [vmem:[%s7431_s14] sm:$0x3f] }
 0x393   :  { %v4586_v46 = vadd.f32 %v4585_v31, %v4545_v7  ;;  %v4549_v47 = vpop.f32.mrb[43].mxu0  ;;  %v4897_v6 = vrot.slane %v953_v30, %v7086_v54  ;;  %v4890_v44 = vcombine.high %v953_v30, %v953_v30 }
 0x394   :  { %v4588_v51 = vadd.f32 %v4587_v22, %v4547_v41  ;;  %v4795_v22 = vrot.slane %v4757_v29, %v7055_v1 }
 0x395   :  { %v4826_v56 = vadd.f32 %v4787_v37, %v4586_v46  ;;  %v4905_v12 = vcombine.high %v4897_v6, %v4897_v6  ;;  %v4904_v46 = vrot.slane %v4890_v44, %v7086_v54 }
 0x396   :  { %v6742_v58 = vpop.eup %6741  ;;  %v4827_v26 = vadd.f32 %v4791_v42, %v4588_v51 }
 0x397   :  { %v4860_v59 = vadd.f32 1.0, %v6742_v58  ;;  %6749 = vtanh.f32 %v4826_v56  ;;  %v6744_v4 = vpop.eup %6743 }
 0x398   :  { %6751 = vtanh.f32 %v4827_v26  ;;  %v6746_v0 = vpop.eup %6745  ;;  %v4807_v26 = vrot.slane %v4757_v29, %v7070_v11 }
 0x399   :  { %6753 = vrcp.f32 %v4860_v59  ;;  %v6748_v10 = vpop.eup %6747  ;;  %v4909_v18 = vmul.f32 %v6746_v0, %v4897_v6 }
 0x39a   :  { %6755 = vpow2.f32 %v5817_v57 }
 0x39b   :  { %6757 = vpow2.f32 %v5814_v32 }
 0x39c   :  { %v4667_v60 = vpop.f32.mrb[44].mxu0 }
 0x39d   :  { %v4669_v2 = vpop.f32.mrb[45].mxu0 }
 0x39e   :  { %v4671_v9 = vpop.f32.mrb[46].mxu0 }
 0x39f   :  { %v4672_v25 = vpop.f32.mrb[47].mxu0 }
 0x3a1   :  { %v6750_v14 = vpop.eup %6749 }
 0x3a2   :  { %v6752_v52 = vpop.eup %6751  ;;  %v4912_v50 = vmul.f32 %v6750_v14, %v6744_v4 }
 0x3a3   :  { %v6754_v53 = vpop.eup %6753  ;;  %v4913_v19 = vmul.f32 %v6752_v52, %v6748_v10 }
 0x3a4   :  { %v7362_v20 = vadd.f32 %v4912_v50, %v4909_v18  ;;  %v4910_v15 = vmul.f32 %v6754_v53, %v4905_v12  ;;  %v6756_v8 = vpop.eup %6755 }
 0x3a5   :  { %v6758_v31 = vpop.eup %6757  ;;  %v4861_v63 = vadd.f32 1.0, %v6756_v8 }
 0x3a6   :  { %v7364_v21 = vadd.f32 %v4913_v19, %v4910_v15  ;;  %v4843_v34 = vadd.f32 1.0, %v6758_v31 }
 0x3a7   :  { %6759 = vrcp.f32 %v4861_v63 }
 0x3a8   :  { %v5203_v23 = vcombine.low %v7362_v20, %v7364_v21  ;;  %6761 = vrcp.f32 %v4843_v34 }
 0x3aa   :  { %v5210_v11 = vrot.slane %v5203_v23, %v7086_v54 }
 0x3b1   :  { %v6760_v56 = vpop.eup %6759 }
 0x3b2   :  { %v6762_v30 = vpop.eup %6761  ;;  %v4911_v0 = vmul.f32 %v6760_v56, %v4904_v46 }
 0x3cf   :  { %v4626_v33 = vpop.f32.mrb[56].mxu1 }
 0x3d0   :  { %v4627_v35 = vadd.f32 %v4626_v33, %v7251_v16  ;;  %v4628_v43 = vpop.f32.mrb[57].mxu1 }
 0x3d1   :  { %v4629_v27 = vadd.f32 %v4628_v43, %v7254_v48  ;;  %v4630_v7 = vpop.f32.mrb[58].mxu1 }
 0x3d2   :  { %v4668_v37 = vadd.f32 %v4667_v60, %v4627_v35  ;;  %v4631_v28 = vpop.f32.mrb[59].mxu1 }
 0x3d3   :  { %v4670_v39 = vadd.f32 %v4669_v2, %v4629_v27  ;;  %v5821_v27 = vld [vmem:[%s7426_s9] ss:$0 sm:$0xff] }
 0x3d4   :  { %v4828_v13 = vadd.f32 %v4795_v22, %v4668_v37 }
 0x3d5   :  { %v4829_v41 = vadd.f32 %v4799_v36, %v4670_v39 }
 0x3d6   :  { %6763 = vtanh.f32 %v4828_v13 }
 0x3d7   :  { %v5818_v42 = vmul.f32 -1.442695, %v4829_v41 }
 0x3d9   :  { %6765 = vpow2.f32 %v5818_v42 }
 0x3da   :  { %6767 = vtanh.f32 %v7362_v20 }
 0x3db   :  { %v4749_v16 = vpop.f32.mrb[60].mxu1 }
 0x3dc   :  { %v4708_v1 = vpop.f32.mrb[48].mxu0  ;;  %v4751_v45 = vpop.f32.mrb[61].mxu1 }
 0x3dd   :  { %v4709_v48 = vadd.f32 %v4708_v1, %v7256_v62  ;;  %v4710_v47 = vpop.f32.mrb[49].mxu0  ;;  %v4753_v51 = vpop.f32.mrb[62].mxu1 }
 0x3de   :  { %v4711_v58 = vadd.f32 %v4710_v47, %v7258_v38  ;;  %v4712_v59 = vpop.f32.mrb[50].mxu0  ;;  %v4754_v60 = vpop.f32.mrb[63].mxu1 }
 0x3df   :  { %v4750_v2 = vadd.f32 %v4749_v16, %v4709_v48  ;;  %v4713_v4 = vpop.f32.mrb[51].mxu0 }
 0x3e0   :  { %v6764_v6 = vpop.eup %6763  ;;  %v4752_v9 = vadd.f32 %v4751_v45, %v4711_v58 }
 0x3e1   :  { %v4914_v25 = vmul.f32 %v6764_v6, %v6762_v30  ;;  %v4830_v10 = vadd.f32 %v4803_v3, %v4750_v2 }
 0x3e2   :  { %v4831_v62 = vadd.f32 %v4807_v26, %v4752_v9 }
 0x3e3   :  { %v6766_v12 = vpop.eup %6765  ;;  %v4917_v40 = vadd.f32 %v4914_v25, %v4911_v0  ;;  %v5819_v14 = vmul.f32 -1.442695, %v4830_v10 }
 0x3e4   :  { %v4880_v52 = vadd.f32 1.0, %v6766_v12  ;;  %v5820_v18 = vmul.f32 -1.442695, %v4831_v62  ;;  %v6768_v53 = vpop.eup %6767 }
 0x3e5   :  { %v5217_v38 = vrot.slane %v4917_v40, %v7086_v54 }
 0x3e6   :  { %6769 = vrcp.f32 %v4880_v52 }
 0x3e7   :  { %v5218_v50 = vcombine.low %v5210_v11, %v5217_v38  ;;  %6771 = vpow2.f32 %v5819_v14 }
 0x3e8   :  { %6773 = vpow2.f32 %v5820_v18 }
 0x3e9   :  { %5220 = vst.msk [vmem:[%s7431_s14] sm:$0x3f] %vm7043_vm5, %v5218_v50  ;;  %6775 = vtanh.f32 %v7364_v21 }
 0x3ea   :  { %6777 = vtanh.f32 %v4917_v40 }
 0x3f0   :  { %v6770_v19 = vpop.eup %6769 }
 0x3f1   :  { %v6772_v15 = vpop.eup %6771  ;;  %v4921_v49 = vmul.f32 %v6770_v19, %v6768_v53 }
 0x3f2   :  { %v6774_v17 = vpop.eup %6773  ;;  %v4881_v20 = vadd.f32 1.0, %v6772_v15 }
 0x3f3   :  { %v4882_v23 = vadd.f32 1.0, %v6774_v17  ;;  %v6776_v24 = vpop.eup %6775  ;;  %v4924_v63 = vpack.c.bf16 %v4921_v49, %v4921_v49 }
 0x3f4   :  { %6779 = vrcp.f32 %v4881_v20  ;;  %v6778_v5 = vpop.eup %6777 }
 0x3f5   :  { %6781 = vrcp.f32 %v4882_v23 }
 0x3fe   :  { %v6780_v55 = vpop.eup %6779 }
 0x3ff   :  { %v6782_v57 = vpop.eup %6781  ;;  %v4922_v32 = vmul.f32 %v6780_v55, %v6776_v24 }
 0x400   :  { %v4923_v8 = vmul.f32 %v6782_v57, %v6778_v5 }
 0x401   :  { %v4925_v29 = vpack.c.bf16 %v4922_v32, %v4922_v32  ;;  %v5177_v31 = vcombine.low %v4921_v49, %v4922_v32 }
 0x402   :  { %v5191_v33 = vrot.slane %v4923_v8, %v7086_v54  ;;  %v4926_v35 = vpack.c.bf16 %v4923_v8, %v4923_v8 }
 0x403   :  { %5123 = vmatprep.mubr.bf16.mxu1 %v4925_v29  ;;  %v5184_v22 = vrot.slane %v5177_v31, %v7086_v54 }
 0x404   :  { %5124 = vmatmul.mubr.bf16.vlgmr.msra.gmra.mrb[64].mxu1 %v4924_v63  ;;  %5897 = vmatmul.mubr.msk.bf16.vlgmr.msra.gmra.mrb[52].mxu0 %vm2564_vm8, %v4926_v35 }
 0x405   :  { %v5192_v21 = vcombine.low %v5184_v22, %v5191_v33 }
 0x407   :  { %5199 = vst.msk [vmem:[%s7430_s13] sm:$0x3f] %vm7043_vm5, %v5192_v21  ;;  %s6851_s13 = scalar_lea.vmem %s5228_s6, 32 }
 0x408   :  { %p6852_p10 = scmp.ne.s32.totalorder %s5228_s6, %s6851_s13  ;;  %p6857_p12 = scmp.lt.s32.totalorder %s6851_s13, %s6851_s13 }
 0x40a   :  { %p6858_p13 = por %p6857_p12, %p6856_p11 }
 0x40c   :  { %p6859_p0 = pnand %p6858_p13, %p6852_p10 }
 0x4d7   :  { %v5880_v43 = vpop.f32.mrb[64].mxu1  ;;  %v5165_v34 = vpop.f32.mrb[52].mxu0 }
 0x4d8   :  { %v5881_v36 = vpop.f32.mrb[65].mxu1  ;;  %v5898_v7 = vpop.f32.mrb[53].mxu0 }
 0x4d9   :  { %v5882_v37 = vadd.f32 %v5881_v36, %v5880_v43  ;;  %v5883_v54 = vpop.f32.mrb[66].mxu1  ;;  %v5168_v28 = vpop.f32.mrb[54].mxu0 }
 0x4da   :  { %v5884_v39 = vpop.f32.mrb[67].mxu1  ;;  %v5899_v13 = vpop.f32.mrb[55].mxu0 }
 0x4db   :  { %v5126_v41 = vadd.f32 %v5882_v37, %v5821_v27 }
 0x4dd   :  { %v5166_v42 = vadd.f32 %v5165_v34, %v5126_v41 }
 0x4df   :  { %6783 = vtanh.f32 %v5166_v42 }
 0x4e9   :  { %v6784_v61 = vpop.eup %6783 }
 0x4ea   :  { %5173 = vst.msk [vmem:[#allocation8] sm:$0x3] %vm5172_vm10, %v6784_v61 }
 0x4eb   :  { %6862 = shalt.err (!%p6859_p0)
}
 0x4ec   :  { %s6863_s11 = scalar_lea.hbm %s7429_s12, 32 }
 0x4ed   :  { %p6864_p1 = scmp.ne.s32.totalorder %s7429_s12, %s6863_s11  ;;  %p6867_p2 = scmp.lt.u32.totalorder %s6863_s11, %s7429_s12 }
 0x4ef   :  { %p6869_p3 = pnand %p6867_p2, %p6864_p1 }
 0x4f1   :  { %6872 = shalt.err (!%p6869_p3)
}
 0x4f2   :  { %5230 = dma.vmem_to_hbm [thread:$0]  %s5228_s6, 32, %s7429_s12, [#allocation4]  }
 0x4f3   :  { %6877 = dma.done.wait [#allocation4], 32  }
 0x4f4   :  { %6878 = vsyncadd [#allocation4], 4294967264 }
 0x4f5   :  { %5242 = vsyncpa [#allocation3], 1 }
 0x4f6   :  { %5243 = vsyncpa [#allocation6], 1 }
 0x4f7   :  { %5244 = vsyncpa [#allocation4], 1 }

</bundles_post_ra>
